<compile_context>
chip_gen: v7x
topology: tpu7x:2x2x1
jax: 0.10.0
libtpu: 0.0.40
codegen_flags: <defaults>
</compile_context>

<pallas_src>
import functools

import jax
import jax.numpy as jnp
from jax import lax
from jax.experimental import pallas as pl
from jax.experimental.pallas import tpu as pltpu


def _ds(start, size, stride):
    if stride == 1:
        return pl.ds(start, size)
    return pl.ds(start, size, stride=stride)


def _res_block_kernel(
    x_ref, w1_ref, b1_ref, w2_ref, b2_ref, o_ref,
    xpad_s, mid_s, patch1_s, patch2_s, yout_s,
    *, stride, h, w, c_in, c_out, h_out, w_out, imgs,
):
    """Processes `imgs` whole images per grid step; everything stays in VMEM.

    x_ref   : (imgs, h, w, c_in)                 input images (NHWC)
    w1_ref  : (9*c_in, c_out)                    conv1 weights, BN1 folded, im2col order
    b1_ref  : (1, c_out)                         conv1 bias, BN1 folded
    w2_ref  : (9*c_out + c_in, c_out)            conv2 weights, BN2 folded, + identity
                                                 shortcut rows (eye(c_in, c_out))
    b2_ref  : (1, c_out)                         conv2 bias, BN2 folded
    o_ref   : (imgs*h_out, w_out*c_out)          lane-dense output slab (== NHWC bytes)
    xpad_s  : VMEM (imgs, h_out*stride+2, w+2, c_in)  spatially padded input
    mid_s   : VMEM (imgs, h_out+2, w_out+2, c_out)    spatially padded conv1 activation
    patch1_s: VMEM (imgs*h_out*w_out, 9*c_in)         im2col matrix for conv1
    patch2_s: VMEM (imgs*h_out*w_out, 9*c_out+c_in)   im2col matrix for conv2 + residual
    yout_s  : VMEM (imgs*h_out*w_out, c_out)          staging for lane-dense store
    """
    f32 = jnp.float32
    npix = h_out * w_out
    rows = imgs * npix

    def zero_borders(ref, hh, ww, c):
        # Zero only the 1-px (plus stride-tail) border strips; the interior is
        # overwritten with data below, so the whole buffer is re-initialized on
        # every grid step (required for correctness under megacore sharding).
        H, W = ref.shape[1], ref.shape[2]
        ref[:, 0:1, :, :] = jnp.zeros((imgs, 1, W, c), f32)
        ref[:, hh + 1:, :, :] = jnp.zeros((imgs, H - (hh + 1), W, c), f32)
        ref[:, :, 0:1, :] = jnp.zeros((imgs, H, 1, c), f32)
        ref[:, :, ww + 1:, :] = jnp.zeros((imgs, H, W - (ww + 1), c), f32)

    def pack_taps(padded_ref, patch_ref, c, s, res_lane=None):
        # im2col packing: for each kernel column (dx) do ONE strided read of the
        # padded buffer; the 3 kernel rows (dy) are carved out of that value with
        # leading-dim slicing only (pure addressing -- no per-tap strided read,
        # no 2x row over-fetch).
        span = h_out * s
        for dx in range(3):
            col_slab = padded_ref[:, :, _ds(dx, w_out, s), :]       # (imgs, H, w_out, c)
            for dy in range(3):
                p = col_slab[:, dy:dy + span]                        # (imgs, span, w_out, c)
                p = p.reshape(imgs, h_out, s, w_out, c)[:, :, 0]     # (imgs, h_out, w_out, c)
                p = p.reshape(rows, c)
                t = dy * 3 + dx
                patch_ref[:, t * c:(t + 1) * c] = p
                if res_lane is not None and dy == 1 and dx == 1:
                    # Reuse the center tap as the IdentityPadding residual: it is
                    # exactly x[:, ::stride, ::stride, :] (MaxPool2d(1, stride)).
                    patch2_s[:, res_lane:res_lane + c] = p

    # ---- stage the input, spatially zero-padded, in VMEM ------------------------
    zero_borders(xpad_s, h, w, c_in)
    xpad_s[:, 1:h + 1, 1:w + 1, :] = x_ref[...].astype(f32)

    # ---- conv1 (3x3, stride) + folded BN1 + ReLU: ONE im2col matmul --------------
    pack_taps(xpad_s, patch1_s, c_in, stride, res_lane=9 * c_out)
    y1 = jnp.dot(patch1_s[...], w1_ref[...], preferred_element_type=f32)
    y1 = jnp.maximum(y1 + b1_ref[...], 0.0)                          # (rows, c_out)

    # ---- stage conv1 output, spatially zero-padded, for conv2 --------------------
    zero_borders(mid_s, h_out, w_out, c_out)
    mid_s[:, 1:h_out + 1, 1:w_out + 1, :] = y1.reshape(imgs, h_out, w_out, c_out)

    # ---- conv2 (3x3, stride 1) + folded BN2 + residual + ReLU: ONE matmul --------
    #      (the residual channel-pad/add rides along as the eye(c_in, c_out) rows
    #       appended to w2_ref, so no extra VPU add / lane concat is needed)
    pack_taps(mid_s, patch2_s, c_out, 1)
    out = jnp.dot(patch2_s[...], w2_ref[...], preferred_element_type=f32)
    out = jnp.maximum(out + b2_ref[...], 0.0)                        # (rows, c_out)

    # ---- lane-dense store: regroup (pixel, channel) rows into (row, w_out*c_out)
    #      lanes via a scratch round-trip + strided sublane reads, so the copy-out
    #      DMA sees a w_out*c_out-wide block instead of c_out(=8) masked lanes.
    #      TODO(synk): skip this regroup (store `out` directly) once c_out >= 128.
    yout_s[...] = out
    for j in range(w_out):
        col = yout_s[_ds(j, imgs * h_out, w_out), :]                 # pixels (b, i, j)
        o_ref[:, j * c_out:(j + 1) * c_out] = col.astype(o_ref.dtype)


def fold_bn_into_conv(w_hwio, conv_bias, gamma, beta, mean, var, eps=1e-5):
    """Fold eval-mode BatchNorm2d into the preceding conv; return im2col-flat weights."""
    scale = gamma / jnp.sqrt(var + eps)                  # (c_out,)
    w_folded = w_hwio * scale                            # (3,3,ci,co) * (co,)
    b_folded = (conv_bias - mean) * scale + beta
    kh, kw, ci, co = w_hwio.shape
    return w_folded.reshape(kh * kw * ci, co), b_folded.reshape(1, co)


def _images_per_step(n, npix, target_rows=256):
    """Largest divisor of n keeping imgs*npix near target_rows (amortize grid steps)."""
    cap = max(1, target_rows // max(npix, 1))
    best = 1
    for d in range(1, n + 1):
        if n % d == 0 and d <= cap:
            best = d
    return best


def res_block_forward(x_nhwc, w1_flat, b1, w2_flat, b2, *, stride):
    """Fused ResBlock forward (res_option='A' / identity shortcut), NHWC in/out."""
    n, h, w, c_in = x_nhwc.shape
    c_out = w1_flat.shape[-1]
    assert w1_flat.shape[0] == 9 * c_in and w2_flat.shape[0] == 9 * c_out
    assert c_out >= c_in, "IdentityPadding requires num_filters >= channels_in"
    # conv(3x3, pad=1, stride) and MaxPool2d(1, stride) share this output size.
    h_out = (h - 1) // stride + 1
    w_out = (w - 1) // stride + 1
    npix = h_out * w_out

    # Fold the IdentityPadding shortcut into conv2's matmul: extra K rows that map the
    # (strided, channel-zero-padded) input straight onto the first c_in output channels.
    w2_ext = jnp.concatenate(
        [w2_flat, jnp.eye(c_in, c_out, dtype=w2_flat.dtype)], axis=0)

    imgs = _images_per_step(n, npix)
    rows = imgs * npix

    kernel = functools.partial(
        _res_block_kernel, stride=stride, h=h, w=w,
        c_in=c_in, c_out=c_out, h_out=h_out, w_out=w_out, imgs=imgs,
    )

    out_flat = pl.pallas_call(
        kernel,
        # Lane-dense output slab: same bytes as NHWC (n, h_out, w_out, c_out).
        out_shape=jax.ShapeDtypeStruct((n * h_out, w_out * c_out), x_nhwc.dtype),
        grid_spec=pltpu.PrefetchScalarGridSpec(
            num_scalar_prefetch=0,
            grid=(n // imgs,),                       # several whole images per step
            in_specs=[
                pl.BlockSpec((imgs, h, w, c_in), lambda g: (g, 0, 0, 0)),
                pl.BlockSpec((9 * c_in, c_out), lambda g: (0, 0)),
                pl.BlockSpec((1, c_out), lambda g: (0, 0)),
                pl.BlockSpec((9 * c_out + c_in, c_out), lambda g: (0, 0)),
                pl.BlockSpec((1, c_out), lambda g: (0, 0)),
            ],
            out_specs=pl.BlockSpec(
                (imgs * h_out, w_out * c_out), lambda g: (g, 0)),
            scratch_shapes=[
                # tall enough for the dy-window reads at any h/stride combination
                pltpu.VMEM((imgs, h_out * stride + 2, w + 2, c_in), jnp.float32),
                pltpu.VMEM((imgs, h_out + 2, w_out + 2, c_out), jnp.float32),
                pltpu.VMEM((rows, 9 * c_in), jnp.float32),
                pltpu.VMEM((rows, 9 * c_out + c_in), jnp.float32),
                pltpu.VMEM((rows, c_out), jnp.float32),
            ],
        ),
        compiler_params=pltpu.CompilerParams(
            dimension_semantics=("parallel",),       # batch groups shard on v7x cores
            vmem_limit_bytes=32 * 1024 * 1024,       # explicit, safe on v5e/v6e/v7x
        ),
    )(x_nhwc, w1_flat, b1, w2_ext, b2)

    # Contiguous (free) reshape back to NHWC; no transpose.
    return out_flat.reshape(n, h_out, w_out, c_out)


if __name__ == "__main__":
    # ResBlock(num_filters=8, channels_in=4, stride=2, res_option='A')
    num_filters, channels_in, stride = 8, 4, 2
    n, h, w = 2, 16, 16
    eps = 1e-5

    keys = jax.random.split(jax.random.PRNGKey(0), 13)
    x = jax.random.normal(keys[0], (n, h, w, channels_in), dtype=jnp.float32)

    # conv1 / bn1 parameters (HWIO weights)
    w1 = 0.2 * jax.random.normal(keys[1], (3, 3, channels_in, num_filters), jnp.float32)
    b1c = 0.1 * jax.random.normal(keys[2], (num_filters,), jnp.float32)
    g1 = jax.random.uniform(keys[3], (num_filters,), jnp.float32, 0.5, 1.5)
    be1 = 0.1 * jax.random.normal(keys[4], (num_filters,), jnp.float32)
    m1 = 0.1 * jax.random.normal(keys[5], (num_filters,), jnp.float32)
    v1 = jax.random.uniform(keys[6], (num_filters,), jnp.float32, 0.5, 1.5)

    # conv2 / bn2 parameters
    w2 = 0.2 * jax.random.normal(keys[7], (3, 3, num_filters, num_filters), jnp.float32)
    b2c = 0.1 * jax.random.normal(keys[8], (num_filters,), jnp.float32)
    g2 = jax.random.uniform(keys[9], (num_filters,), jnp.float32, 0.5, 1.5)
    be2 = 0.1 * jax.random.normal(keys[10], (num_filters,), jnp.float32)
    m2 = 0.1 * jax.random.normal(keys[11], (num_filters,), jnp.float32)
    v2 = jax.random.uniform(keys[12], (num_filters,), jnp.float32, 0.5, 1.5)

    w1_flat, b1f = fold_bn_into_conv(w1, b1c, g1, be1, m1, v1, eps)
    w2_flat, b2f = fold_bn_into_conv(w2, b2c, g2, be2, m2, v2, eps)

    out = res_block_forward(x, w1_flat, b1f, w2_flat, b2f, stride=stride)
    out = jax.block_until_ready(out)

    # ---- pure-JAX reference of the PyTorch ResBlock forward (eval-mode BN) -------
    def bn(y, g, b, m, v):
        return (y - m) / jnp.sqrt(v + eps) * g + b

    dn = ("NHWC", "HWIO", "NHWC")
    y = lax.conv_general_dilated(
        x, w1, (stride, stride), ((1, 1), (1, 1)), dimension_numbers=dn) + b1c
    y = jnp.maximum(bn(y, g1, be1, m1, v1), 0.0)
    z = lax.conv_general_dilated(
        y, w2, (1, 1), ((1, 1), (1, 1)), dimension_numbers=dn) + b2c
    z = bn(z, g2, be2, m2, v2)
    residual = jnp.pad(
        x, ((0, 0), (0, 0), (0, 0), (0, num_filters - channels_in))
    )[:, ::stride, ::stride, :]                      # IdentityPadding
    ref = jnp.maximum(z + residual, 0.0)

    assert out.shape == ref.shape, (out.shape, ref.shape)
    assert out.dtype == ref.dtype, (out.dtype, ref.dtype)
    max_err = float(jnp.max(jnp.abs(out - ref)))
    assert jnp.allclose(out, ref, rtol=1e-4, atol=1e-4), f"max |err| = {max_err}"

    print("KERNEL_OK")
</pallas_src>

<mosaic_0001>
module attributes {stable_mosaic.version = 11 : i64} {
  func.func @_res_block_kernel(%arg0: i32, %arg1: memref<2x16x16x4xf32, #tpu.memory_space<vmem>>, %arg2: memref<36x8xf32, #tpu.memory_space<vmem>>, %arg3: memref<1x8xf32, #tpu.memory_space<vmem>>, %arg4: memref<76x8xf32, #tpu.memory_space<vmem>>, %arg5: memref<1x8xf32, #tpu.memory_space<vmem>>, %arg6: memref<16x64xf32, #tpu.memory_space<vmem>>, %arg7: memref<2x18x18x4xf32, #tpu.memory_space<vmem>>, %arg8: memref<2x10x10x8xf32, #tpu.memory_space<vmem>>, %arg9: memref<128x36xf32, #tpu.memory_space<vmem>>, %arg10: memref<128x76xf32, #tpu.memory_space<vmem>>, %arg11: memref<128x8xf32, #tpu.memory_space<vmem>>) attributes {dimension_semantics = [#tpu.dimension_semantics<parallel>], iteration_bounds = array<i64: 1>, scalar_prefetch = 0 : i64, scratch_operands = 5 : i64, tpu.core_type = #tpu.core_type<tc>, window_params = [{transform_indices = @transform_0, window_bounds = array<i64: 2, 16, 16, 4>}, {pipeline_mode = #tpu.pipeline_mode<synchronous>, transform_indices = @transform_1, window_bounds = array<i64: 36, 8>}, {pipeline_mode = #tpu.pipeline_mode<synchronous>, transform_indices = @transform_2, window_bounds = array<i64: 1, 8>}, {pipeline_mode = #tpu.pipeline_mode<synchronous>, transform_indices = @transform_3, window_bounds = array<i64: 76, 8>}, {pipeline_mode = #tpu.pipeline_mode<synchronous>, transform_indices = @transform_4, window_bounds = array<i64: 1, 8>}, {transform_indices = @transform_5, window_bounds = array<i64: 16, 64>}]} {
    %cst = arith.constant 0.000000e+00 : f32
    %0 = vector.broadcast %cst : f32 to vector<2x1x18x4xf32>
    %c0 = arith.constant 0 : index
    %c0_0 = arith.constant 0 : index
    %c0_1 = arith.constant 0 : index
    %c0_2 = arith.constant 0 : index
    %1 = vector.load %arg7[%c0, %c0_0, %c0_1, %c0_2] : memref<2x18x18x4xf32, #tpu.memory_space<vmem>>, vector<2x1x18x4xf32>
    tpu.vector_store %arg7[%c0, %c0_0, %c0_1, %c0_2], %0 {strides = array<i32>} : memref<2x18x18x4xf32, #tpu.memory_space<vmem>>, vector<2x1x18x4xf32>,
    %cst_3 = arith.constant 0.000000e+00 : f32
    %2 = vector.broadcast %cst_3 : f32 to vector<2x1x18x4xf32>
    %c0_4 = arith.constant 0 : index
    %c17 = arith.constant 17 : index
    %c0_5 = arith.constant 0 : index
    %c0_6 = arith.constant 0 : index
    %3 = vector.load %arg7[%c0_4, %c17, %c0_5, %c0_6] : memref<2x18x18x4xf32, #tpu.memory_space<vmem>>, vector<2x1x18x4xf32>
    tpu.vector_store %arg7[%c0_4, %c17, %c0_5, %c0_6], %2 {strides = array<i32>} : memref<2x18x18x4xf32, #tpu.memory_space<vmem>>, vector<2x1x18x4xf32>,
    %cst_7 = arith.constant 0.000000e+00 : f32
    %4 = vector.broadcast %cst_7 : f32 to vector<2x18x1x4xf32>
    %c0_8 = arith.constant 0 : index
    %c0_9 = arith.constant 0 : index
    %c0_10 = arith.constant 0 : index
    %c0_11 = arith.constant 0 : index
    %5 = vector.load %arg7[%c0_8, %c0_9, %c0_10, %c0_11] : memref<2x18x18x4xf32, #tpu.memory_space<vmem>>, vector<2x18x1x4xf32>
    tpu.vector_store %arg7[%c0_8, %c0_9, %c0_10, %c0_11], %4 {strides = array<i32>} : memref<2x18x18x4xf32, #tpu.memory_space<vmem>>, vector<2x18x1x4xf32>,
    %cst_12 = arith.constant 0.000000e+00 : f32
    %6 = vector.broadcast %cst_12 : f32 to vector<2x18x1x4xf32>
    %c0_13 = arith.constant 0 : index
    %c0_14 = arith.constant 0 : index
    %c17_15 = arith.constant 17 : index
    %c0_16 = arith.constant 0 : index
    %7 = vector.load %arg7[%c0_13, %c0_14, %c17_15, %c0_16] : memref<2x18x18x4xf32, #tpu.memory_space<vmem>>, vector<2x18x1x4xf32>
    tpu.vector_store %arg7[%c0_13, %c0_14, %c17_15, %c0_16], %6 {strides = array<i32>} : memref<2x18x18x4xf32, #tpu.memory_space<vmem>>, vector<2x18x1x4xf32>,
    %c0_17 = arith.constant 0 : index
    %c0_18 = arith.constant 0 : index
    %c0_19 = arith.constant 0 : index
    %c0_20 = arith.constant 0 : index
    %8 = vector.load %arg1[%c0_17, %c0_18, %c0_19, %c0_20] : memref<2x16x16x4xf32, #tpu.memory_space<vmem>>, vector<2x16x16x4xf32>
    %c0_21 = arith.constant 0 : index
    %c1 = arith.constant 1 : index
    %c1_22 = arith.constant 1 : index
    %c0_23 = arith.constant 0 : index
    %9 = vector.load %arg7[%c0_21, %c1, %c1_22, %c0_23] : memref<2x18x18x4xf32, #tpu.memory_space<vmem>>, vector<2x16x16x4xf32>
    tpu.vector_store %arg7[%c0_21, %c1, %c1_22, %c0_23], %8 {strides = array<i32>} : memref<2x18x18x4xf32, #tpu.memory_space<vmem>>, vector<2x16x16x4xf32>,
    %c0_24 = arith.constant 0 : index
    %c0_25 = arith.constant 0 : index
    %c0_26 = arith.constant 0 : index
    %c0_27 = arith.constant 0 : index
    %10 = tpu.strided_load %arg7[%c0_24, %c0_25, %c0_26, %c0_27] {strides = array<i32: 1, 1, 2, 1>} : memref<2x18x18x4xf32, #tpu.memory_space<vmem>>, vector<2x18x8x4xf32>
    %11 = vector.extract_strided_slice %10 {offsets = [0, 0, 0, 0], sizes = [2, 16, 8, 4], strides = [1, 1, 1, 1]} : vector<2x18x8x4xf32> to vector<2x16x8x4xf32>
    %12 = vector.shape_cast %11 : vector<2x16x8x4xf32> to vector<2x8x2x8x4xf32>
    %13 = vector.extract_strided_slice %12 {offsets = [0, 0, 0, 0, 0], sizes = [2, 8, 1, 8, 4], strides = [1, 1, 1, 1, 1]} : vector<2x8x2x8x4xf32> to vector<2x8x1x8x4xf32>
    %14 = vector.shape_cast %13 : vector<2x8x1x8x4xf32> to vector<2x8x8x4xf32>
    %15 = vector.shape_cast %14 : vector<2x8x8x4xf32> to vector<128x4xf32>
    %c0_28 = arith.constant 0 : index
    %c0_29 = arith.constant 0 : index
    %16 = vector.load %arg9[%c0_28, %c0_29] : memref<128x36xf32, #tpu.memory_space<vmem>>, vector<128x4xf32>
    tpu.vector_store %arg9[%c0_28, %c0_29], %15 {strides = array<i32>} : memref<128x36xf32, #tpu.memory_space<vmem>>, vector<128x4xf32>,
    %17 = vector.extract_strided_slice %10 {offsets = [0, 1, 0, 0], sizes = [2, 16, 8, 4], strides = [1, 1, 1, 1]} : vector<2x18x8x4xf32> to vector<2x16x8x4xf32>
    %18 = vector.shape_cast %17 : vector<2x16x8x4xf32> to vector<2x8x2x8x4xf32>
    %19 = vector.extract_strided_slice %18 {offsets = [0, 0, 0, 0, 0], sizes = [2, 8, 1, 8, 4], strides = [1, 1, 1, 1, 1]} : vector<2x8x2x8x4xf32> to vector<2x8x1x8x4xf32>
    %20 = vector.shape_cast %19 : vector<2x8x1x8x4xf32> to vector<2x8x8x4xf32>
    %21 = vector.shape_cast %20 : vector<2x8x8x4xf32> to vector<128x4xf32>
    %c0_30 = arith.constant 0 : index
    %c12 = arith.constant 12 : index
    %22 = vector.load %arg9[%c0_30, %c12] : memref<128x36xf32, #tpu.memory_space<vmem>>, vector<128x4xf32>
    tpu.vector_store %arg9[%c0_30, %c12], %21 {strides = array<i32>} : memref<128x36xf32, #tpu.memory_space<vmem>>, vector<128x4xf32>,
    %23 = vector.extract_strided_slice %10 {offsets = [0, 2, 0, 0], sizes = [2, 16, 8, 4], strides = [1, 1, 1, 1]} : vector<2x18x8x4xf32> to vector<2x16x8x4xf32>
    %24 = vector.shape_cast %23 : vector<2x16x8x4xf32> to vector<2x8x2x8x4xf32>
    %25 = vector.extract_strided_slice %24 {offsets = [0, 0, 0, 0, 0], sizes = [2, 8, 1, 8, 4], strides = [1, 1, 1, 1, 1]} : vector<2x8x2x8x4xf32> to vector<2x8x1x8x4xf32>
    %26 = vector.shape_cast %25 : vector<2x8x1x8x4xf32> to vector<2x8x8x4xf32>
    %27 = vector.shape_cast %26 : vector<2x8x8x4xf32> to vector<128x4xf32>
    %c0_31 = arith.constant 0 : index
    %c24 = arith.constant 24 : index
    %28 = vector.load %arg9[%c0_31, %c24] : memref<128x36xf32, #tpu.memory_space<vmem>>, vector<128x4xf32>
    tpu.vector_store %arg9[%c0_31, %c24], %27 {strides = array<i32>} : memref<128x36xf32, #tpu.memory_space<vmem>>, vector<128x4xf32>,
    %c0_32 = arith.constant 0 : index
    %c0_33 = arith.constant 0 : index
    %c1_34 = arith.constant 1 : index
    %c0_35 = arith.constant 0 : index
    %29 = tpu.strided_load %arg7[%c0_32, %c0_33, %c1_34, %c0_35] {strides = array<i32: 1, 1, 2, 1>} : memref<2x18x18x4xf32, #tpu.memory_space<vmem>>, vector<2x18x8x4xf32>
    %30 = vector.extract_strided_slice %29 {offsets = [0, 0, 0, 0], sizes = [2, 16, 8, 4], strides = [1, 1, 1, 1]} : vector<2x18x8x4xf32> to vector<2x16x8x4xf32>
    %31 = vector.shape_cast %30 : vector<2x16x8x4xf32> to vector<2x8x2x8x4xf32>
    %32 = vector.extract_strided_slice %31 {offsets = [0, 0, 0, 0, 0], sizes = [2, 8, 1, 8, 4], strides = [1, 1, 1, 1, 1]} : vector<2x8x2x8x4xf32> to vector<2x8x1x8x4xf32>
    %33 = vector.shape_cast %32 : vector<2x8x1x8x4xf32> to vector<2x8x8x4xf32>
    %34 = vector.shape_cast %33 : vector<2x8x8x4xf32> to vector<128x4xf32>
    %c0_36 = arith.constant 0 : index
    %c4 = arith.constant 4 : index
    %35 = vector.load %arg9[%c0_36, %c4] : memref<128x36xf32, #tpu.memory_space<vmem>>, vector<128x4xf32>
    tpu.vector_store %arg9[%c0_36, %c4], %34 {strides = array<i32>} : memref<128x36xf32, #tpu.memory_space<vmem>>, vector<128x4xf32>,
    %36 = vector.extract_strided_slice %29 {offsets = [0, 1, 0, 0], sizes = [2, 16, 8, 4], strides = [1, 1, 1, 1]} : vector<2x18x8x4xf32> to vector<2x16x8x4xf32>
    %37 = vector.shape_cast %36 : vector<2x16x8x4xf32> to vector<2x8x2x8x4xf32>
    %38 = vector.extract_strided_slice %37 {offsets = [0, 0, 0, 0, 0], sizes = [2, 8, 1, 8, 4], strides = [1, 1, 1, 1, 1]} : vector<2x8x2x8x4xf32> to vector<2x8x1x8x4xf32>
    %39 = vector.shape_cast %38 : vector<2x8x1x8x4xf32> to vector<2x8x8x4xf32>
    %40 = vector.shape_cast %39 : vector<2x8x8x4xf32> to vector<128x4xf32>
    %c0_37 = arith.constant 0 : index
    %c16 = arith.constant 16 : index
    %41 = vector.load %arg9[%c0_37, %c16] : memref<128x36xf32, #tpu.memory_space<vmem>>, vector<128x4xf32>
    tpu.vector_store %arg9[%c0_37, %c16], %40 {strides = array<i32>} : memref<128x36xf32, #tpu.memory_space<vmem>>, vector<128x4xf32>,
    %c0_38 = arith.constant 0 : index
    %c72 = arith.constant 72 : index
    %42 = vector.load %arg10[%c0_38, %c72] : memref<128x76xf32, #tpu.memory_space<vmem>>, vector<128x4xf32>
    tpu.vector_store %arg10[%c0_38, %c72], %40 {strides = array<i32>} : memref<128x76xf32, #tpu.memory_space<vmem>>, vector<128x4xf32>,
    %43 = vector.extract_strided_slice %29 {offsets = [0, 2, 0, 0], sizes = [2, 16, 8, 4], strides = [1, 1, 1, 1]} : vector<2x18x8x4xf32> to vector<2x16x8x4xf32>
    %44 = vector.shape_cast %43 : vector<2x16x8x4xf32> to vector<2x8x2x8x4xf32>
    %45 = vector.extract_strided_slice %44 {offsets = [0, 0, 0, 0, 0], sizes = [2, 8, 1, 8, 4], strides = [1, 1, 1, 1, 1]} : vector<2x8x2x8x4xf32> to vector<2x8x1x8x4xf32>
    %46 = vector.shape_cast %45 : vector<2x8x1x8x4xf32> to vector<2x8x8x4xf32>
    %47 = vector.shape_cast %46 : vector<2x8x8x4xf32> to vector<128x4xf32>
    %c0_39 = arith.constant 0 : index
    %c28 = arith.constant 28 : index
    %48 = vector.load %arg9[%c0_39, %c28] : memref<128x36xf32, #tpu.memory_space<vmem>>, vector<128x4xf32>
    tpu.vector_store %arg9[%c0_39, %c28], %47 {strides = array<i32>} : memref<128x36xf32, #tpu.memory_space<vmem>>, vector<128x4xf32>,
    %c0_40 = arith.constant 0 : index
    %c0_41 = arith.constant 0 : index
    %c2 = arith.constant 2 : index
    %c0_42 = arith.constant 0 : index
    %49 = tpu.strided_load %arg7[%c0_40, %c0_41, %c2, %c0_42] {strides = array<i32: 1, 1, 2, 1>} : memref<2x18x18x4xf32, #tpu.memory_space<vmem>>, vector<2x18x8x4xf32>
    %50 = vector.extract_strided_slice %49 {offsets = [0, 0, 0, 0], sizes = [2, 16, 8, 4], strides = [1, 1, 1, 1]} : vector<2x18x8x4xf32> to vector<2x16x8x4xf32>
    %51 = vector.shape_cast %50 : vector<2x16x8x4xf32> to vector<2x8x2x8x4xf32>
    %52 = vector.extract_strided_slice %51 {offsets = [0, 0, 0, 0, 0], sizes = [2, 8, 1, 8, 4], strides = [1, 1, 1, 1, 1]} : vector<2x8x2x8x4xf32> to vector<2x8x1x8x4xf32>
    %53 = vector.shape_cast %52 : vector<2x8x1x8x4xf32> to vector<2x8x8x4xf32>
    %54 = vector.shape_cast %53 : vector<2x8x8x4xf32> to vector<128x4xf32>
    %c0_43 = arith.constant 0 : index
    %c8 = arith.constant 8 : index
    %55 = vector.load %arg9[%c0_43, %c8] : memref<128x36xf32, #tpu.memory_space<vmem>>, vector<128x4xf32>
    tpu.vector_store %arg9[%c0_43, %c8], %54 {strides = array<i32>} : memref<128x36xf32, #tpu.memory_space<vmem>>, vector<128x4xf32>,
    %56 = vector.extract_strided_slice %49 {offsets = [0, 1, 0, 0], sizes = [2, 16, 8, 4], strides = [1, 1, 1, 1]} : vector<2x18x8x4xf32> to vector<2x16x8x4xf32>
    %57 = vector.shape_cast %56 : vector<2x16x8x4xf32> to vector<2x8x2x8x4xf32>
    %58 = vector.extract_strided_slice %57 {offsets = [0, 0, 0, 0, 0], sizes = [2, 8, 1, 8, 4], strides = [1, 1, 1, 1, 1]} : vector<2x8x2x8x4xf32> to vector<2x8x1x8x4xf32>
    %59 = vector.shape_cast %58 : vector<2x8x1x8x4xf32> to vector<2x8x8x4xf32>
    %60 = vector.shape_cast %59 : vector<2x8x8x4xf32> to vector<128x4xf32>
    %c0_44 = arith.constant 0 : index
    %c20 = arith.constant 20 : index
    %61 = vector.load %arg9[%c0_44, %c20] : memref<128x36xf32, #tpu.memory_space<vmem>>, vector<128x4xf32>
    tpu.vector_store %arg9[%c0_44, %c20], %60 {strides = array<i32>} : memref<128x36xf32, #tpu.memory_space<vmem>>, vector<128x4xf32>,
    %62 = vector.extract_strided_slice %49 {offsets = [0, 2, 0, 0], sizes = [2, 16, 8, 4], strides = [1, 1, 1, 1]} : vector<2x18x8x4xf32> to vector<2x16x8x4xf32>
    %63 = vector.shape_cast %62 : vector<2x16x8x4xf32> to vector<2x8x2x8x4xf32>
    %64 = vector.extract_strided_slice %63 {offsets = [0, 0, 0, 0, 0], sizes = [2, 8, 1, 8, 4], strides = [1, 1, 1, 1, 1]} : vector<2x8x2x8x4xf32> to vector<2x8x1x8x4xf32>
    %65 = vector.shape_cast %64 : vector<2x8x1x8x4xf32> to vector<2x8x8x4xf32>
    %66 = vector.shape_cast %65 : vector<2x8x8x4xf32> to vector<128x4xf32>
    %c0_45 = arith.constant 0 : index
    %c32 = arith.constant 32 : index
    %67 = vector.load %arg9[%c0_45, %c32] : memref<128x36xf32, #tpu.memory_space<vmem>>, vector<128x4xf32>
    tpu.vector_store %arg9[%c0_45, %c32], %66 {strides = array<i32>} : memref<128x36xf32, #tpu.memory_space<vmem>>, vector<128x4xf32>,
    %c0_46 = arith.constant 0 : index
    %c0_47 = arith.constant 0 : index
    %68 = vector.load %arg9[%c0_46, %c0_47] : memref<128x36xf32, #tpu.memory_space<vmem>>, vector<128x36xf32>
    %c0_48 = arith.constant 0 : index
    %c0_49 = arith.constant 0 : index
    %69 = vector.load %arg2[%c0_48, %c0_49] : memref<36x8xf32, #tpu.memory_space<vmem>>, vector<36x8xf32>
    %cst_50 = arith.constant dense<0.000000e+00> : vector<128x8xf32>
    %70 = tpu.matmul %68, %69, %cst_50 {dimension_numbers = #tpu.dot_dimension_numbers<[1], [0], [0], [1], [0, 0, 1, 1], [], []>} : vector<128x36xf32>, vector<36x8xf32>, vector<128x8xf32> -> vector<128x8xf32>
    %c0_51 = arith.constant 0 : index
    %c0_52 = arith.constant 0 : index
    %71 = vector.load %arg3[%c0_51, %c0_52] : memref<1x8xf32, #tpu.memory_space<vmem>>, vector<1x8xf32>
    %72 = vector.broadcast %71 : vector<1x8xf32> to vector<128x8xf32>
    %73 = arith.addf %70, %72 : vector<128x8xf32>
    %cst_53 = arith.constant 0.000000e+00 : f32
    %74 = vector.broadcast %cst_53 : f32 to vector<128x8xf32>
    %75 = arith.maximumf %73, %74 : vector<128x8xf32>
    %cst_54 = arith.constant 0.000000e+00 : f32
    %76 = vector.broadcast %cst_54 : f32 to vector<2x1x10x8xf32>
    %c0_55 = arith.constant 0 : index
    %c0_56 = arith.constant 0 : index
    %c0_57 = arith.constant 0 : index
    %c0_58 = arith.constant 0 : index
    %77 = vector.load %arg8[%c0_55, %c0_56, %c0_57, %c0_58] : memref<2x10x10x8xf32, #tpu.memory_space<vmem>>, vector<2x1x10x8xf32>
    tpu.vector_store %arg8[%c0_55, %c0_56, %c0_57, %c0_58], %76 {strides = array<i32>} : memref<2x10x10x8xf32, #tpu.memory_space<vmem>>, vector<2x1x10x8xf32>,
    %cst_59 = arith.constant 0.000000e+00 : f32
    %78 = vector.broadcast %cst_59 : f32 to vector<2x1x10x8xf32>
    %c0_60 = arith.constant 0 : index
    %c9 = arith.constant 9 : index
    %c0_61 = arith.constant 0 : index
    %c0_62 = arith.constant 0 : index
    %79 = vector.load %arg8[%c0_60, %c9, %c0_61, %c0_62] : memref<2x10x10x8xf32, #tpu.memory_space<vmem>>, vector<2x1x10x8xf32>
    tpu.vector_store %arg8[%c0_60, %c9, %c0_61, %c0_62], %78 {strides = array<i32>} : memref<2x10x10x8xf32, #tpu.memory_space<vmem>>, vector<2x1x10x8xf32>,
    %cst_63 = arith.constant 0.000000e+00 : f32
    %80 = vector.broadcast %cst_63 : f32 to vector<2x10x1x8xf32>
    %c0_64 = arith.constant 0 : index
    %c0_65 = arith.constant 0 : index
    %c0_66 = arith.constant 0 : index
    %c0_67 = arith.constant 0 : index
    %81 = vector.load %arg8[%c0_64, %c0_65, %c0_66, %c0_67] : memref<2x10x10x8xf32, #tpu.memory_space<vmem>>, vector<2x10x1x8xf32>
    tpu.vector_store %arg8[%c0_64, %c0_65, %c0_66, %c0_67], %80 {strides = array<i32>} : memref<2x10x10x8xf32, #tpu.memory_space<vmem>>, vector<2x10x1x8xf32>,
    %cst_68 = arith.constant 0.000000e+00 : f32
    %82 = vector.broadcast %cst_68 : f32 to vector<2x10x1x8xf32>
    %c0_69 = arith.constant 0 : index
    %c0_70 = arith.constant 0 : index
    %c9_71 = arith.constant 9 : index
    %c0_72 = arith.constant 0 : index
    %83 = vector.load %arg8[%c0_69, %c0_70, %c9_71, %c0_72] : memref<2x10x10x8xf32, #tpu.memory_space<vmem>>, vector<2x10x1x8xf32>
    tpu.vector_store %arg8[%c0_69, %c0_70, %c9_71, %c0_72], %82 {strides = array<i32>} : memref<2x10x10x8xf32, #tpu.memory_space<vmem>>, vector<2x10x1x8xf32>,
    %84 = vector.shape_cast %75 : vector<128x8xf32> to vector<2x8x8x8xf32>
    %c0_73 = arith.constant 0 : index
    %c1_74 = arith.constant 1 : index
    %c1_75 = arith.constant 1 : index
    %c0_76 = arith.constant 0 : index
    %85 = vector.load %arg8[%c0_73, %c1_74, %c1_75, %c0_76] : memref<2x10x10x8xf32, #tpu.memory_space<vmem>>, vector<2x8x8x8xf32>
    tpu.vector_store %arg8[%c0_73, %c1_74, %c1_75, %c0_76], %84 {strides = array<i32>} : memref<2x10x10x8xf32, #tpu.memory_space<vmem>>, vector<2x8x8x8xf32>,
    %c0_77 = arith.constant 0 : index
    %c0_78 = arith.constant 0 : index
    %c0_79 = arith.constant 0 : index
    %c0_80 = arith.constant 0 : index
    %86 = vector.load %arg8[%c0_77, %c0_78, %c0_79, %c0_80] : memref<2x10x10x8xf32, #tpu.memory_space<vmem>>, vector<2x10x8x8xf32>
    %87 = vector.extract_strided_slice %86 {offsets = [0, 0, 0, 0], sizes = [2, 8, 8, 8], strides = [1, 1, 1, 1]} : vector<2x10x8x8xf32> to vector<2x8x8x8xf32>
    %88 = vector.shape_cast %87 : vector<2x8x8x8xf32> to vector<2x8x1x8x8xf32>
    %89 = vector.shape_cast %88 : vector<2x8x1x8x8xf32> to vector<2x8x8x8xf32>
    %90 = vector.shape_cast %89 : vector<2x8x8x8xf32> to vector<128x8xf32>
    %c0_81 = arith.constant 0 : index
    %c0_82 = arith.constant 0 : index
    %91 = vector.load %arg10[%c0_81, %c0_82] : memref<128x76xf32, #tpu.memory_space<vmem>>, vector<128x8xf32>
    tpu.vector_store %arg10[%c0_81, %c0_82], %90 {strides = array<i32>} : memref<128x76xf32, #tpu.memory_space<vmem>>, vector<128x8xf32>,
    %92 = vector.extract_strided_slice %86 {offsets = [0, 1, 0, 0], sizes = [2, 8, 8, 8], strides = [1, 1, 1, 1]} : vector<2x10x8x8xf32> to vector<2x8x8x8xf32>
    %93 = vector.shape_cast %92 : vector<2x8x8x8xf32> to vector<2x8x1x8x8xf32>
    %94 = vector.shape_cast %93 : vector<2x8x1x8x8xf32> to vector<2x8x8x8xf32>
    %95 = vector.shape_cast %94 : vector<2x8x8x8xf32> to vector<128x8xf32>
    %c0_83 = arith.constant 0 : index
    %c24_84 = arith.constant 24 : index
    %96 = vector.load %arg10[%c0_83, %c24_84] : memref<128x76xf32, #tpu.memory_space<vmem>>, vector<128x8xf32>
    tpu.vector_store %arg10[%c0_83, %c24_84], %95 {strides = array<i32>} : memref<128x76xf32, #tpu.memory_space<vmem>>, vector<128x8xf32>,
    %97 = vector.extract_strided_slice %86 {offsets = [0, 2, 0, 0], sizes = [2, 8, 8, 8], strides = [1, 1, 1, 1]} : vector<2x10x8x8xf32> to vector<2x8x8x8xf32>
    %98 = vector.shape_cast %97 : vector<2x8x8x8xf32> to vector<2x8x1x8x8xf32>
    %99 = vector.shape_cast %98 : vector<2x8x1x8x8xf32> to vector<2x8x8x8xf32>
    %100 = vector.shape_cast %99 : vector<2x8x8x8xf32> to vector<128x8xf32>
    %c0_85 = arith.constant 0 : index
    %c48 = arith.constant 48 : index
    %101 = vector.load %arg10[%c0_85, %c48] : memref<128x76xf32, #tpu.memory_space<vmem>>, vector<128x8xf32>
    tpu.vector_store %arg10[%c0_85, %c48], %100 {strides = array<i32>} : memref<128x76xf32, #tpu.memory_space<vmem>>, vector<128x8xf32>,
    %c0_86 = arith.constant 0 : index
    %c0_87 = arith.constant 0 : index
    %c1_88 = arith.constant 1 : index
    %c0_89 = arith.constant 0 : index
    %102 = vector.load %arg8[%c0_86, %c0_87, %c1_88, %c0_89] : memref<2x10x10x8xf32, #tpu.memory_space<vmem>>, vector<2x10x8x8xf32>
    %103 = vector.extract_strided_slice %102 {offsets = [0, 0, 0, 0], sizes = [2, 8, 8, 8], strides = [1, 1, 1, 1]} : vector<2x10x8x8xf32> to vector<2x8x8x8xf32>
    %104 = vector.shape_cast %103 : vector<2x8x8x8xf32> to vector<2x8x1x8x8xf32>
    %105 = vector.shape_cast %104 : vector<2x8x1x8x8xf32> to vector<2x8x8x8xf32>
    %106 = vector.shape_cast %105 : vector<2x8x8x8xf32> to vector<128x8xf32>
    %c0_90 = arith.constant 0 : index
    %c8_91 = arith.constant 8 : index
    %107 = vector.load %arg10[%c0_90, %c8_91] : memref<128x76xf32, #tpu.memory_space<vmem>>, vector<128x8xf32>
    tpu.vector_store %arg10[%c0_90, %c8_91], %106 {strides = array<i32>} : memref<128x76xf32, #tpu.memory_space<vmem>>, vector<128x8xf32>,
    %108 = vector.extract_strided_slice %102 {offsets = [0, 1, 0, 0], sizes = [2, 8, 8, 8], strides = [1, 1, 1, 1]} : vector<2x10x8x8xf32> to vector<2x8x8x8xf32>
    %109 = vector.shape_cast %108 : vector<2x8x8x8xf32> to vector<2x8x1x8x8xf32>
    %110 = vector.shape_cast %109 : vector<2x8x1x8x8xf32> to vector<2x8x8x8xf32>
    %111 = vector.shape_cast %110 : vector<2x8x8x8xf32> to vector<128x8xf32>
    %c0_92 = arith.constant 0 : index
    %c32_93 = arith.constant 32 : index
    %112 = vector.load %arg10[%c0_92, %c32_93] : memref<128x76xf32, #tpu.memory_space<vmem>>, vector<128x8xf32>
    tpu.vector_store %arg10[%c0_92, %c32_93], %111 {strides = array<i32>} : memref<128x76xf32, #tpu.memory_space<vmem>>, vector<128x8xf32>,
    %113 = vector.extract_strided_slice %102 {offsets = [0, 2, 0, 0], sizes = [2, 8, 8, 8], strides = [1, 1, 1, 1]} : vector<2x10x8x8xf32> to vector<2x8x8x8xf32>
    %114 = vector.shape_cast %113 : vector<2x8x8x8xf32> to vector<2x8x1x8x8xf32>
    %115 = vector.shape_cast %114 : vector<2x8x1x8x8xf32> to vector<2x8x8x8xf32>
    %116 = vector.shape_cast %115 : vector<2x8x8x8xf32> to vector<128x8xf32>
    %c0_94 = arith.constant 0 : index
    %c56 = arith.constant 56 : index
    %117 = vector.load %arg10[%c0_94, %c56] : memref<128x76xf32, #tpu.memory_space<vmem>>, vector<128x8xf32>
    tpu.vector_store %arg10[%c0_94, %c56], %116 {strides = array<i32>} : memref<128x76xf32, #tpu.memory_space<vmem>>, vector<128x8xf32>,
    %c0_95 = arith.constant 0 : index
    %c0_96 = arith.constant 0 : index
    %c2_97 = arith.constant 2 : index
    %c0_98 = arith.constant 0 : index
    %118 = vector.load %arg8[%c0_95, %c0_96, %c2_97, %c0_98] : memref<2x10x10x8xf32, #tpu.memory_space<vmem>>, vector<2x10x8x8xf32>
    %119 = vector.extract_strided_slice %118 {offsets = [0, 0, 0, 0], sizes = [2, 8, 8, 8], strides = [1, 1, 1, 1]} : vector<2x10x8x8xf32> to vector<2x8x8x8xf32>
    %120 = vector.shape_cast %119 : vector<2x8x8x8xf32> to vector<2x8x1x8x8xf32>
    %121 = vector.shape_cast %120 : vector<2x8x1x8x8xf32> to vector<2x8x8x8xf32>
    %122 = vector.shape_cast %121 : vector<2x8x8x8xf32> to vector<128x8xf32>
    %c0_99 = arith.constant 0 : index
    %c16_100 = arith.constant 16 : index
    %123 = vector.load %arg10[%c0_99, %c16_100] : memref<128x76xf32, #tpu.memory_space<vmem>>, vector<128x8xf32>
    tpu.vector_store %arg10[%c0_99, %c16_100], %122 {strides = array<i32>} : memref<128x76xf32, #tpu.memory_space<vmem>>, vector<128x8xf32>,
    %124 = vector.extract_strided_slice %118 {offsets = [0, 1, 0, 0], sizes = [2, 8, 8, 8], strides = [1, 1, 1, 1]} : vector<2x10x8x8xf32> to vector<2x8x8x8xf32>
    %125 = vector.shape_cast %124 : vector<2x8x8x8xf32> to vector<2x8x1x8x8xf32>
    %126 = vector.shape_cast %125 : vector<2x8x1x8x8xf32> to vector<2x8x8x8xf32>
    %127 = vector.shape_cast %126 : vector<2x8x8x8xf32> to vector<128x8xf32>
    %c0_101 = arith.constant 0 : index
    %c40 = arith.constant 40 : index
    %128 = vector.load %arg10[%c0_101, %c40] : memref<128x76xf32, #tpu.memory_space<vmem>>, vector<128x8xf32>
    tpu.vector_store %arg10[%c0_101, %c40], %127 {strides = array<i32>} : memref<128x76xf32, #tpu.memory_space<vmem>>, vector<128x8xf32>,
    %129 = vector.extract_strided_slice %118 {offsets = [0, 2, 0, 0], sizes = [2, 8, 8, 8], strides = [1, 1, 1, 1]} : vector<2x10x8x8xf32> to vector<2x8x8x8xf32>
    %130 = vector.shape_cast %129 : vector<2x8x8x8xf32> to vector<2x8x1x8x8xf32>
    %131 = vector.shape_cast %130 : vector<2x8x1x8x8xf32> to vector<2x8x8x8xf32>
    %132 = vector.shape_cast %131 : vector<2x8x8x8xf32> to vector<128x8xf32>
    %c0_102 = arith.constant 0 : index
    %c64 = arith.constant 64 : index
    %133 = vector.load %arg10[%c0_102, %c64] : memref<128x76xf32, #tpu.memory_space<vmem>>, vector<128x8xf32>
    tpu.vector_store %arg10[%c0_102, %c64], %132 {strides = array<i32>} : memref<128x76xf32, #tpu.memory_space<vmem>>, vector<128x8xf32>,
    %c0_103 = arith.constant 0 : index
    %c0_104 = arith.constant 0 : index
    %134 = vector.load %arg10[%c0_103, %c0_104] : memref<128x76xf32, #tpu.memory_space<vmem>>, vector<128x76xf32>
    %c0_105 = arith.constant 0 : index
    %c0_106 = arith.constant 0 : index
    %135 = vector.load %arg4[%c0_105, %c0_106] : memref<76x8xf32, #tpu.memory_space<vmem>>, vector<76x8xf32>
    %cst_107 = arith.constant dense<0.000000e+00> : vector<128x8xf32>
    %136 = tpu.matmul %134, %135, %cst_107 {dimension_numbers = #tpu.dot_dimension_numbers<[1], [0], [0], [1], [0, 0, 1, 1], [], []>} : vector<128x76xf32>, vector<76x8xf32>, vector<128x8xf32> -> vector<128x8xf32>
    %c0_108 = arith.constant 0 : index
    %c0_109 = arith.constant 0 : index
    %137 = vector.load %arg5[%c0_108, %c0_109] : memref<1x8xf32, #tpu.memory_space<vmem>>, vector<1x8xf32>
    %138 = vector.broadcast %137 : vector<1x8xf32> to vector<128x8xf32>
    %139 = arith.addf %136, %138 : vector<128x8xf32>
    %cst_110 = arith.constant 0.000000e+00 : f32
    %140 = vector.broadcast %cst_110 : f32 to vector<128x8xf32>
    %141 = arith.maximumf %139, %140 : vector<128x8xf32>
    %c0_111 = arith.constant 0 : index
    %c0_112 = arith.constant 0 : index
    %142 = vector.load %arg11[%c0_111, %c0_112] : memref<128x8xf32, #tpu.memory_space<vmem>>, vector<128x8xf32>
    tpu.vector_store %arg11[%c0_111, %c0_112], %141 {strides = array<i32>} : memref<128x8xf32, #tpu.memory_space<vmem>>, vector<128x8xf32>,
    %c0_113 = arith.constant 0 : index
    %c0_114 = arith.constant 0 : index
    %143 = tpu.strided_load %arg11[%c0_113, %c0_114] {strides = array<i32: 8, 1>} : memref<128x8xf32, #tpu.memory_space<vmem>>, vector<16x8xf32>
    %c0_115 = arith.constant 0 : index
    %c0_116 = arith.constant 0 : index
    %144 = vector.load %arg6[%c0_115, %c0_116] : memref<16x64xf32, #tpu.memory_space<vmem>>, vector<16x8xf32>
    tpu.vector_store %arg6[%c0_115, %c0_116], %143 {strides = array<i32>} : memref<16x64xf32, #tpu.memory_space<vmem>>, vector<16x8xf32>,
    %c1_117 = arith.constant 1 : index
    %c0_118 = arith.constant 0 : index
    %145 = tpu.strided_load %arg11[%c1_117, %c0_118] {strides = array<i32: 8, 1>} : memref<128x8xf32, #tpu.memory_space<vmem>>, vector<16x8xf32>
    %c0_119 = arith.constant 0 : index
    %c8_120 = arith.constant 8 : index
    %146 = vector.load %arg6[%c0_119, %c8_120] : memref<16x64xf32, #tpu.memory_space<vmem>>, vector<16x8xf32>
    tpu.vector_store %arg6[%c0_119, %c8_120], %145 {strides = array<i32>} : memref<16x64xf32, #tpu.memory_space<vmem>>, vector<16x8xf32>,
    %c2_121 = arith.constant 2 : index
    %c0_122 = arith.constant 0 : index
    %147 = tpu.strided_load %arg11[%c2_121, %c0_122] {strides = array<i32: 8, 1>} : memref<128x8xf32, #tpu.memory_space<vmem>>, vector<16x8xf32>
    %c0_123 = arith.constant 0 : index
    %c16_124 = arith.constant 16 : index
    %148 = vector.load %arg6[%c0_123, %c16_124] : memref<16x64xf32, #tpu.memory_space<vmem>>, vector<16x8xf32>
    tpu.vector_store %arg6[%c0_123, %c16_124], %147 {strides = array<i32>} : memref<16x64xf32, #tpu.memory_space<vmem>>, vector<16x8xf32>,
    %c3 = arith.constant 3 : index
    %c0_125 = arith.constant 0 : index
    %149 = tpu.strided_load %arg11[%c3, %c0_125] {strides = array<i32: 8, 1>} : memref<128x8xf32, #tpu.memory_space<vmem>>, vector<16x8xf32>
    %c0_126 = arith.constant 0 : index
    %c24_127 = arith.constant 24 : index
    %150 = vector.load %arg6[%c0_126, %c24_127] : memref<16x64xf32, #tpu.memory_space<vmem>>, vector<16x8xf32>
    tpu.vector_store %arg6[%c0_126, %c24_127], %149 {strides = array<i32>} : memref<16x64xf32, #tpu.memory_space<vmem>>, vector<16x8xf32>,
    %c4_128 = arith.constant 4 : index
    %c0_129 = arith.constant 0 : index
    %151 = tpu.strided_load %arg11[%c4_128, %c0_129] {strides = array<i32: 8, 1>} : memref<128x8xf32, #tpu.memory_space<vmem>>, vector<16x8xf32>
    %c0_130 = arith.constant 0 : index
    %c32_131 = arith.constant 32 : index
    %152 = vector.load %arg6[%c0_130, %c32_131] : memref<16x64xf32, #tpu.memory_space<vmem>>, vector<16x8xf32>
    tpu.vector_store %arg6[%c0_130, %c32_131], %151 {strides = array<i32>} : memref<16x64xf32, #tpu.memory_space<vmem>>, vector<16x8xf32>,
    %c5 = arith.constant 5 : index
    %c0_132 = arith.constant 0 : index
    %153 = tpu.strided_load %arg11[%c5, %c0_132] {strides = array<i32: 8, 1>} : memref<128x8xf32, #tpu.memory_space<vmem>>, vector<16x8xf32>
    %c0_133 = arith.constant 0 : index
    %c40_134 = arith.constant 40 : index
    %154 = vector.load %arg6[%c0_133, %c40_134] : memref<16x64xf32, #tpu.memory_space<vmem>>, vector<16x8xf32>
    tpu.vector_store %arg6[%c0_133, %c40_134], %153 {strides = array<i32>} : memref<16x64xf32, #tpu.memory_space<vmem>>, vector<16x8xf32>,
    %c6 = arith.constant 6 : index
    %c0_135 = arith.constant 0 : index
    %155 = tpu.strided_load %arg11[%c6, %c0_135] {strides = array<i32: 8, 1>} : memref<128x8xf32, #tpu.memory_space<vmem>>, vector<16x8xf32>
    %c0_136 = arith.constant 0 : index
    %c48_137 = arith.constant 48 : index
    %156 = vector.load %arg6[%c0_136, %c48_137] : memref<16x64xf32, #tpu.memory_space<vmem>>, vector<16x8xf32>
    tpu.vector_store %arg6[%c0_136, %c48_137], %155 {strides = array<i32>} : memref<16x64xf32, #tpu.memory_space<vmem>>, vector<16x8xf32>,
    %c7 = arith.constant 7 : index
    %c0_138 = arith.constant 0 : index
    %157 = tpu.strided_load %arg11[%c7, %c0_138] {strides = array<i32: 8, 1>} : memref<128x8xf32, #tpu.memory_space<vmem>>, vector<16x8xf32>
    %c0_139 = arith.constant 0 : index
    %c56_140 = arith.constant 56 : index
    %158 = vector.load %arg6[%c0_139, %c56_140] : memref<16x64xf32, #tpu.memory_space<vmem>>, vector<16x8xf32>
    tpu.vector_store %arg6[%c0_139, %c56_140], %157 {strides = array<i32>} : memref<16x64xf32, #tpu.memory_space<vmem>>, vector<16x8xf32>,
    return
  }
  func.func @transform_0(%arg0: i32) -> (i32, i32, i32, i32) {
    %c0_i32 = arith.constant 0 : i32
    %c0_i32_0 = arith.constant 0 : i32
    %c0_i32_1 = arith.constant 0 : i32
    %c0_i32_2 = arith.constant 0 : i32
    return %arg0, %c0_i32, %c0_i32_0, %c0_i32_1 : i32, i32, i32, i32
  }
  func.func @transform_1(%arg0: i32) -> (i32, i32) {
    %c0_i32 = arith.constant 0 : i32
    %c0_i32_0 = arith.constant 0 : i32
    %c0_i32_1 = arith.constant 0 : i32
    return %c0_i32, %c0_i32_0 : i32, i32
  }
  func.func @transform_2(%arg0: i32) -> (i32, i32) {
    %c0_i32 = arith.constant 0 : i32
    %c0_i32_0 = arith.constant 0 : i32
    %c0_i32_1 = arith.constant 0 : i32
    return %c0_i32, %c0_i32_0 : i32, i32
  }
  func.func @transform_3(%arg0: i32) -> (i32, i32) {
    %c0_i32 = arith.constant 0 : i32
    %c0_i32_0 = arith.constant 0 : i32
    %c0_i32_1 = arith.constant 0 : i32
    return %c0_i32, %c0_i32_0 : i32, i32
  }
  func.func @transform_4(%arg0: i32) -> (i32, i32) {
    %c0_i32 = arith.constant 0 : i32
    %c0_i32_0 = arith.constant 0 : i32
    %c0_i32_1 = arith.constant 0 : i32
    return %c0_i32, %c0_i32_0 : i32, i32
  }
  func.func @transform_5(%arg0: i32) -> (i32, i32) {
    %c0_i32 = arith.constant 0 : i32
    %c0_i32_0 = arith.constant 0 : i32
    return %arg0, %c0_i32 : i32, i32
  }
}

</mosaic_0001>

<bundles_post_ra>
// kernel: tpu_custom_call.1
= control target key start
LH: loop header
LB: loop body
LE: loop exit
PB: predicated region body
PF: predicated region fallthrough
CT: control target
= control target key end

     0   :  { %vm21_vm0 = vcmask 31744   ;;  %vm36_vm1 = vcmask 24576   ;;  %v2768_v2 = vmov 0.0   ;;  %vm24_vm2 = vcmask 25600   ;;  %s2769_s14 = smov 24   ;;  %s2770_s15 = smov 12   ;;  %s4210_s0 = inlined_call_operand.vmem [shape: f32[2,16,16,4], index: 0, kind: input, shape index: {}]   ;;  %s4211_s1 = inlined_call_operand.vmem [shape: f32[36,8], index: 1, kind: input, shape index: {}]   ;;  %s4212_s2 = inlined_call_operand.vmem [shape: f32[1,8], index: 2, kind: input, shape index: {}]   ;;  %s4213_s3 = inlined_call_operand.vmem [shape: f32[76,8], index: 3, kind: input, shape index: {}]   ;;  %s4214_s4 = inlined_call_operand.vmem [shape: f32[1,8], index: 4, kind: input, shape index: {}]   ;;  %s4215_s5 = inlined_call_operand.hbm [shape: f32[16,64], index: 5, kind: output, shape index: {}]  }
   0x1   :  { %v111_v0 = vld [vmem:[%s4210_s0 + $0x10] sm:$0xff]  ;;  %v112_v1 = vld [vmem:[%s4210_s0 + $0x18] sm:$0xff]  ;;  %39 = vst.msk [vmem:[#allocation2 + $0x30] sm:$0x1] %vm36_vm1, %v2768_v2  ;;  %38 = vst.msk [vmem:[#allocation2 + $0x18] sm:$0x1] %vm36_vm1, %v2768_v2 }
   0x2   :  { %176 = vst.msk [vmem:[#allocation2 + $0x31] sm:$0xff] %vm21_vm0, %v111_v0  ;;  %177 = vst.msk [vmem:[#allocation2 + $0x39] sm:$0xff] %vm21_vm0, %v112_v1  ;;  %v109_v3 = vld [vmem:[%s4210_s0] sm:$0xff]  ;;  %v110_v4 = vld [vmem:[%s4210_s0 + $0x8] sm:$0xff]  ;;  %s2771_s18 = smov 4   ;;  %s2772_s10 = smov 16  }
   0x3   :  { %22 = vst.msk [vmem:[#allocation2] sm:$0xff] %vm21_vm0, %v2768_v2  ;;  %23 = vst.msk [vmem:[#allocation2 + $0x8] sm:$0xff] %vm21_vm0, %v2768_v2  ;;  %v115_v5 = vld [vmem:[%s4210_s0 + $0x30] sm:$0xff]  ;;  %v116_v6 = vld [vmem:[%s4210_s0 + $0x38] sm:$0xff]  ;;  %s2773_s20 = smov 28   ;;  %s2774_s17 = smov 8  }
   0x4   :  { %26 = vst.msk [vmem:[#allocation2 + $0x1b0] sm:$0xff] %vm21_vm0, %v2768_v2  ;;  %27 = vst.msk [vmem:[#allocation2 + $0x1b8] sm:$0xff] %vm21_vm0, %v2768_v2  ;;  %v113_v7 = vld [vmem:[%s4210_s0 + $0x20] sm:$0xff]  ;;  %v114_v8 = vld [vmem:[%s4210_s0 + $0x28] sm:$0xff] }
   0x5   :  { %40 = vst.msk [vmem:[#allocation2 + $0x48] sm:$0x1] %vm36_vm1, %v2768_v2  ;;  %41 = vst.msk [vmem:[#allocation2 + $0x60] sm:$0x1] %vm36_vm1, %v2768_v2  ;;  %v117_v9 = vld [vmem:[%s4210_s0 + $0x40] sm:$0xff]  ;;  %v118_v10 = vld [vmem:[%s4210_s0 + $0x48] sm:$0xff] }
   0x6   :  { %42 = vst.msk [vmem:[#allocation2 + $0x78] sm:$0x1] %vm36_vm1, %v2768_v2  ;;  %43 = vst.msk [vmem:[#allocation2 + $0x90] sm:$0x1] %vm36_vm1, %v2768_v2  ;;  %v119_v11 = vld [vmem:[%s4210_s0 + $0x50] sm:$0xff]  ;;  %v120_v12 = vld [vmem:[%s4210_s0 + $0x58] sm:$0xff] }
   0x7   :  { %44 = vst.msk [vmem:[#allocation2 + $0xa8] sm:$0x1] %vm36_vm1, %v2768_v2  ;;  %45 = vst.msk [vmem:[#allocation2 + $0xc0] sm:$0x1] %vm36_vm1, %v2768_v2  ;;  %v121_v13 = vld [vmem:[%s4210_s0 + $0x60] sm:$0xff]  ;;  %v122_v14 = vld [vmem:[%s4210_s0 + $0x68] sm:$0xff] }
   0x8   :  { %46 = vst.msk [vmem:[#allocation2 + $0xd8] sm:$0x1] %vm36_vm1, %v2768_v2  ;;  %47 = vst.msk [vmem:[#allocation2 + $0xf0] sm:$0x1] %vm36_vm1, %v2768_v2  ;;  %v123_v15 = vld [vmem:[%s4210_s0 + $0x70] sm:$0xff]  ;;  %v124_v16 = vld [vmem:[%s4210_s0 + $0x78] sm:$0xff] }
   0x9   :  { %48 = vst.msk [vmem:[#allocation2 + $0x108] sm:$0x1] %vm36_vm1, %v2768_v2  ;;  %49 = vst.msk [vmem:[#allocation2 + $0x120] sm:$0x1] %vm36_vm1, %v2768_v2  ;;  %v125_v17 = vld [vmem:[%s4210_s0 + $0x80] sm:$0xff]  ;;  %v126_v18 = vld [vmem:[%s4210_s0 + $0x88] sm:$0xff] }
   0xa   :  { %50 = vst.msk [vmem:[#allocation2 + $0x138] sm:$0x1] %vm36_vm1, %v2768_v2  ;;  %51 = vst.msk [vmem:[#allocation2 + $0x150] sm:$0x1] %vm36_vm1, %v2768_v2  ;;  %v127_v19 = vld [vmem:[%s4210_s0 + $0x90] sm:$0xff]  ;;  %v128_v20 = vld [vmem:[%s4210_s0 + $0x98] sm:$0xff] }
   0xb   :  { %52 = vst.msk [vmem:[#allocation2 + $0x168] sm:$0x1] %vm36_vm1, %v2768_v2  ;;  %53 = vst.msk [vmem:[#allocation2 + $0x180] sm:$0x1] %vm36_vm1, %v2768_v2  ;;  %v129_v21 = vld [vmem:[%s4210_s0 + $0xa0] sm:$0xff]  ;;  %v130_v22 = vld [vmem:[%s4210_s0 + $0xa8] sm:$0xff] }
   0xc   :  { %56 = vst.msk [vmem:[#allocation2 + $0x1c8] sm:$0x1] %vm36_vm1, %v2768_v2  ;;  %57 = vst.msk [vmem:[#allocation2 + $0x1e0] sm:$0x1] %vm36_vm1, %v2768_v2  ;;  %v131_v23 = vld [vmem:[%s4210_s0 + $0xb0] sm:$0xff]  ;;  %v132_v33 = vld [vmem:[%s4210_s0 + $0xb8] sm:$0xff] }
   0xd   :  { %58 = vst.msk [vmem:[#allocation2 + $0x1f8] sm:$0x1] %vm36_vm1, %v2768_v2  ;;  %59 = vst.msk [vmem:[#allocation2 + $0x210] sm:$0x1] %vm36_vm1, %v2768_v2  ;;  %v242_v24 = vld [vmem:[#allocation2 + $0x30] ss:$2 sm:$0xff] }
   0xe   :  { %60 = vst.msk [vmem:[#allocation2 + $0x228] sm:$0x1] %vm36_vm1, %v2768_v2  ;;  %61 = vst.msk [vmem:[#allocation2 + $0x240] sm:$0x1] %vm36_vm1, %v2768_v2  ;;  %418 = vrot.lane.b32.xlu1 %v242_v24, %s2769_s14  ;;  %v488_v30 = vld [vmem:[#allocation2 + $0x31] ss:$2 sm:$0xff] }
   0xf   :  { %62 = vst.msk [vmem:[#allocation2 + $0x258] sm:$0x1] %vm36_vm1, %v2768_v2  ;;  %63 = vst.msk [vmem:[#allocation2 + $0x270] sm:$0x1] %vm36_vm1, %v2768_v2  ;;  %v484_v31 = vld [vmem:[#allocation2 + $0x1] ss:$2 sm:$0xff] }
  0x10   :  { %64 = vst.msk [vmem:[#allocation2 + $0x288] sm:$0x1] %vm36_vm1, %v2768_v2  ;;  %65 = vst.msk [vmem:[#allocation2 + $0x2a0] sm:$0x1] %vm36_vm1, %v2768_v2  ;;  %v133_v35 = vld [vmem:[%s4210_s0 + $0xc0] sm:$0xff]  ;;  %v134_v37 = vld [vmem:[%s4210_s0 + $0xc8] sm:$0xff] }
  0x11   :  { %66 = vst.msk [vmem:[#allocation2 + $0x2b8] sm:$0x1] %vm36_vm1, %v2768_v2  ;;  %67 = vst.msk [vmem:[#allocation2 + $0x2d0] sm:$0x1] %vm36_vm1, %v2768_v2  ;;  %v135_v38 = vld [vmem:[%s4210_s0 + $0xd0] sm:$0xff]  ;;  %v136_v39 = vld [vmem:[%s4210_s0 + $0xd8] sm:$0xff] }
  0x12   :  { %68 = vst.msk [vmem:[#allocation2 + $0x2e8] sm:$0x1] %vm36_vm1, %v2768_v2  ;;  %69 = vst.msk [vmem:[#allocation2 + $0x300] sm:$0x1] %vm36_vm1, %v2768_v2  ;;  %v137_v40 = vld [vmem:[%s4210_s0 + $0xe0] sm:$0xff]  ;;  %v138_v41 = vld [vmem:[%s4210_s0 + $0xe8] sm:$0xff] }
  0x13   :  { %70 = vst.msk [vmem:[#allocation2 + $0x318] sm:$0x1] %vm36_vm1, %v2768_v2  ;;  %71 = vst.msk [vmem:[#allocation2 + $0x330] sm:$0x1] %vm36_vm1, %v2768_v2  ;;  %v139_v42 = vld [vmem:[%s4210_s0 + $0xf0] sm:$0xff]  ;;  %v140_v43 = vld [vmem:[%s4210_s0 + $0xf8] sm:$0xff] }
  0x14   :  { %174 = vst.msk [vmem:[#allocation2 + $0x19] sm:$0xff] %vm21_vm0, %v109_v3  ;;  %175 = vst.msk [vmem:[#allocation2 + $0x21] sm:$0xff] %vm21_vm0, %v110_v4  ;;  %v141_v45 = vld [vmem:[%s4210_s0 + $0x100] sm:$0xff]  ;;  %v142_v46 = vld [vmem:[%s4210_s0 + $0x108] sm:$0xff] }
  0x15   :  { %37 = vst.msk [vmem:[#allocation2] sm:$0x1] %vm36_vm1, %v2768_v2  ;;  %55 = vst.msk [vmem:[#allocation2 + $0x1b0] sm:$0x1] %vm36_vm1, %v2768_v2  ;;  %v143_v48 = vld [vmem:[%s4210_s0 + $0x110] sm:$0xff]  ;;  %v144_v50 = vld [vmem:[%s4210_s0 + $0x118] sm:$0xff] }
  0x16   :  { %180 = vst.msk [vmem:[#allocation2 + $0x61] sm:$0xff] %vm21_vm0, %v115_v5  ;;  %181 = vst.msk [vmem:[#allocation2 + $0x69] sm:$0xff] %vm21_vm0, %v116_v6  ;;  %v145_v51 = vld [vmem:[%s4210_s0 + $0x120] sm:$0xff]  ;;  %v146_v52 = vld [vmem:[%s4210_s0 + $0x128] sm:$0xff] }
  0x17   :  { %25 = vst.msk [vmem:[#allocation2 + $0x10] sm:$0x3] %vm24_vm2, %v2768_v2  ;;  %28 = vst.msk [vmem:[#allocation2 + $0x1c0] sm:$0x3] %vm24_vm2, %v2768_v2  ;;  %v147_v53 = vld [vmem:[%s4210_s0 + $0x130] sm:$0xff]  ;;  %v148_v54 = vld [vmem:[%s4210_s0 + $0x138] sm:$0xff] }
  0x18   :  { %178 = vst.msk [vmem:[#allocation2 + $0x49] sm:$0xff] %vm21_vm0, %v113_v7  ;;  %179 = vst.msk [vmem:[#allocation2 + $0x51] sm:$0xff] %vm21_vm0, %v114_v8  ;;  %v149_v58 = vld [vmem:[%s4210_s0 + $0x140] sm:$0xff]  ;;  %v150_v60 = vld [vmem:[%s4210_s0 + $0x148] sm:$0xff] }
  0x19   :  { %182 = vst.msk [vmem:[#allocation2 + $0x79] sm:$0xff] %vm21_vm0, %v117_v9  ;;  %183 = vst.msk [vmem:[#allocation2 + $0x81] sm:$0xff] %vm21_vm0, %v118_v10  ;;  %v151_v61 = vld [vmem:[%s4210_s0 + $0x150] sm:$0xff]  ;;  %v152_v62 = vld [vmem:[%s4210_s0 + $0x158] sm:$0xff] }
  0x1a   :  { %184 = vst.msk [vmem:[#allocation2 + $0x91] sm:$0xff] %vm21_vm0, %v119_v11  ;;  %185 = vst.msk [vmem:[#allocation2 + $0x99] sm:$0xff] %vm21_vm0, %v120_v12  ;;  %v153_v1 = vld [vmem:[%s4210_s0 + $0x160] sm:$0xff]  ;;  %v154_v3 = vld [vmem:[%s4210_s0 + $0x168] sm:$0xff] }
  0x1b   :  { %186 = vst.msk [vmem:[#allocation2 + $0xa9] sm:$0xff] %vm21_vm0, %v121_v13  ;;  %187 = vst.msk [vmem:[#allocation2 + $0xb1] sm:$0xff] %vm21_vm0, %v122_v14  ;;  %v240_v25 = vld [vmem:[#allocation2 + $0x18] ss:$2 sm:$0xff]  ;;  %v486_v36 = vld [vmem:[#allocation2 + $0x19] ss:$2 sm:$0xff] }
  0x1c   :  { %188 = vst.msk [vmem:[#allocation2 + $0xc1] sm:$0xff] %vm21_vm0, %v123_v15  ;;  %189 = vst.msk [vmem:[#allocation2 + $0xc9] sm:$0xff] %vm21_vm0, %v124_v16  ;;  %337 = vrot.lane.b32.xlu0 %v240_v25, %s2770_s15  ;;  %v238_v47 = vld [vmem:[#allocation2] ss:$2 sm:$0xff]  ;;  %v155_v4 = vld [vmem:[%s4210_s0 + $0x170] sm:$0xff] }
  0x1d   :  { %190 = vst.msk [vmem:[#allocation2 + $0xd9] sm:$0xff] %vm21_vm0, %v125_v17  ;;  %191 = vst.msk [vmem:[#allocation2 + $0xe1] sm:$0xff] %vm21_vm0, %v126_v18  ;;  %v246_v26 = vld [vmem:[#allocation2 + $0x60] ss:$2 sm:$0xff]  ;;  %v492_v59 = vld [vmem:[#allocation2 + $0x61] ss:$2 sm:$0xff] }
  0x1e   :  { %192 = vst.msk [vmem:[#allocation2 + $0xf1] sm:$0xff] %vm21_vm0, %v127_v19  ;;  %193 = vst.msk [vmem:[#allocation2 + $0xf9] sm:$0xff] %vm21_vm0, %v128_v20  ;;  %420 = vrot.lane.b32.xlu1 %v246_v26, %s2769_s14  ;;  %v846_v57 = vld [vmem:[#allocation2 + $0x2] ss:$2 sm:$0xff]  ;;  %v156_v5 = vld [vmem:[%s4210_s0 + $0x178] sm:$0xff] }
  0x1f   :  { %194 = vst.msk [vmem:[#allocation2 + $0x109] sm:$0xff] %vm21_vm0, %v129_v21  ;;  %195 = vst.msk [vmem:[#allocation2 + $0x111] sm:$0xff] %vm21_vm0, %v130_v22  ;;  %v244_v27 = vld [vmem:[#allocation2 + $0x48] ss:$2 sm:$0xff]  ;;  %v490_v44 = vld [vmem:[#allocation2 + $0x49] ss:$2 sm:$0xff] }
  0x20   :  { %196 = vst.msk [vmem:[#allocation2 + $0x121] sm:$0xff] %vm21_vm0, %v131_v23  ;;  %306 = vst.msk [vmem:[#allocation4 + $0x8] sm:$0xff] %vm21_vm0, %v242_v24  ;;  %339 = vrot.lane.b32.xlu0 %v244_v27, %s2770_s15  ;;  %v248_v34 = vld [vmem:[#allocation2 + $0x78] ss:$2 sm:$0xff] }
  0x21   :  { %307 = vst.msk [vmem:[#allocation4 + $0x10] sm:$0xff] %vm21_vm0, %v246_v26  ;;  %v250_v28 = vld [vmem:[#allocation2 + $0x90] ss:$2 sm:$0xff]  ;;  %197 = vst.msk [vmem:[#allocation2 + $0x129] sm:$0xff] %vm21_vm0, %v132_v33 }
  0x22   :  { %308 = vst.msk [vmem:[#allocation4 + $0x18] sm:$0xff] %vm21_vm0, %v250_v28  ;;  %569 = vrot.lane.b32.xlu1 %v488_v30, %s2771_s18  ;;  %198 = vst.msk [vmem:[#allocation2 + $0x139] sm:$0xff] %vm21_vm0, %v133_v35  ;;  %v252_v55 = vld [vmem:[#allocation2 + $0xa8] ss:$2 sm:$0xff] }
  0x23   :  { %v2991_v29 = vld [vmem:[#allocation2 + $0xc0] ss:$2 sm:$0xff]  ;;  %199 = vst.msk [vmem:[#allocation2 + $0x141] sm:$0xff] %vm21_vm0, %v134_v37  ;;  %200 = vst.msk [vmem:[#allocation2 + $0x151] sm:$0xff] %vm21_vm0, %v135_v38 }
  0x24   :  { %309 = vst.msk [vmem:[#allocation4 + $0x20] sm:$0xff] %vm21_vm0, %v2991_v29  ;;  %567 = vrot.lane.b32.xlu0 %v484_v31, %s2771_s18  ;;  %201 = vst.msk [vmem:[#allocation2 + $0x159] sm:$0xff] %vm21_vm0, %v136_v39 }
  0x25   :  { %v2996_v32 = vld [vmem:[#allocation2 + $0xf0] ss:$2 sm:$0xff]  ;;  %202 = vst.msk [vmem:[#allocation2 + $0x169] sm:$0xff] %vm21_vm0, %v137_v40  ;;  %203 = vst.msk [vmem:[#allocation2 + $0x171] sm:$0xff] %vm21_vm0, %v138_v41 }
  0x26   :  { %310 = vst.msk [vmem:[#allocation4 + $0x28] sm:$0xff] %vm21_vm0, %v2996_v32  ;;  %341 = vrot.lane.b32.xlu1 %v248_v34, %s2770_s15  ;;  %204 = vst.msk [vmem:[#allocation2 + $0x181] sm:$0xff] %vm21_vm0, %v139_v42 }
  0x27   :  { %205 = vst.msk [vmem:[#allocation2 + $0x189] sm:$0xff] %vm21_vm0, %v140_v43  ;;  %206 = vst.msk [vmem:[#allocation2 + $0x1c9] sm:$0xff] %vm21_vm0, %v141_v45 }
  0x28   :  { %648 = vrot.lane.b32.xlu0 %v486_v36, %s2772_s10  ;;  %v3050_v49 = vld [vmem:[#allocation2 + $0x120] ss:$2 sm:$0xff]  ;;  %207 = vst.msk [vmem:[#allocation2 + $0x1d1] sm:$0xff] %vm21_vm0, %v142_v46  ;;  %305 = vst.msk [vmem:[#allocation4] sm:$0xff] %vm21_vm0, %v238_v47 }
  0x29   :  { %208 = vst.msk [vmem:[#allocation2 + $0x1e1] sm:$0xff] %vm21_vm0, %v143_v48  ;;  %311 = vst.msk [vmem:[#allocation4 + $0x30] sm:$0xff] %vm21_vm0, %v3050_v49 }
  0x2a   :  { %780 = vrot.lane.b32.xlu1 %v488_v30, %s2773_s20  ;;  %209 = vst.msk [vmem:[#allocation2 + $0x1e9] sm:$0xff] %vm21_vm0, %v144_v50  ;;  %210 = vst.msk [vmem:[#allocation2 + $0x1f9] sm:$0xff] %vm21_vm0, %v145_v51 }
  0x2b   :  { %211 = vst.msk [vmem:[#allocation2 + $0x201] sm:$0xff] %vm21_vm0, %v146_v52  ;;  %212 = vst.msk [vmem:[#allocation2 + $0x211] sm:$0xff] %vm21_vm0, %v147_v53  ;;  %v3079_v56 = vld [vmem:[#allocation2 + $0x150] ss:$2 sm:$0xff] }
  0x2c   :  { %650 = vrot.lane.b32.xlu0 %v490_v44, %s2772_s10  ;;  %213 = vst.msk [vmem:[#allocation2 + $0x219] sm:$0xff] %vm21_vm0, %v148_v54  ;;  %312 = vst.msk [vmem:[#allocation4 + $0x38] sm:$0xff] %vm21_vm0, %v3079_v56 }
  0x2d   :  { %214 = vst.msk [vmem:[#allocation2 + $0x229] sm:$0xff] %vm21_vm0, %v149_v58  ;;  %215 = vst.msk [vmem:[#allocation2 + $0x231] sm:$0xff] %vm21_vm0, %v150_v60 }
  0x2e   :  { %422 = vrot.lane.b32.xlu1 %v250_v28, %s2769_s14  ;;  %216 = vst.msk [vmem:[#allocation2 + $0x241] sm:$0xff] %vm21_vm0, %v151_v61  ;;  %217 = vst.msk [vmem:[#allocation2 + $0x249] sm:$0xff] %vm21_vm0, %v152_v62 }
  0x2f   :  { %218 = vst.msk [vmem:[#allocation2 + $0x259] sm:$0xff] %vm21_vm0, %v153_v1  ;;  %219 = vst.msk [vmem:[#allocation2 + $0x261] sm:$0xff] %vm21_vm0, %v154_v3 }
  0x30   :  { %343 = vrot.lane.b32.xlu0 %v252_v55, %s2770_s15 }
  0x31   :  { %v3100_v63 = vld [vmem:[#allocation2 + $0x1e0] ss:$2 sm:$0xff] }
  0x32   :  { %929 = vrot.lane.b32.xlu1 %v846_v57, %s2774_s17  ;;  %314 = vst.msk [vmem:[#allocation4 + $0x48] sm:$0xff] %vm21_vm0, %v3100_v63 }
  0x33   :  { %v3107_v0 = vld [vmem:[#allocation2 + $0x210] ss:$2 sm:$0xff] }
  0x34   :  { %782 = vrot.lane.b32.xlu0 %v492_v59, %s2773_s20  ;;  %315 = vst.msk [vmem:[#allocation4 + $0x50] sm:$0xff] %vm21_vm0, %v3107_v0 }
  0x35   :  { %10 = vsyncpa [#allocation8], 0  ;;  %220 = vst.msk [vmem:[#allocation2 + $0x271] sm:$0xff] %vm21_vm0, %v155_v4  ;;  %v848_v6 = vld [vmem:[#allocation2 + $0x1a] ss:$2 sm:$0xff]  ;;  %s2775_s28 = smov 20  }
  0x36   :  { %571 = vrot.lane.b32.xlu1 %v492_v59, %s2771_s18  ;;  %221 = vst.msk [vmem:[#allocation2 + $0x279] sm:$0xff] %vm21_vm0, %v156_v5  ;;  %v850_v7 = vld [vmem:[#allocation2 + $0x32] ss:$2 sm:$0xff]  ;;  %v3136_v9 = vld [vmem:[#allocation2 + $0x79] ss:$2 sm:$0xff]  ;;  %v1159_v12 = vld [vmem:[%s4211_s1 + $0x8] sm:$0xff] }
  0x37   :  { %v3130_v8 = vld [vmem:[#allocation2 + $0x240] ss:$2 sm:$0xff]  ;;  %v496_v10 = vld [vmem:[#allocation2 + $0x91] ss:$2 sm:$0xff]  ;;  %s2776_s22 = smov 32   ;;  %vm1219_vm3 = vcmask 1043456  }
  0x38   :  { %424 = vrot.lane.b32.xlu0 %v2991_v29, %s2769_s14  ;;  %316 = vst.msk [vmem:[#allocation4 + $0x58] sm:$0xff] %vm21_vm0, %v3130_v8  ;;  %v1158_v11 = vld [vmem:[%s4211_s1] sm:$0xff]  ;;  %v158_v16 = vld [vmem:[%s4210_s0 + $0x188] sm:$0xff]  ;;  %v1160_v18 = vld [vmem:[%s4211_s1 + $0x10] sm:$0xff]  ;;  %vm385_vm4 = vcmask 130144   ;;  %vm466_vm5 = vcmask 228544  }
  0x39   :  { %v2681_v14 = vpack.c.bf16 %v1159_v12, %v1158_v11  ;;  %v157_v15 = vld [vmem:[%s4210_s0 + $0x180] sm:$0xff]  ;;  %v852_v17 = vld [vmem:[#allocation2 + $0x4a] ss:$2 sm:$0xff]  ;;  %223 = vst.msk [vmem:[#allocation2 + $0x291] sm:$0xff] %vm21_vm0, %v158_v16  ;;  %v3167_v21 = vld [vmem:[#allocation2 + $0xa9] ss:$2 sm:$0xff] }
  0x3a   :  { %1010 = vrot.lane.b32.xlu1 %v848_v6, %s2775_s28  ;;  %222 = vst.msk [vmem:[#allocation2 + $0x289] sm:$0xff] %vm21_vm0, %v157_v15  ;;  %v1161_v19 = vld [vmem:[%s4211_s1 + $0x18] sm:$0xff]  ;;  %v1162_v23 = vld [vmem:[%s4211_s1 + $0x20] sm:$0xf]  ;;  %v159_v24 = vld [vmem:[%s4210_s0 + $0x190] sm:$0xff]  ;;  %vm615_vm6 = vcmask 64544  }
  0x3b   :  { %2682 = vmatprep.subr.bf16.mxu0 %v2681_v14  ;;  %v2685_v20 = vpack.c.bf16 %v1161_v19, %v1160_v18  ;;  %v256_v22 = vld [vmem:[#allocation2 + $0xd8] ss:$2 sm:$0xff]  ;;  %224 = vst.msk [vmem:[#allocation2 + $0x2a1] sm:$0xff] %vm21_vm0, %v159_v24  ;;  %v162_v28 = vld [vmem:[%s4210_s0 + $0x1a8] sm:$0xff]  ;;  %v163_v30 = vld [vmem:[%s4210_s0 + $0x1b0] sm:$0xff]  ;;  %vm696_vm7 = vcmask 162944  }
  0x3c   :  { %931 = vrot.lane.b32.xlu0 %v850_v7, %s2774_s17  ;;  %2684 = vmatpush3.bf16.msra.mxu0 %v2681_v14  ;;  %v854_v25 = vld [vmem:[#allocation2 + $0x62] ss:$2 sm:$0xff]  ;;  %v160_v26 = vld [vmem:[%s4210_s0 + $0x198] sm:$0xff]  ;;  %227 = vst.msk [vmem:[#allocation2 + $0x2c1] sm:$0xff] %vm21_vm0, %v162_v28  ;;  %228 = vst.msk [vmem:[#allocation2 + $0x2d1] sm:$0xff] %vm21_vm0, %v163_v30  ;;  %vm828_vm8 = vcmask 261344  }
  0x3d   :  { %v3144_v13 = vld [vmem:[#allocation2 + $0x270] ss:$2 sm:$0xff]  ;;  %2686 = vmatprep.subr.bf16.mxu0 %v2685_v20  ;;  %v161_v27 = vld [vmem:[%s4210_s0 + $0x1a0] sm:$0xff]  ;;  %225 = vst.msk [vmem:[#allocation2 + $0x2a9] sm:$0xff] %vm21_vm0, %v160_v26  ;;  %v504_v38 = vld [vmem:[#allocation2 + $0xf1] ss:$2 sm:$0xff] }
  0x3e   :  { %652 = vrot.lane.b32.xlu1 %v3136_v9, %s2772_s10  ;;  %317 = vst.msk [vmem:[#allocation4 + $0x60] sm:$0xff] %vm21_vm0, %v3144_v13  ;;  %226 = vst.msk [vmem:[#allocation2 + $0x2b9] sm:$0xff] %vm21_vm0, %v161_v27  ;;  %v260_v29 = vld [vmem:[#allocation2 + $0x108] ss:$2 sm:$0xff]  ;;  %v164_v31 = vld [vmem:[%s4210_s0 + $0x1b8] sm:$0xff]  ;;  %vm977_vm9 = vcmask 97344  }
  0x3f   :  { %229 = vst.msk [vmem:[#allocation2 + $0x2d9] sm:$0xff] %vm21_vm0, %v164_v31  ;;  %v500_v34 = vld [vmem:[#allocation2 + $0xc1] ss:$2 sm:$0xff]  ;;  %v856_v35 = vld [vmem:[#allocation2 + $0x7a] ss:$2 sm:$0xff]  ;;  %v167_v48 = vld [vmem:[%s4210_s0 + $0x1d0] sm:$0xff] }
  0x40   :  { %573 = vrot.lane.b32.xlu0 %v496_v10, %s2771_s18  ;;  %2688 = vmatpush3.bf16.msra.mxu0 %v2685_v20  ;;  %v858_v36 = vld [vmem:[#allocation2 + $0x92] ss:$2 sm:$0xff]  ;;  %v3221_v37 = vld [vmem:[#allocation2 + $0xd9] ss:$2 sm:$0xff]  ;;  %v166_v40 = vld [vmem:[%s4210_s0 + $0x1c8] sm:$0xff]  ;;  %232 = vst.msk [vmem:[#allocation2 + $0x301] sm:$0xff] %vm21_vm0, %v167_v48 }
  0x41   :  { %2611 = vmatprep.subr.msk.mxu0 %vm1219_vm3, %v1162_v23  ;;  %v165_v39 = vld [vmem:[%s4210_s0 + $0x1c0] sm:$0xff]  ;;  %v860_v41 = vld [vmem:[#allocation2 + $0xaa] ss:$2 sm:$0xff]  ;;  %231 = vst.msk [vmem:[#allocation2 + $0x2f1] sm:$0xff] %vm21_vm0, %v166_v40  ;;  %v3236_v42 = vld [vmem:[#allocation2 + $0x109] ss:$2 sm:$0xff] }
  0x42   :  { %1077 = vrot.lane.b32.xlu1 %v850_v7, %s2776_s22  ;;  %230 = vst.msk [vmem:[#allocation2 + $0x2e9] sm:$0xff] %vm21_vm0, %v165_v39  ;;  %v264_v43 = vld [vmem:[#allocation2 + $0x138] ss:$2 sm:$0xff]  ;;  %v170_v45 = vld [vmem:[%s4210_s0 + $0x1e8] sm:$0xff]  ;;  %v171_v50 = vld [vmem:[%s4210_s0 + $0x1f0] sm:$0xff]  ;;  %vm1058_vm10 = vcmask 195744  }
  0x43   :  { %v169_v44 = vld [vmem:[%s4210_s0 + $0x1e0] sm:$0xff]  ;;  %235 = vst.msk [vmem:[#allocation2 + $0x321] sm:$0xff] %vm21_vm0, %v170_v45  ;;  %v268_v47 = vld [vmem:[#allocation2 + $0x168] ss:$2 sm:$0xff]  ;;  %v172_v51 = vld [vmem:[%s4210_s0 + $0x1f8] sm:$0xff]  ;;  %vm1125_vm11 = vcmask 294144  }
  0x44   :  { %1012 = vrot.lane.b32.xlu0 %v852_v17, %s2775_s28  ;;  %2612 = vmatpush3.msk.msra.mxu0 %vm1219_vm3, %v1162_v23  ;;  %v3204_v33 = vld [vmem:[#allocation2 + $0x2a0] ss:$2 sm:$0xff]  ;;  %234 = vst.msk [vmem:[#allocation2 + $0x319] sm:$0xff] %vm21_vm0, %v169_v44  ;;  %236 = vst.msk [vmem:[#allocation2 + $0x331] sm:$0xff] %vm21_vm0, %v171_v50  ;;  %v508_v52 = vld [vmem:[#allocation2 + $0x121] ss:$2 sm:$0xff] }
  0x45   :  { %318 = vst.msk [vmem:[#allocation4 + $0x68] sm:$0xff] %vm21_vm0, %v3204_v33  ;;  %v862_v46 = vld [vmem:[#allocation2 + $0xc2] ss:$2 sm:$0xff]  ;;  %237 = vst.msk [vmem:[#allocation2 + $0x339] sm:$0xff] %vm21_vm0, %v172_v51  ;;  %v3281_v58 = vld [vmem:[#allocation2 + $0x139] ss:$2 sm:$0xff] }
  0x46   :  { %654 = vrot.lane.b32.xlu1 %v3167_v21, %s2772_s10  ;;  %v270_v53 = vld [vmem:[#allocation2 + $0x180] ss:$2 sm:$0xff]  ;;  %v272_v57 = vld [vmem:[#allocation2 + $0x1b0] ss:$2 sm:$0xff]  ;;  %v512_v59 = vld [vmem:[#allocation2 + $0x151] ss:$2 sm:$0xff] }
  0x47   :  { %v864_v55 = vld [vmem:[#allocation2 + $0xda] ss:$2 sm:$0xff]  ;;  %313 = vst.msk [vmem:[#allocation4 + $0x40] sm:$0xff] %vm21_vm0, %v272_v57  ;;  %v868_v60 = vld [vmem:[#allocation2 + $0x10a] ss:$2 sm:$0xff]  ;;  %vm1170_vm12 = vcmask 293888  }
  0x48   :  { %345 = vrot.lane.b32.xlu0 %v256_v22, %s2770_s15  ;;  %v3288_v61 = vld [vmem:[#allocation2 + $0x169] ss:$2 sm:$0xff]  ;;  %v274_v62 = vld [vmem:[#allocation2 + $0x1c8] ss:$2 sm:$0xff]  ;;  %v278_v4 = vld [vmem:[#allocation2 + $0x1f8] ss:$2 sm:$0xff] }
  0x49   :  { %v870_v1 = vld [vmem:[#allocation2 + $0x122] ss:$2 sm:$0xff]  ;;  %v516_v7 = vld [vmem:[#allocation2 + $0x181] ss:$2 sm:$0xff]  ;;  %v518_v11 = vld [vmem:[#allocation2 + $0x1b1] ss:$2 sm:$0xff] }
  0x4a   :  { %1079 = vrot.lane.b32.xlu1 %v854_v25, %s2776_s22  ;;  %v872_v14 = vld [vmem:[#allocation2 + $0x13a] ss:$2 sm:$0xff]  ;;  %v3313_v18 = vld [vmem:[#allocation2 + $0x1c9] ss:$2 sm:$0xff]  ;;  %v876_v23 = vld [vmem:[#allocation2 + $0x16a] ss:$2 sm:$0xff] }
  0x4b   :  { %v874_v16 = vld [vmem:[#allocation2 + $0x152] ss:$2 sm:$0xff]  ;;  %v522_v20 = vld [vmem:[#allocation2 + $0x1e1] ss:$2 sm:$0xff]  ;;  %v526_v40 = vld [vmem:[#allocation2 + $0x211] ss:$2 sm:$0xff] }
  0x4c   :  { %784 = vrot.lane.b32.xlu0 %v496_v10, %s2773_s20  ;;  %v282_v27 = vld [vmem:[#allocation2 + $0x228] ss:$2 sm:$0xff]  ;;  %v3353_v48 = vld [vmem:[#allocation2 + $0x229] ss:$2 sm:$0xff]  ;;  %vm1384_vm13 = vcmask 64512   ;;  %vm1395_vm14 = vcmask 57344  }
  0x4d   :  { %v530_v50 = vld [vmem:[#allocation2 + $0x241] ss:$2 sm:$0xff]  ;;  %1385 = vst.msk [vmem:[#allocation3] sm:$0xff] %vm1384_vm13, %v2768_v2  ;;  %1388 = vst.msk [vmem:[#allocation3 + $0xa0] sm:$0xff] %vm1384_vm13, %v2768_v2  ;;  %vm1386_vm15 = vcmask 58368   ;;  %s2781_s11 = smov 40  }
  0x4e   :  { %426 = vrot.lane.b32.xlu1 %v2996_v32, %s2769_s14  ;;  %v3213_v32 = vld [vmem:[#allocation2 + $0x2d0] ss:$2 sm:$0xff]  ;;  %1391 = vst.msk [vmem:[#allocation3 + $0x90] sm:$0xff] %vm1384_vm13, %v2768_v2  ;;  %1393 = vst.msk [vmem:[#allocation3 + $0x130] sm:$0xff] %vm1384_vm13, %v2768_v2  ;;  %vm2782_vm1 = vmmov 1  }
  0x4f   :  { %319 = vst.msk [vmem:[#allocation4 + $0x70] sm:$0xff] %vm21_vm0, %v3213_v32  ;;  %vm2706_vm2 = vmpackc.low %vm1219_vm3, %vm2782_vm1  ;;  %vm1553_vm3 = vcmask 261312  }
  0x50   :  { %347 = vrot.lane.b32.xlu0 %v260_v29, %s2770_s15  ;;  %v878_v29 = vld [vmem:[#allocation2 + $0x182] ss:$2 sm:$0xff]  ;;  %1405 = vst.msk [vmem:[#allocation3 + $0x90] sm:$0x1] %vm1395_vm14, %v2768_v2  ;;  %1396 = vst.msk [vmem:[#allocation3] sm:$0x1] %vm1395_vm14, %v2768_v2 }
  0x51   :  { %1397 = vst.msk [vmem:[#allocation3 + $0x10] sm:$0x1] %vm1395_vm14, %v2768_v2  ;;  %1398 = vst.msk [vmem:[#allocation3 + $0x20] sm:$0x1] %vm1395_vm14, %v2768_v2 }
  0x52   :  { %933 = vrot.lane.b32.xlu1 %v854_v25, %s2774_s17  ;;  %v3324_v25 = vld [vmem:[#allocation2 + $0x1f9] ss:$2 sm:$0xff]  ;;  %1399 = vst.msk [vmem:[#allocation3 + $0x30] sm:$0x1] %vm1395_vm14, %v2768_v2  ;;  %1400 = vst.msk [vmem:[#allocation3 + $0x40] sm:$0x1] %vm1395_vm14, %v2768_v2 }
  0x53   :  { %1401 = vst.msk [vmem:[#allocation3 + $0x50] sm:$0x1] %vm1395_vm14, %v2768_v2  ;;  %1402 = vst.msk [vmem:[#allocation3 + $0x60] sm:$0x1] %vm1395_vm14, %v2768_v2 }
  0x54   :  { %786 = vrot.lane.b32.xlu0 %v500_v34, %s2773_s20  ;;  %1403 = vst.msk [vmem:[#allocation3 + $0x70] sm:$0x1] %vm1395_vm14, %v2768_v2  ;;  %1404 = vst.msk [vmem:[#allocation3 + $0x80] sm:$0x1] %vm1395_vm14, %v2768_v2 }
  0x55   :  { %1406 = vst.msk [vmem:[#allocation3 + $0xa0] sm:$0x1] %vm1395_vm14, %v2768_v2  ;;  %1407 = vst.msk [vmem:[#allocation3 + $0xb0] sm:$0x1] %vm1395_vm14, %v2768_v2 }
  0x56   :  { %575 = vrot.lane.b32.xlu1 %v500_v34, %s2771_s18  ;;  %1408 = vst.msk [vmem:[#allocation3 + $0xc0] sm:$0x1] %vm1395_vm14, %v2768_v2  ;;  %1409 = vst.msk [vmem:[#allocation3 + $0xd0] sm:$0x1] %vm1395_vm14, %v2768_v2 }
  0x57   :  { %1410 = vst.msk [vmem:[#allocation3 + $0xe0] sm:$0x1] %vm1395_vm14, %v2768_v2  ;;  %1411 = vst.msk [vmem:[#allocation3 + $0xf0] sm:$0x1] %vm1395_vm14, %v2768_v2 }
  0x58   :  { %428 = vrot.lane.b32.xlu0 %v3050_v49, %s2769_s14  ;;  %v168_v49 = vld [vmem:[%s4210_s0 + $0x1d8] sm:$0xff]  ;;  %1412 = vst.msk [vmem:[#allocation3 + $0x100] sm:$0x1] %vm1395_vm14, %v2768_v2  ;;  %1413 = vst.msk [vmem:[#allocation3 + $0x110] sm:$0x1] %vm1395_vm14, %v2768_v2  ;;  %s2777_s0 = smov 72  }
  0x59   :  { %233 = vst.msk [vmem:[#allocation2 + $0x309] sm:$0xff] %vm21_vm0, %v168_v49 }
  0x5a   :  { %1014 = vrot.lane.b32.xlu1 %v856_v35, %s2775_s28  ;;  %v286_v35 = vld [vmem:[#allocation2 + $0x258] ss:$2 sm:$0xff]  ;;  %1414 = vst.msk [vmem:[#allocation3 + $0x120] sm:$0x1] %vm1395_vm14, %v2768_v2  ;;  %1415 = vst.msk [vmem:[#allocation3 + $0x130] sm:$0x1] %vm1395_vm14, %v2768_v2 }
  0x5b   :  { %1417 = vst.msk [vmem:[#allocation3 + $0x19] sm:$0x1] %vm1395_vm14, %v2768_v2  ;;  %1418 = vst.msk [vmem:[#allocation3 + $0x29] sm:$0x1] %vm1395_vm14, %v2768_v2 }
  0x5c   :  { %935 = vrot.lane.b32.xlu0 %v858_v36, %s2774_s17  ;;  %1419 = vst.msk [vmem:[#allocation3 + $0x39] sm:$0x1] %vm1395_vm14, %v2768_v2  ;;  %1420 = vst.msk [vmem:[#allocation3 + $0x49] sm:$0x1] %vm1395_vm14, %v2768_v2 }
  0x5d   :  { %1421 = vst.msk [vmem:[#allocation3 + $0x59] sm:$0x1] %vm1395_vm14, %v2768_v2  ;;  %1422 = vst.msk [vmem:[#allocation3 + $0x69] sm:$0x1] %vm1395_vm14, %v2768_v2 }
  0x5e   :  { %656 = vrot.lane.b32.xlu1 %v3221_v37, %s2772_s10  ;;  %1423 = vst.msk [vmem:[#allocation3 + $0x79] sm:$0x1] %vm1395_vm14, %v2768_v2  ;;  %1424 = vst.msk [vmem:[#allocation3 + $0x89] sm:$0x1] %vm1395_vm14, %v2768_v2 }
  0x5f   :  { %1427 = vst.msk [vmem:[#allocation3 + $0xb9] sm:$0x1] %vm1395_vm14, %v2768_v2  ;;  %1428 = vst.msk [vmem:[#allocation3 + $0xc9] sm:$0x1] %vm1395_vm14, %v2768_v2 }
  0x60   :  { %577 = vrot.lane.b32.xlu0 %v504_v38, %s2771_s18  ;;  %v3272_v54 = vld [vmem:[#allocation2 + $0x300] ss:$2 sm:$0xff]  ;;  %1429 = vst.msk [vmem:[#allocation3 + $0xd9] sm:$0x1] %vm1395_vm14, %v2768_v2  ;;  %1430 = vst.msk [vmem:[#allocation3 + $0xe9] sm:$0x1] %vm1395_vm14, %v2768_v2 }
  0x61   :  { %320 = vst.msk [vmem:[#allocation4 + $0x78] sm:$0xff] %vm21_vm0, %v3272_v54  ;;  %vm761_vm0 = vcmask 622144  }
  0x62   :  { %1081 = vrot.lane.b32.xlu1 %v858_v36, %s2776_s22  ;;  %1431 = vst.msk [vmem:[#allocation3 + $0xf9] sm:$0x1] %vm1395_vm14, %v2768_v2  ;;  %1432 = vst.msk [vmem:[#allocation3 + $0x109] sm:$0x1] %vm1395_vm14, %v2768_v2 }
  0x63   :  { %1433 = vst.msk [vmem:[#allocation3 + $0x119] sm:$0x1] %vm1395_vm14, %v2768_v2  ;;  %1434 = vst.msk [vmem:[#allocation3 + $0x129] sm:$0x1] %vm1395_vm14, %v2768_v2 }
  0x64   :  { %1016 = vrot.lane.b32.xlu0 %v860_v41, %s2775_s28  ;;  %1392 = vst.msk [vmem:[#allocation3 + $0x98] sm:$0x3] %vm1386_vm15, %v2768_v2  ;;  %1387 = vst.msk [vmem:[#allocation3 + $0x8] sm:$0x3] %vm1386_vm15, %v2768_v2 }
  0x65   :  { %1389 = vst.msk [vmem:[#allocation3 + $0xa8] sm:$0x3] %vm1386_vm15, %v2768_v2  ;;  %1394 = vst.msk [vmem:[#allocation3 + $0x138] sm:$0x3] %vm1386_vm15, %v2768_v2 }
  0x66   :  { %658 = vrot.lane.b32.xlu1 %v3236_v42, %s2772_s10  ;;  %1425 = vst.msk [vmem:[#allocation3 + $0x99] sm:$0x1] %vm1395_vm14, %v2768_v2  ;;  %1416 = vst.msk [vmem:[#allocation3 + $0x9] sm:$0x1] %vm1395_vm14, %v2768_v2 }
  0x67   :  { %1426 = vst.msk [vmem:[#allocation3 + $0xa9] sm:$0x1] %vm1395_vm14, %v2768_v2  ;;  %1435 = vst.msk [vmem:[#allocation3 + $0x139] sm:$0x1] %vm1395_vm14, %v2768_v2 }
  0x68   :  { %349 = vrot.lane.b32.xlu0 %v264_v43, %s2770_s15 }
  0x6a   :  { %1083 = vrot.lane.b32.xlu1 %v862_v46, %s2776_s22 }
  0x6c   :  { %788 = vrot.lane.b32.xlu0 %v504_v38, %s2773_s20  ;;  %v880_v38 = vld [vmem:[#allocation2 + $0x1b2] ss:$2 sm:$0xff] }
  0x6e   :  { %430 = vrot.lane.b32.xlu1 %v3079_v56, %s2769_s14  ;;  %v866_v56 = vld [vmem:[#allocation2 + $0xf2] ss:$2 sm:$0xff] }
  0x70   :  { %351 = vrot.lane.b32.xlu0 %v268_v47, %s2770_s15 }
  0x72   :  { %937 = vrot.lane.b32.xlu1 %v862_v46, %s2774_s17  ;;  %v884_v46 = vld [vmem:[#allocation2 + $0x1e2] ss:$2 sm:$0xff] }
  0x74   :  { %790 = vrot.lane.b32.xlu0 %v508_v52, %s2773_s20 }
  0x76   :  { %579 = vrot.lane.b32.xlu1 %v508_v52, %s2771_s18 }
  0x78   :  { %432 = vrot.lane.b32.xlu0 %v270_v53, %s2769_s14  ;;  %v886_v53 = vld [vmem:[#allocation2 + $0x1fa] ss:$2 sm:$0xff] }
  0x7a   :  { %1018 = vrot.lane.b32.xlu1 %v864_v55, %s2775_s28 }
  0x7c   :  { %939 = vrot.lane.b32.xlu0 %v866_v56, %s2774_s17 }
  0x7e   :  { %660 = vrot.lane.b32.xlu1 %v3281_v58, %s2772_s10 }
  0x80   :  { %581 = vrot.lane.b32.xlu0 %v512_v59, %s2771_s18  ;;  %v419_v3 = vpop.permute.xlu1 %418 }
  0x82   :  { %1085 = vrot.lane.b32.xlu1 %v866_v56, %s2776_s22  ;;  %v3365_v56 = vld [vmem:[#allocation2 + $0x259] ss:$2 sm:$0xff] }
  0x84   :  { %1020 = vrot.lane.b32.xlu0 %v868_v60, %s2775_s28 }
  0x86   :  { %662 = vrot.lane.b32.xlu1 %v3288_v61, %s2772_s10 }
  0x88   :  { %353 = vrot.lane.b32.xlu0 %v274_v62, %s2770_s15 }
  0x8a   :  { %1087 = vrot.lane.b32.xlu1 %v870_v1, %s2776_s22 }
  0x8c   :  { %792 = vrot.lane.b32.xlu0 %v512_v59, %s2773_s20  ;;  %v290_v59 = vld [vmem:[#allocation2 + $0x288] ss:$2 sm:$0xff] }
  0x8e   :  { %v338_v5 = vpop.permute.xlu0 %337  ;;  %434 = vrot.lane.b32.xlu1 %v3100_v63, %s2769_s14 }
  0x8f   :  { %386 = vst.msk [vmem:[#allocation4] sm:$0xff] %vm385_vm4, %v338_v5 }
  0x90   :  { %355 = vrot.lane.b32.xlu0 %v278_v4, %s2770_s15  ;;  %467 = vst.msk [vmem:[#allocation4] sm:$0xff] %vm466_vm5, %v419_v3  ;;  %v421_v6 = vpop.permute.xlu1 %420 }
  0x92   :  { %v340_v10 = vpop.permute.xlu0 %339  ;;  %941 = vrot.lane.b32.xlu1 %v870_v1, %s2774_s17  ;;  %v888_v1 = vld [vmem:[#allocation2 + $0x212] ss:$2 sm:$0xff] }
  0x93   :  { %387 = vst.msk [vmem:[#allocation4 + $0x8] sm:$0xff] %vm385_vm4, %v340_v10 }
  0x94   :  { %794 = vrot.lane.b32.xlu0 %v516_v7, %s2773_s20  ;;  %468 = vst.msk [vmem:[#allocation4 + $0x8] sm:$0xff] %vm466_vm5, %v421_v6  ;;  %v570_v12 = vpop.permute.xlu1 %569  ;;  %v294_v6 = vld [vmem:[#allocation2 + $0x2b8] ss:$2 sm:$0xff] }
  0x95   :  { %617 = vst.msk [vmem:[#allocation4 + $0x8] sm:$0xff] %vm615_vm6, %v570_v12 }
  0x96   :  { %v568_v63 = vpop.permute.xlu0 %567  ;;  %583 = vrot.lane.b32.xlu1 %v518_v11, %s2771_s18  ;;  %v534_v11 = vld [vmem:[#allocation2 + $0x271] ss:$2 sm:$0xff] }
  0x97   :  { %616 = vst.msk [vmem:[#allocation4] sm:$0xff] %vm615_vm6, %v568_v63 }
  0x98   :  { %436 = vrot.lane.b32.xlu0 %v3107_v0, %s2769_s14  ;;  %v342_v15 = vpop.permute.xlu1 %341 }
  0x99   :  { %388 = vst.msk [vmem:[#allocation4 + $0x10] sm:$0xff] %vm385_vm4, %v342_v15 }
  0x9a   :  { %v649_v17 = vpop.permute.xlu0 %648  ;;  %1022 = vrot.lane.b32.xlu1 %v872_v14, %s2775_s28 }
  0x9b   :  { %697 = vst.msk [vmem:[#allocation4] sm:$0xff] %vm696_vm7, %v649_v17 }
  0x9c   :  { %943 = vrot.lane.b32.xlu0 %v874_v16, %s2774_s17  ;;  %v781_v19 = vpop.permute.xlu1 %780 }
  0x9d   :  { %829 = vst.msk [vmem:[#allocation4] sm:$0xff] %vm828_vm8, %v781_v19  ;;  %v536_v19 = vld [vmem:[#allocation2 + $0x289] ss:$2 sm:$0xff] }
  0x9e   :  { %v651_v0 = vpop.permute.xlu0 %650  ;;  %664 = vrot.lane.b32.xlu1 %v3313_v18, %s2772_s10 }
  0x9f   :  { %698 = vst.msk [vmem:[#allocation4 + $0x8] sm:$0xff] %vm696_vm7, %v651_v0  ;;  %v538_v0 = vld [vmem:[#allocation2 + $0x2a1] ss:$2 sm:$0xff] }
  0xa0   :  { %585 = vrot.lane.b32.xlu0 %v522_v20, %s2771_s18  ;;  %v423_v22 = vpop.permute.xlu1 %422 }
  0xa1   :  { %469 = vst.msk [vmem:[#allocation4 + $0x10] sm:$0xff] %vm466_vm5, %v423_v22 }
  0xa2   :  { %v344_v24 = vpop.permute.xlu0 %343  ;;  %1089 = vrot.lane.b32.xlu1 %v874_v16, %s2776_s22  ;;  %v892_v16 = vld [vmem:[#allocation2 + $0x242] ss:$2 sm:$0xff] }
  0xa3   :  { %389 = vst.msk [vmem:[#allocation4 + $0x18] sm:$0xff] %vm385_vm4, %v344_v24  ;;  %v894_v24 = vld [vmem:[#allocation2 + $0x25a] ss:$2 sm:$0xff] }
  0xa4   :  { %1024 = vrot.lane.b32.xlu0 %v876_v23, %s2775_s28  ;;  %v930_v26 = vpop.permute.xlu1 %929 }
  0xa5   :  { %978 = vst.msk [vmem:[#allocation4] sm:$0xff] %vm977_vm9, %v930_v26 }
  0xa6   :  { %v783_v28 = vpop.permute.xlu0 %782  ;;  %666 = vrot.lane.b32.xlu1 %v3324_v25, %s2772_s10 }
  0xa7   :  { %830 = vst.msk [vmem:[#allocation4 + $0x8] sm:$0xff] %vm828_vm8, %v783_v28 }
  0xa8   :  { %357 = vrot.lane.b32.xlu0 %v282_v27, %s2770_s15  ;;  %v572_v30 = vpop.permute.xlu1 %571  ;;  %v540_v27 = vld [vmem:[#allocation2 + $0x2b9] ss:$2 sm:$0xff] }
  0xa9   :  { %618 = vst.msk [vmem:[#allocation4 + $0x10] sm:$0xff] %vm615_vm6, %v572_v30  ;;  %v298_v30 = vld [vmem:[#allocation2 + $0x2e8] ss:$2 sm:$0xff] }
  0xaa   :  { %v425_v31 = vpop.permute.xlu0 %424  ;;  %1091 = vrot.lane.b32.xlu1 %v878_v29, %s2776_s22 }
  0xab   :  { %470 = vst.msk [vmem:[#allocation4 + $0x18] sm:$0xff] %vm466_vm5, %v425_v31 }
  0xac   :  { %796 = vrot.lane.b32.xlu0 %v522_v20, %s2773_s20  ;;  %v1011_v34 = vpop.permute.xlu1 %1010 }
  0xad   :  { %1059 = vst.msk [vmem:[#allocation4] sm:$0xff] %vm1058_vm10, %v1011_v34  ;;  %v896_v34 = vld [vmem:[#allocation2 + $0x272] ss:$2 sm:$0xff] }
  0xae   :  { %v932_v36 = vpop.permute.xlu0 %931  ;;  %438 = vrot.lane.b32.xlu1 %v3130_v8, %s2769_s14  ;;  %v882_v8 = vld [vmem:[#allocation2 + $0x1ca] ss:$2 sm:$0xff] }
  0xaf   :  { %979 = vst.msk [vmem:[#allocation4 + $0x8] sm:$0xff] %vm977_vm9, %v932_v36 }
  0xb0   :  { %359 = vrot.lane.b32.xlu0 %v286_v35, %s2770_s15  ;;  %v653_v39 = vpop.permute.xlu1 %652 }
  0xb1   :  { %699 = vst.msk [vmem:[#allocation4 + $0x10] sm:$0xff] %vm696_vm7, %v653_v39  ;;  %v302_v39 = vld [vmem:[#allocation2 + $0x318] ss:$2 sm:$0xff] }
  0xb2   :  { %v574_v41 = vpop.permute.xlu0 %573  ;;  %945 = vrot.lane.b32.xlu1 %v880_v38, %s2774_s17 }
  0xb3   :  { %619 = vst.msk [vmem:[#allocation4 + $0x18] sm:$0xff] %vm615_vm6, %v574_v41 }
  0xb4   :  { %798 = vrot.lane.b32.xlu0 %v526_v40, %s2773_s20  ;;  %v1078_v43 = vpop.permute.xlu1 %1077 }
  0xb5   :  { %1126 = vst.msk [vmem:[#allocation4] sm:$0xff] %vm1125_vm11, %v1078_v43  ;;  %v542_v43 = vld [vmem:[#allocation2 + $0x2d1] ss:$2 sm:$0xff] }
  0xb6   :  { %v1013_v44 = vpop.permute.xlu0 %1012  ;;  %587 = vrot.lane.b32.xlu1 %v526_v40, %s2771_s18 }
  0xb7   :  { %1060 = vst.msk [vmem:[#allocation4 + $0x8] sm:$0xff] %vm1058_vm10, %v1013_v44 }
  0xb8   :  { %440 = vrot.lane.b32.xlu0 %v3144_v13, %s2769_s14  ;;  %v655_v45 = vpop.permute.xlu1 %654 }
  0xb9   :  { %700 = vst.msk [vmem:[#allocation4 + $0x18] sm:$0xff] %vm696_vm7, %v655_v45  ;;  %v304_v45 = vld [vmem:[#allocation2 + $0x330] ss:$2 sm:$0xff] }
  0xba   :  { %v346_v47 = vpop.permute.xlu0 %345  ;;  %1026 = vrot.lane.b32.xlu1 %v882_v8, %s2775_s28 }
  0xbb   :  { %390 = vst.msk [vmem:[#allocation4 + $0x20] sm:$0xff] %vm385_vm4, %v346_v47 }
  0xbc   :  { %947 = vrot.lane.b32.xlu0 %v884_v46, %s2774_s17  ;;  %v1080_v49 = vpop.permute.xlu1 %1079  ;;  %v1142_v51 = vld [vmem:[#allocation4] sm:$0xff] }
  0xbd   :  { %1127 = vst.msk [vmem:[#allocation4 + $0x8] sm:$0xff] %vm1125_vm11, %v1080_v49  ;;  %2613 = vmatprep.mubr.msk.f32.mxu0 %vm1170_vm12, %v1142_v51  ;;  %v900_v49 = vld [vmem:[#allocation2 + $0x2a2] ss:$2 sm:$0xff]  ;;  %v544_v51 = vld [vmem:[#allocation2 + $0x2e9] ss:$2 sm:$0xff] }
  0xbe   :  { %v785_v13 = vpop.permute.xlu0 %784  ;;  %668 = vrot.lane.b32.xlu1 %v3353_v48, %s2772_s10 }
  0xbf   :  { %831 = vst.msk [vmem:[#allocation4 + $0x10] sm:$0xff] %vm828_vm8, %v785_v13 }
  0xc0   :  { %589 = vrot.lane.b32.xlu0 %v530_v50, %s2771_s18  ;;  %v427_v52 = vpop.permute.xlu1 %426 }
  0xc1   :  { %471 = vst.msk [vmem:[#allocation4 + $0x20] sm:$0xff] %vm466_vm5, %v427_v52  ;;  %v546_v52 = vld [vmem:[#allocation2 + $0x301] ss:$2 sm:$0xff] }
  0xc2   :  { %v348_v55 = vpop.permute.xlu0 %347  ;;  %1093 = vrot.lane.b32.xlu1 %v884_v46, %s2776_s22 }
  0xc3   :  { %391 = vst.msk [vmem:[#allocation4 + $0x28] sm:$0xff] %vm385_vm4, %v348_v55 }
  0xc4   :  { %1028 = vrot.lane.b32.xlu0 %v886_v53, %s2775_s28  ;;  %v934_v57 = vpop.permute.xlu1 %933  ;;  %v1143_v60 = vld [vmem:[#allocation4 + $0x8] sm:$0xff] }
  0xc5   :  { %980 = vst.msk [vmem:[#allocation4 + $0x10] sm:$0xff] %vm977_vm9, %v934_v57  ;;  %2614 = vmatmul.mubr.msk.f32.vlgmr.msra.gmra.mrb[0].mxu0 %vm1170_vm12, %v1143_v60 }
  0xc6   :  { %v787_v62 = vpop.permute.xlu0 %786  ;;  %670 = vrot.lane.b32.xlu1 %v3365_v56, %s2772_s10 }
  0xc7   :  { %832 = vst.msk [vmem:[#allocation4 + $0x18] sm:$0xff] %vm828_vm8, %v787_v62 }
  0xc8   :  { %361 = vrot.lane.b32.xlu0 %v290_v59, %s2770_s15  ;;  %v576_v3 = vpop.permute.xlu1 %575  ;;  %v902_v59 = vld [vmem:[#allocation2 + $0x2ba] ss:$2 sm:$0xff] }
  0xc9   :  { %620 = vst.msk [vmem:[#allocation4 + $0x20] sm:$0xff] %vm615_vm6, %v576_v3  ;;  %v548_v3 = vld [vmem:[#allocation2 + $0x319] ss:$2 sm:$0xff] }
  0xca   :  { %v429_v4 = vpop.permute.xlu0 %428  ;;  %1095 = vrot.lane.b32.xlu1 %v888_v1, %s2776_s22 }
  0xcb   :  { %472 = vst.msk [vmem:[#allocation4 + $0x28] sm:$0xff] %vm466_vm5, %v429_v4 }
  0xcc   :  { %800 = vrot.lane.b32.xlu0 %v530_v50, %s2773_s20  ;;  %v1015_v5 = vpop.permute.xlu1 %1014 }
  0xcd   :  { %1061 = vst.msk [vmem:[#allocation4 + $0x10] sm:$0xff] %vm1058_vm10, %v1015_v5  ;;  %v550_v5 = vld [vmem:[#allocation2 + $0x331] ss:$2 sm:$0xff] }
  0xce   :  { %v936_v7 = vpop.permute.xlu0 %935  ;;  %442 = vrot.lane.b32.xlu1 %v3204_v33, %s2769_s14  ;;  %v890_v33 = vld [vmem:[#allocation2 + $0x22a] ss:$2 sm:$0xff] }
  0xcf   :  { %981 = vst.msk [vmem:[#allocation4 + $0x18] sm:$0xff] %vm977_vm9, %v936_v7  ;;  %v904_v7 = vld [vmem:[#allocation2 + $0x2d2] ss:$2 sm:$0xff] }
  0xd0   :  { %363 = vrot.lane.b32.xlu0 %v294_v6, %s2770_s15  ;;  %v657_v10 = vpop.permute.xlu1 %656 }
  0xd1   :  { %701 = vst.msk [vmem:[#allocation4 + $0x20] sm:$0xff] %vm696_vm7, %v657_v10 }
  0xd2   :  { %v578_v12 = vpop.permute.xlu0 %577  ;;  %949 = vrot.lane.b32.xlu1 %v888_v1, %s2774_s17 }
  0xd3   :  { %621 = vst.msk [vmem:[#allocation4 + $0x28] sm:$0xff] %vm615_vm6, %v578_v12 }
  0xd4   :  { %802 = vrot.lane.b32.xlu0 %v534_v11, %s2773_s20  ;;  %v1082_v63 = vpop.permute.xlu1 %1081 }
  0xd5   :  { %1128 = vst.msk [vmem:[#allocation4 + $0x10] sm:$0xff] %vm1125_vm11, %v1082_v63 }
  0xd6   :  { %v1017_v14 = vpop.permute.xlu0 %1016  ;;  %591 = vrot.lane.b32.xlu1 %v534_v11, %s2771_s18  ;;  %v908_v11 = vld [vmem:[#allocation2 + $0x302] ss:$2 sm:$0xff] }
  0xd7   :  { %1062 = vst.msk [vmem:[#allocation4 + $0x18] sm:$0xff] %vm1058_vm10, %v1017_v14  ;;  %v910_v14 = vld [vmem:[#allocation2 + $0x31a] ss:$2 sm:$0xff] }
  0xd8   :  { %444 = vrot.lane.b32.xlu0 %v3213_v32, %s2769_s14  ;;  %v659_v15 = vpop.permute.xlu1 %658 }
  0xd9   :  { %702 = vst.msk [vmem:[#allocation4 + $0x28] sm:$0xff] %vm696_vm7, %v659_v15  ;;  %v906_v15 = vld [vmem:[#allocation2 + $0x2ea] ss:$2 sm:$0xff] }
  0xda   :  { %v350_v17 = vpop.permute.xlu0 %349  ;;  %1030 = vrot.lane.b32.xlu1 %v890_v33, %s2775_s28 }
  0xdb   :  { %392 = vst.msk [vmem:[#allocation4 + $0x30] sm:$0xff] %vm385_vm4, %v350_v17  ;;  %v912_v17 = vld [vmem:[#allocation2 + $0x332] ss:$2 sm:$0xff] }
  0xdc   :  { %951 = vrot.lane.b32.xlu0 %v892_v16, %s2774_s17  ;;  %v1084_v20 = vpop.permute.xlu1 %1083  ;;  %v1144_v22 = vld [vmem:[#allocation4 + $0x10] sm:$0xff] }
  0xdd   :  { %1129 = vst.msk [vmem:[#allocation4 + $0x18] sm:$0xff] %vm1125_vm11, %v1084_v20  ;;  %2616 = vmatprep.mubr.msk.f32.mxu0 %vm1170_vm12, %v1144_v22 }
  0xde   :  { %v789_v23 = vpop.permute.xlu0 %788  ;;  %672 = vrot.lane.b32.xlu1 %v536_v19, %s2772_s10 }
  0xdf   :  { %833 = vst.msk [vmem:[#allocation4 + $0x20] sm:$0xff] %vm828_vm8, %v789_v23 }
  0xe0   :  { %593 = vrot.lane.b32.xlu0 %v538_v0, %s2771_s18  ;;  %v431_v32 = vpop.permute.xlu1 %430 }
  0xe1   :  { %473 = vst.msk [vmem:[#allocation4 + $0x30] sm:$0xff] %vm466_vm5, %v431_v32 }
  0xe2   :  { %v352_v26 = vpop.permute.xlu0 %351  ;;  %1097 = vrot.lane.b32.xlu1 %v892_v16, %s2776_s22 }
  0xe3   :  { %393 = vst.msk [vmem:[#allocation4 + $0x38] sm:$0xff] %vm385_vm4, %v352_v26 }
  0xe4   :  { %1032 = vrot.lane.b32.xlu0 %v894_v24, %s2775_s28  ;;  %v938_v28 = vpop.permute.xlu1 %937  ;;  %v1145_v29 = vld [vmem:[#allocation4 + $0x18] sm:$0xff] }
  0xe5   :  { %982 = vst.msk [vmem:[#allocation4 + $0x20] sm:$0xff] %vm977_vm9, %v938_v28  ;;  %2617 = vmatmul.mubr.msk.f32.gmra.mrb[2].mxu0 %vm1170_vm12, %v1145_v29 }
  0xe6   :  { %v791_v31 = vpop.permute.xlu0 %790  ;;  %674 = vrot.lane.b32.xlu1 %v540_v27, %s2772_s10 }
  0xe7   :  { %834 = vst.msk [vmem:[#allocation4 + $0x28] sm:$0xff] %vm828_vm8, %v791_v31 }
  0xe8   :  { %365 = vrot.lane.b32.xlu0 %v298_v30, %s2770_s15  ;;  %v580_v35 = vpop.permute.xlu1 %579  ;;  %v1646_v30 = vld [vmem:[#allocation3 + $0x91] sm:$0xff] }
  0xe9   :  { %622 = vst.msk [vmem:[#allocation4 + $0x30] sm:$0xff] %vm615_vm6, %v580_v35 }
  0xea   :  { %v433_v36 = vpop.permute.xlu0 %432  ;;  %1099 = vrot.lane.b32.xlu1 %v896_v34, %s2776_s22 }
  0xeb   :  { %474 = vst.msk [vmem:[#allocation4 + $0x38] sm:$0xff] %vm466_vm5, %v433_v36 }
  0xec   :  { %804 = vrot.lane.b32.xlu0 %v538_v0, %s2773_s20  ;;  %v1019_v38 = vpop.permute.xlu1 %1018 }
  0xed   :  { %1063 = vst.msk [vmem:[#allocation4 + $0x20] sm:$0xff] %vm1058_vm10, %v1019_v38 }
  0xee   :  { %v940_v40 = vpop.permute.xlu0 %939  ;;  %446 = vrot.lane.b32.xlu1 %v3272_v54, %s2769_s14  ;;  %v898_v54 = vld [vmem:[#allocation2 + $0x28a] ss:$2 sm:$0xff] }
  0xef   :  { %983 = vst.msk [vmem:[#allocation4 + $0x28] sm:$0xff] %vm977_vm9, %v940_v40 }
  0xf0   :  { %367 = vrot.lane.b32.xlu0 %v302_v39, %s2770_s15  ;;  %v661_v41 = vpop.permute.xlu1 %660  ;;  %s2778_s15 = smov 48   ;;  %v1647_v39 = vld [vmem:[#allocation3 + $0xa1] sm:$0xff] }
  0xf1   :  { %703 = vst.msk [vmem:[#allocation4 + $0x30] sm:$0xff] %vm696_vm7, %v661_v41 }
  0xf2   :  { %v582_v44 = vpop.permute.xlu0 %581  ;;  %953 = vrot.lane.b32.xlu1 %v896_v34, %s2774_s17 }
  0xf3   :  { %623 = vst.msk [vmem:[#allocation4 + $0x38] sm:$0xff] %vm615_vm6, %v582_v44 }
  0xf4   :  { %806 = vrot.lane.b32.xlu0 %v542_v43, %s2773_s20  ;;  %v1086_v8 = vpop.permute.xlu1 %1085 }
  0xf5   :  { %1130 = vst.msk [vmem:[#allocation4 + $0x20] sm:$0xff] %vm1125_vm11, %v1086_v8 }
  0xf6   :  { %v1021_v46 = vpop.permute.xlu0 %1020  ;;  %595 = vrot.lane.b32.xlu1 %v542_v43, %s2771_s18 }
  0xf7   :  { %1064 = vst.msk [vmem:[#allocation4 + $0x28] sm:$0xff] %vm1058_vm10, %v1021_v46 }
  0xf8   :  { %448 = vrot.lane.b32.xlu0 %v304_v45, %s2769_s14  ;;  %v663_v47 = vpop.permute.xlu1 %662 }
  0xf9   :  { %704 = vst.msk [vmem:[#allocation4 + $0x38] sm:$0xff] %vm696_vm7, %v663_v47 }
  0xfa   :  { %v354_v50 = vpop.permute.xlu0 %353  ;;  %1034 = vrot.lane.b32.xlu1 %v898_v54, %s2775_s28 }
  0xfb   :  { %394 = vst.msk [vmem:[#allocation4 + $0x40] sm:$0xff] %vm385_vm4, %v354_v50 }
  0xfc   :  { %955 = vrot.lane.b32.xlu0 %v900_v49, %s2774_s17  ;;  %v1088_v13 = vpop.permute.xlu1 %1087  ;;  %v1146_v53 = vld [vmem:[#allocation4 + $0x20] sm:$0xff] }
  0xfd   :  { %1131 = vst.msk [vmem:[#allocation4 + $0x28] sm:$0xff] %vm1125_vm11, %v1088_v13  ;;  %2619 = vmatprep.mubr.msk.f32.mxu0 %vm1170_vm12, %v1146_v53 }
  0xfe   :  { %v793_v55 = vpop.permute.xlu0 %792  ;;  %676 = vrot.lane.b32.xlu1 %v544_v51, %s2772_s10 }
  0xff   :  { %835 = vst.msk [vmem:[#allocation4 + $0x30] sm:$0xff] %vm828_vm8, %v793_v55 }
 0x100   :  { %597 = vrot.lane.b32.xlu0 %v546_v52, %s2771_s18  ;;  %v435_v57 = vpop.permute.xlu1 %434  ;;  %s2779_s18 = smov 56  }
 0x101   :  { %475 = vst.msk [vmem:[#allocation4 + $0x40] sm:$0xff] %vm466_vm5, %v435_v57 }
 0x102   :  { %v356_v60 = vpop.permute.xlu0 %355  ;;  %1101 = vrot.lane.b32.xlu1 %v900_v49, %s2776_s22 }
 0x103   :  { %395 = vst.msk [vmem:[#allocation4 + $0x48] sm:$0xff] %vm385_vm4, %v356_v60 }
 0x104   :  { %1036 = vrot.lane.b32.xlu0 %v902_v59, %s2775_s28  ;;  %v942_v62 = vpop.permute.xlu1 %941  ;;  %v1147_v1 = vld [vmem:[#allocation4 + $0x28] sm:$0xff] }
 0x105   :  { %984 = vst.msk [vmem:[#allocation4 + $0x30] sm:$0xff] %vm977_vm9, %v942_v62  ;;  %2620 = vmatmul.mubr.msk.f32.gmra.mrb[4].mxu0 %vm1170_vm12, %v1147_v1 }
 0x106   :  { %v795_v4 = vpop.permute.xlu0 %794  ;;  %808 = vrot.lane.b32.xlu1 %v546_v52, %s2773_s20 }
 0x107   :  { %836 = vst.msk [vmem:[#allocation4 + $0x38] sm:$0xff] %vm828_vm8, %v795_v4 }
 0x108   :  { %678 = vrot.lane.b32.xlu0 %v548_v3, %s2772_s10  ;;  %v584_v6 = vpop.permute.xlu1 %583 }
 0x109   :  { %624 = vst.msk [vmem:[#allocation4 + $0x40] sm:$0xff] %vm615_vm6, %v584_v6 }
 0x10a   :  { %v437_v10 = vpop.permute.xlu0 %436  ;;  %810 = vrot.lane.b32.xlu1 %v550_v5, %s2773_s20 }
 0x10b   :  { %476 = vst.msk [vmem:[#allocation4 + $0x48] sm:$0xff] %vm466_vm5, %v437_v10 }
 0x10c   :  { %1103 = vrot.lane.b32.xlu0 %v904_v7, %s2776_s22  ;;  %v1023_v12 = vpop.permute.xlu1 %1022 }
 0x10d   :  { %1065 = vst.msk [vmem:[#allocation4 + $0x30] sm:$0xff] %vm1058_vm10, %v1023_v12 }
 0x10e   :  { %v944_v63 = vpop.permute.xlu0 %943  ;;  %959 = vrot.lane.b32.xlu1 %v908_v11, %s2774_s17 }
 0x10f   :  { %985 = vst.msk [vmem:[#allocation4 + $0x38] sm:$0xff] %vm977_vm9, %v944_v63 }
 0x110   :  { %957 = vrot.lane.b32.xlu0 %v904_v7, %s2774_s17  ;;  %v665_v33 = vpop.permute.xlu1 %664 }
 0x111   :  { %705 = vst.msk [vmem:[#allocation4 + $0x40] sm:$0xff] %vm696_vm7, %v665_v33 }
 0x112   :  { %v586_v16 = vpop.permute.xlu0 %585  ;;  %1040 = vrot.lane.b32.xlu1 %v910_v14, %s2775_s28 }
 0x113   :  { %625 = vst.msk [vmem:[#allocation4 + $0x48] sm:$0xff] %vm615_vm6, %v586_v16 }
 0x114   :  { %1038 = vrot.lane.b32.xlu0 %v906_v15, %s2775_s28  ;;  %v1090_v19 = vpop.permute.xlu1 %1089 }
 0x115   :  { %1132 = vst.msk [vmem:[#allocation4 + $0x30] sm:$0xff] %vm1125_vm11, %v1090_v19 }
 0x116   :  { %v1025_v20 = vpop.permute.xlu0 %1024  ;;  %1107 = vrot.lane.b32.xlu1 %v912_v17, %s2776_s22 }
 0x117   :  { %1066 = vst.msk [vmem:[#allocation4 + $0x38] sm:$0xff] %vm1058_vm10, %v1025_v20 }
 0x118   :  { %1105 = vrot.lane.b32.xlu0 %v908_v11, %s2776_s22  ;;  %v667_v0 = vpop.permute.xlu1 %666 }
 0x119   :  { %706 = vst.msk [vmem:[#allocation4 + $0x48] sm:$0xff] %vm696_vm7, %v667_v0 }
 0x11a   :  { %v358_v22 = vpop.permute.xlu0 %357  ;;  %719 = vrot.lane.b32.xlu1 %v3167_v21, %s2777_s0 }
 0x11b   :  { %396 = vst.msk [vmem:[#allocation4 + $0x50] sm:$0xff] %vm385_vm4, %v358_v22 }
 0x11c   :  { %717 = vrot.lane.b32.xlu0 %v3136_v9, %s2777_s0  ;;  %v1092_v23 = vpop.permute.xlu1 %1091  ;;  %v1148_v32 = vld [vmem:[#allocation4 + $0x30] sm:$0xff] }
 0x11d   :  { %1133 = vst.msk [vmem:[#allocation4 + $0x38] sm:$0xff] %vm1125_vm11, %v1092_v23  ;;  %2622 = vmatprep.mubr.msk.f32.mxu0 %vm1170_vm12, %v1148_v32  ;;  %v1462_v9 = vld [vmem:[#allocation3 + $0x90] sm:$0xff] }
 0x11e   :  { %v797_v24 = vpop.permute.xlu0 %796  ;;  %721 = vrot.lane.b32.xlu1 %v3221_v37, %s2777_s0 }
 0x11f   :  { %837 = vst.msk [vmem:[#allocation4 + $0x40] sm:$0xff] %vm828_vm8, %v797_v24 }
 0x120   :  { %723 = vrot.lane.b32.xlu0 %v3236_v42, %s2777_s0  ;;  %v439_v26 = vpop.permute.xlu1 %438 }
 0x121   :  { %477 = vst.msk [vmem:[#allocation4 + $0x50] sm:$0xff] %vm466_vm5, %v439_v26 }
 0x122   :  { %v360_v21 = vpop.permute.xlu0 %359  ;;  %727 = vrot.lane.b32.xlu1 %v3288_v61, %s2777_s0 }
 0x123   :  { %397 = vst.msk [vmem:[#allocation4 + $0x58] sm:$0xff] %vm385_vm4, %v360_v21 }
 0x124   :  { %725 = vrot.lane.b32.xlu0 %v3281_v58, %s2777_s0  ;;  %v946_v27 = vpop.permute.xlu1 %945  ;;  %v1149_v28 = vld [vmem:[#allocation4 + $0x38] sm:$0xff] }
 0x125   :  { %986 = vst.msk [vmem:[#allocation4 + $0x40] sm:$0xff] %vm977_vm9, %v946_v27  ;;  %2623 = vmatmul.mubr.msk.f32.gmra.mrb[6].mxu0 %vm1170_vm12, %v1149_v28 }
 0x126   :  { %v799_v37 = vpop.permute.xlu0 %798  ;;  %1586 = vrot.lane.b32.xlu1 %v1462_v9, %s2778_s15 }
 0x127   :  { %838 = vst.msk [vmem:[#allocation4 + $0x48] sm:$0xff] %vm828_vm8, %v799_v37 }
 0x128   :  { %729 = vrot.lane.b32.xlu0 %v3313_v18, %s2777_s0  ;;  %v588_v42 = vpop.permute.xlu1 %587 }
 0x129   :  { %626 = vst.msk [vmem:[#allocation4 + $0x50] sm:$0xff] %vm615_vm6, %v588_v42 }
 0x12a   :  { %v441_v58 = vpop.permute.xlu0 %440  ;;  %731 = vrot.lane.b32.xlu1 %v3324_v25, %s2777_s0 }
 0x12b   :  { %478 = vst.msk [vmem:[#allocation4 + $0x58] sm:$0xff] %vm466_vm5, %v441_v58 }
 0x12c   :  { %v1027_v61 = vpop.permute.xlu1 %1026  ;;  %1821 = vrot.lane.b32.xlu0 %v1646_v30, %s2779_s18 }
 0x12d   :  { %1067 = vst.msk [vmem:[#allocation4 + $0x40] sm:$0xff] %vm1058_vm10, %v1027_v61  ;;  %v3651_v61 = vld [vmem:[%s4212_s2] ss:$0 sm:$0xff]  ;;  %s2780_s2 = smov 64  }
 0x12e   :  { %v948_v18 = vpop.permute.xlu0 %947  ;;  %735 = vrot.lane.b32.xlu1 %v3365_v56, %s2777_s0 }
 0x12f   :  { %987 = vst.msk [vmem:[#allocation4 + $0x48] sm:$0xff] %vm977_vm9, %v948_v18 }
 0x130   :  { %v669_v25 = vpop.permute.xlu1 %668  ;;  %733 = vrot.lane.b32.xlu0 %v3353_v48, %s2777_s0 }
 0x131   :  { %707 = vst.msk [vmem:[#allocation4 + $0x50] sm:$0xff] %vm696_vm7, %v669_v25 }
 0x132   :  { %v590_v29 = vpop.permute.xlu0 %589 }
 0x133   :  { %627 = vst.msk [vmem:[#allocation4 + $0x58] sm:$0xff] %vm615_vm6, %v590_v29 }
 0x134   :  { %v1094_v2 = vpop.permute.xlu1 %1093  ;;  %1689 = vrot.lane.b32.xlu0 %v1647_v39, %s2774_s17 }
 0x135   :  { %1134 = vst.msk [vmem:[#allocation4 + $0x40] sm:$0xff] %vm1125_vm11, %v1094_v2 }
 0x136   :  { %v1029_v31 = vpop.permute.xlu0 %1028 }
 0x137   :  { %1068 = vst.msk [vmem:[#allocation4 + $0x48] sm:$0xff] %vm1058_vm10, %v1029_v31 }
 0x138   :  { %v671_v56 = vpop.permute.xlu1 %670 }
 0x139   :  { %708 = vst.msk [vmem:[#allocation4 + $0x58] sm:$0xff] %vm696_vm7, %v671_v56 }
 0x13a   :  { %v362_v34 = vpop.permute.xlu0 %361 }
 0x13b   :  { %398 = vst.msk [vmem:[#allocation4 + $0x60] sm:$0xff] %vm385_vm4, %v362_v34 }
 0x13c   :  { %v1096_v35 = vpop.permute.xlu1 %1095  ;;  %v1150_v36 = vld [vmem:[#allocation4 + $0x40] sm:$0xff] }
 0x13d   :  { %1135 = vst.msk [vmem:[#allocation4 + $0x48] sm:$0xff] %vm1125_vm11, %v1096_v35  ;;  %2625 = vmatprep.mubr.msk.f32.mxu0 %vm1170_vm12, %v1150_v36 }
 0x13e   :  { %v801_v38 = vpop.permute.xlu0 %800 }
 0x13f   :  { %839 = vst.msk [vmem:[#allocation4 + $0x50] sm:$0xff] %vm828_vm8, %v801_v38 }
 0x140   :  { %v443_v40 = vpop.permute.xlu1 %442 }
 0x141   :  { %479 = vst.msk [vmem:[#allocation4 + $0x60] sm:$0xff] %vm466_vm5, %v443_v40 }
 0x142   :  { %v364_v48 = vpop.permute.xlu0 %363 }
 0x143   :  { %399 = vst.msk [vmem:[#allocation4 + $0x68] sm:$0xff] %vm385_vm4, %v364_v48 }
 0x144   :  { %v950_v41 = vpop.permute.xlu1 %949  ;;  %v1151_v43 = vld [vmem:[#allocation4 + $0x48] sm:$0xff] }
 0x145   :  { %988 = vst.msk [vmem:[#allocation4 + $0x50] sm:$0xff] %vm977_vm9, %v950_v41  ;;  %2626 = vmatmul.mubr.msk.f32.gmra.mrb[8].mxu0 %vm1170_vm12, %v1151_v43 }
 0x146   :  { %v803_v44 = vpop.permute.xlu0 %802 }
 0x147   :  { %840 = vst.msk [vmem:[#allocation4 + $0x58] sm:$0xff] %vm828_vm8, %v803_v44 }
 0x148   :  { %v592_v8 = vpop.permute.xlu1 %591 }
 0x149   :  { %628 = vst.msk [vmem:[#allocation4 + $0x60] sm:$0xff] %vm615_vm6, %v592_v8 }
 0x14a   :  { %v445_v45 = vpop.permute.xlu0 %444 }
 0x14b   :  { %480 = vst.msk [vmem:[#allocation4 + $0x68] sm:$0xff] %vm466_vm5, %v445_v45 }
 0x14c   :  { %v1031_v46 = vpop.permute.xlu1 %1030 }
 0x14d   :  { %1069 = vst.msk [vmem:[#allocation4 + $0x50] sm:$0xff] %vm1058_vm10, %v1031_v46 }
 0x14e   :  { %v952_v54 = vpop.permute.xlu0 %951 }
 0x14f   :  { %989 = vst.msk [vmem:[#allocation4 + $0x58] sm:$0xff] %vm977_vm9, %v952_v54 }
 0x150   :  { %v673_v47 = vpop.permute.xlu1 %672 }
 0x151   :  { %709 = vst.msk [vmem:[#allocation4 + $0x60] sm:$0xff] %vm696_vm7, %v673_v47 }
 0x152   :  { %v594_v49 = vpop.permute.xlu0 %593 }
 0x153   :  { %629 = vst.msk [vmem:[#allocation4 + $0x68] sm:$0xff] %vm615_vm6, %v594_v49 }
 0x154   :  { %v1098_v50 = vpop.permute.xlu1 %1097 }
 0x155   :  { %1136 = vst.msk [vmem:[#allocation4 + $0x50] sm:$0xff] %vm1125_vm11, %v1098_v50 }
 0x156   :  { %v1033_v51 = vpop.permute.xlu0 %1032 }
 0x157   :  { %1070 = vst.msk [vmem:[#allocation4 + $0x58] sm:$0xff] %vm1058_vm10, %v1033_v51 }
 0x158   :  { %v675_v13 = vpop.permute.xlu1 %674 }
 0x159   :  { %710 = vst.msk [vmem:[#allocation4 + $0x68] sm:$0xff] %vm696_vm7, %v675_v13 }
 0x15a   :  { %v366_v52 = vpop.permute.xlu0 %365 }
 0x15b   :  { %400 = vst.msk [vmem:[#allocation4 + $0x70] sm:$0xff] %vm385_vm4, %v366_v52 }
 0x15c   :  { %v1100_v53 = vpop.permute.xlu1 %1099  ;;  %v1152_v55 = vld [vmem:[#allocation4 + $0x50] sm:$0xff] }
 0x15d   :  { %1137 = vst.msk [vmem:[#allocation4 + $0x58] sm:$0xff] %vm1125_vm11, %v1100_v53  ;;  %2628 = vmatprep.mubr.msk.f32.mxu0 %vm1170_vm12, %v1152_v55 }
 0x15e   :  { %v805_v57 = vpop.permute.xlu0 %804 }
 0x15f   :  { %841 = vst.msk [vmem:[#allocation4 + $0x60] sm:$0xff] %vm828_vm8, %v805_v57 }
 0x160   :  { %v447_v59 = vpop.permute.xlu1 %446 }
 0x161   :  { %481 = vst.msk [vmem:[#allocation4 + $0x70] sm:$0xff] %vm466_vm5, %v447_v59 }
 0x162   :  { %v368_v60 = vpop.permute.xlu0 %367 }
 0x163   :  { %401 = vst.msk [vmem:[#allocation4 + $0x78] sm:$0xff] %vm385_vm4, %v368_v60  ;;  %vm1620_vm4 = vcmask 458112  }
 0x164   :  { %v1153_v62 = vld [vmem:[#allocation4 + $0x58] sm:$0xff]  ;;  %v954_v1 = vpop.permute.xlu1 %953 }
 0x165   :  { %2629 = vmatmul.mubr.msk.f32.gmra.mrb[10].mxu0 %vm1170_vm12, %v1153_v62  ;;  %990 = vst.msk [vmem:[#allocation4 + $0x60] sm:$0xff] %vm977_vm9, %v954_v1  ;;  %v2123_v1 = vld [vmem:[%s4213_s3] sm:$0xff] }
 0x166   :  { %v807_v3 = vpop.permute.xlu0 %806 }
 0x167   :  { %842 = vst.msk [vmem:[#allocation4 + $0x68] sm:$0xff] %vm828_vm8, %v807_v3  ;;  %v2124_v3 = vld [vmem:[%s4213_s3 + $0x8] sm:$0xff] }
 0x168   :  { %v596_v4 = vpop.permute.xlu1 %595 }
 0x169   :  { %630 = vst.msk [vmem:[#allocation4 + $0x70] sm:$0xff] %vm615_vm6, %v596_v4  ;;  %v2689_v4 = vpack.c.bf16 %v2124_v3, %v2123_v1 }
 0x16a   :  { %v449_v5 = vpop.permute.xlu0 %448 }
 0x16b   :  { %482 = vst.msk [vmem:[#allocation4 + $0x78] sm:$0xff] %vm466_vm5, %v449_v5  ;;  %2711 = vmatprep.subr.bf16.mxu1 %v2689_v4  ;;  %2690 = vmatprep.subr.bf16.mxu0 %v2689_v4  ;;  %vm1721_vm5 = vcmask 130112  }
 0x16c   :  { %v1035_v6 = vpop.permute.xlu1 %1034  ;;  %2716 = vmatpush3.bf16.msra.mxu1 %v2689_v4  ;;  %2692 = vmatpush3.bf16.msra.mxu0 %v2689_v4 }
 0x16d   :  { %1071 = vst.msk [vmem:[#allocation4 + $0x60] sm:$0xff] %vm1058_vm10, %v1035_v6 }
 0x16e   :  { %v956_v7 = vpop.permute.xlu0 %955 }
 0x16f   :  { %991 = vst.msk [vmem:[#allocation4 + $0x68] sm:$0xff] %vm977_vm9, %v956_v7 }
 0x170   :  { %v677_v10 = vpop.permute.xlu1 %676 }
 0x171   :  { %711 = vst.msk [vmem:[#allocation4 + $0x70] sm:$0xff] %vm696_vm7, %v677_v10  ;;  %v2125_v10 = vld [vmem:[%s4213_s3 + $0x10] sm:$0xff] }
 0x172   :  { %v598_v11 = vpop.permute.xlu0 %597 }
 0x173   :  { %631 = vst.msk [vmem:[#allocation4 + $0x78] sm:$0xff] %vm615_vm6, %v598_v11  ;;  %v2126_v11 = vld [vmem:[%s4213_s3 + $0x18] sm:$0xff]  ;;  %vm1788_vm6 = vcmask 326912  }
 0x174   :  { %v1102_v12 = vpop.permute.xlu1 %1101 }
 0x175   :  { %1138 = vst.msk [vmem:[#allocation4 + $0x60] sm:$0xff] %vm1125_vm11, %v1102_v12  ;;  %v2693_v12 = vpack.c.bf16 %v2126_v11, %v2125_v10 }
 0x176   :  { %v1037_v63 = vpop.permute.xlu0 %1036 }
 0x177   :  { %1072 = vst.msk [vmem:[#allocation4 + $0x68] sm:$0xff] %vm1058_vm10, %v1037_v63  ;;  %2712 = vmatprep.subr.bf16.mxu1 %v2693_v12  ;;  %2694 = vmatprep.subr.bf16.mxu0 %v2693_v12 }
 0x178   :  { %v809_v14 = vpop.permute.xlu1 %808  ;;  %2717 = vmatpush3.bf16.msra.mxu1 %v2693_v12  ;;  %2696 = vmatpush3.bf16.msra.mxu0 %v2693_v12  ;;  %v1881_v12 = vld [vmem:[#allocation3 + $0x92] sm:$0xff] }
 0x179   :  { %843 = vst.msk [vmem:[#allocation4 + $0x70] sm:$0xff] %vm828_vm8, %v809_v14  ;;  %v2127_v14 = vld [vmem:[%s4213_s3 + $0x20] sm:$0xff] }
 0x17a   :  { %v679_v33 = vpop.permute.xlu0 %678 }
 0x17b   :  { %712 = vst.msk [vmem:[#allocation4 + $0x78] sm:$0xff] %vm696_vm7, %v679_v33  ;;  %v2128_v33 = vld [vmem:[%s4213_s3 + $0x28] sm:$0xff]  ;;  %vm1855_vm7 = vcmask 523712  }
 0x17c   :  { %v1154_v15 = vld [vmem:[#allocation4 + $0x60] sm:$0xff]  ;;  %v811_v16 = vpop.permute.xlu1 %810 }
 0x17d   :  { %2631 = vmatprep.mubr.msk.f32.mxu0 %vm1170_vm12, %v1154_v15  ;;  %844 = vst.msk [vmem:[#allocation4 + $0x78] sm:$0xff] %vm828_vm8, %v811_v16  ;;  %v2697_v15 = vpack.c.bf16 %v2128_v33, %v2127_v14  ;;  %v2129_v16 = vld [vmem:[%s4213_s3 + $0x30] sm:$0xff]  ;;  %vm1956_vm8 = vcmask 195712  }
 0x17e   :  { %v1104_v17 = vpop.permute.xlu0 %1103 }
 0x17f   :  { %1139 = vst.msk [vmem:[#allocation4 + $0x68] sm:$0xff] %vm1125_vm11, %v1104_v17  ;;  %2713 = vmatprep.subr.bf16.mxu1 %v2697_v15  ;;  %v2130_v17 = vld [vmem:[%s4213_s3 + $0x38] sm:$0xff]  ;;  %2698 = vmatprep.subr.bf16.mxu0 %v2697_v15 }
 0x180   :  { %v960_v19 = vpop.permute.xlu1 %959  ;;  %2718 = vmatpush3.bf16.msra.mxu1 %v2697_v15  ;;  %2700 = vmatpush3.bf16.msra.mxu0 %v2697_v15 }
 0x181   :  { %993 = vst.msk [vmem:[#allocation4 + $0x78] sm:$0xff] %vm977_vm9, %v960_v19  ;;  %v2701_v19 = vpack.c.bf16 %v2130_v17, %v2129_v16  ;;  %v1882_v16 = vld [vmem:[#allocation3 + $0xa2] sm:$0xff] }
 0x182   :  { %v958_v20 = vpop.permute.xlu0 %957 }
 0x183   :  { %992 = vst.msk [vmem:[#allocation4 + $0x70] sm:$0xff] %vm977_vm9, %v958_v20  ;;  %2714 = vmatprep.subr.bf16.mxu1 %v2701_v19  ;;  %v2131_v20 = vld [vmem:[%s4213_s3 + $0x40] sm:$0xff]  ;;  %2702 = vmatprep.subr.bf16.mxu0 %v2701_v19  ;;  %vm2023_vm9 = vcmask 392512  }
 0x184   :  { %v1041_v0 = vpop.permute.xlu1 %1040  ;;  %2719 = vmatpush3.bf16.msra.mxu1 %v2701_v19  ;;  %2704 = vmatpush3.bf16.msra.mxu0 %v2701_v19 }
 0x185   :  { %1074 = vst.msk [vmem:[#allocation4 + $0x78] sm:$0xff] %vm1058_vm10, %v1041_v0  ;;  %v2132_v0 = vld [vmem:[%s4213_s3 + $0x48] sm:$0xf] }
 0x186   :  { %v1155_v22 = vld [vmem:[#allocation4 + $0x68] sm:$0xff]  ;;  %v1039_v23 = vpop.permute.xlu0 %1038 }
 0x187   :  { %2632 = vmatmul.mubr.msk.f32.gmra.mrb[12].mxu0 %vm1170_vm12, %v1155_v22  ;;  %1073 = vst.msk [vmem:[#allocation4 + $0x70] sm:$0xff] %vm1058_vm10, %v1039_v23  ;;  %v2705_v22 = vpack.c.bf16 %v2132_v0, %v2131_v20  ;;  %vm2090_vm10 = vcmask 589312   ;;  %v2738_v20 = vld [vmem:[#allocation2 + $0x289] ss:$2 sm:$0xff] }
 0x188   :  { %v1108_v32 = vpop.permute.xlu1 %1107 }
 0x189   :  { %1141 = vst.msk [vmem:[#allocation4 + $0x78] sm:$0xff] %vm1125_vm11, %v1108_v32  ;;  %2715 = vmatprep.subr.msk.bf16.mxu1 %vm2706_vm2, %v2705_v22  ;;  %2707 = vmatprep.subr.msk.bf16.mxu0 %vm2706_vm2, %v2705_v22 }
 0x18a   :  { %v1106_v24 = vpop.permute.xlu0 %1105  ;;  %2720 = vmatpush3.bf16.msk.msra.mxu1 %vm2706_vm2, %v2705_v22  ;;  %2710 = vmatpush3.bf16.msk.msra.mxu0 %vm2706_vm2, %v2705_v22 }
 0x18b   :  { %1140 = vst.msk [vmem:[#allocation4 + $0x70] sm:$0xff] %vm1125_vm11, %v1106_v24  ;;  %vm2140_vm11 = vcmask 621568  }
 0x18c   :  { %v720_v26 = vpop.permute.xlu1 %719 }
 0x18d   :  { %765 = vst.msk [vmem:[#allocation5 + $0x18] sm:$0xff] %vm761_vm0, %v720_v26 }
 0x18e   :  { %v718_v21 = vpop.permute.xlu0 %717 }
 0x18f   :  { %764 = vst.msk [vmem:[#allocation5 + $0x10] sm:$0xff] %vm761_vm0, %v718_v21 }
 0x190   :  { %v1157_v9 = vld [vmem:[#allocation4 + $0x78] sm:$0xff]  ;;  %v722_v27 = vpop.permute.xlu1 %721 }
 0x191   :  { %766 = vst.msk [vmem:[#allocation5 + $0x20] sm:$0xff] %vm761_vm0, %v722_v27 }
 0x192   :  { %v1156_v28 = vld [vmem:[#allocation4 + $0x70] sm:$0xff]  ;;  %v724_v37 = vpop.permute.xlu0 %723 }
 0x193   :  { %2634 = vmatprep.mubr.msk.f32.mxu0 %vm1170_vm12, %v1156_v28  ;;  %767 = vst.msk [vmem:[#allocation5 + $0x28] sm:$0xff] %vm761_vm0, %v724_v37 }
 0x194   :  { %2635 = vmatmul.mubr.msk.f32.gmra.mrb[14].mxu0 %vm1170_vm12, %v1157_v9  ;;  %v728_v42 = vpop.permute.xlu1 %727 }
 0x195   :  { %769 = vst.msk [vmem:[#allocation5 + $0x38] sm:$0xff] %vm761_vm0, %v728_v42 }
 0x196   :  { %v726_v58 = vpop.permute.xlu0 %725 }
 0x197   :  { %768 = vst.msk [vmem:[#allocation5 + $0x30] sm:$0xff] %vm761_vm0, %v726_v58 }
 0x198   :  { %v2615_v18 = vpop.f32.mrb[0].mxu0  ;;  %v3654_v25 = vpop.permute.xlu1 %1586 }
 0x199   :  { %v1295_v29 = vadd.f32 %v2615_v18, %v3651_v61  ;;  %v1289_v30 = vpop.f32.mrb[1].mxu0 }
 0x19a   :  { %v1290_v2 = vadd.f32 %v3651_v61, %v1289_v30  ;;  %v730_v35 = vpop.permute.xlu0 %729 }
 0x19b   :  { %v1369_v31 = vmax.f32 %v1295_v29, 0.0  ;;  %770 = vst.msk [vmem:[#allocation5 + $0x40] sm:$0xff] %vm761_vm0, %v730_v35 }
 0x19c   :  { %v1368_v56 = vmax.f32 %v1290_v2, 0.0  ;;  %v732_v34 = vpop.permute.xlu1 %731 }
 0x19d   :  { %1438 = vst.msk [vmem:[#allocation3 + $0x21] sm:$0xff] %vm1384_vm13, %v1369_v31 }
 0x19e   :  { %771 = vst.msk [vmem:[#allocation5 + $0x48] sm:$0xff] %vm761_vm0, %v732_v34  ;;  %v3669_v40 = vpop.permute.xlu0 %1821 }
 0x19f   :  { %1437 = vst.msk [vmem:[#allocation3 + $0x11] sm:$0xff] %vm1384_vm13, %v1368_v56 }
 0x1a0   :  { %v736_v36 = vpop.permute.xlu1 %735 }
 0x1a1   :  { %773 = vst.msk [vmem:[#allocation5 + $0x58] sm:$0xff] %vm761_vm0, %v736_v36  ;;  %v1463_v36 = vld [vmem:[#allocation3 + $0xa0] sm:$0xff] }
 0x1a2   :  { %v734_v41 = vpop.permute.xlu0 %733  ;;  %1481 = vst.msk [vmem:[#allocation5 + $0x40] sm:$0xff] %vm1384_vm13, %v1463_v36 }
 0x1a3   :  { %772 = vst.msk [vmem:[#allocation5 + $0x50] sm:$0xff] %vm761_vm0, %v734_v41 }
 0x1a4   :  { %v3663_v38 = vld [vmem:[#allocation3 + $0x21] sm:$0xff] }
 0x1a5   :  { %v3665_v39 = vld [vmem:[#allocation3 + $0x20] sm:$0xff]  ;;  %1677 = vrot.lane.b32.xlu1 %v3663_v38, %s2774_s17 }
 0x1a6   :  { %1475 = vst.msk [vmem:[#allocation5 + $0x10] sm:$0xff] %vm1384_vm13, %v3665_v39  ;;  %v3673_v48 = vld [vmem:[#allocation3 + $0x22] sm:$0xff] }
 0x1a9   :  { %1912 = vrot.lane.b32.xlu1 %v3673_v48, %s2772_s10 }
 0x1b8   :  { %v2618_v43 = vpop.f32.mrb[2].mxu0 }
 0x1b9   :  { %v1305_v44 = vadd.f32 %v2618_v43, %v3651_v61  ;;  %v1299_v8 = vpop.f32.mrb[3].mxu0 }
 0x1ba   :  { %v1300_v45 = vadd.f32 %v3651_v61, %v1299_v8 }
 0x1bb   :  { %v1371_v46 = vmax.f32 %v1305_v44, 0.0 }
 0x1bc   :  { %v1370_v54 = vmax.f32 %v1300_v45, 0.0 }
 0x1bd   :  { %1440 = vst.msk [vmem:[#allocation3 + $0x41] sm:$0xff] %vm1384_vm13, %v1371_v46 }
 0x1be   :  { %1439 = vst.msk [vmem:[#allocation3 + $0x31] sm:$0xff] %vm1384_vm13, %v1370_v54  ;;  %v3797_v54 = vpop.permute.xlu0 %1689 }
 0x1c4   :  { %v1457_v47 = vld [vmem:[#allocation3 + $0x40] sm:$0xff] }
 0x1c5   :  { %1576 = vrot.lane.b32.xlu0 %v1457_v47, %s2778_s15  ;;  %1511 = vrot.lane.b32.xlu1 %v1457_v47, %s2769_s14  ;;  %1477 = vst.msk [vmem:[#allocation5 + $0x20] sm:$0xff] %vm1384_vm13, %v1457_v47  ;;  %v3685_v49 = vld [vmem:[#allocation3 + $0x30] sm:$0xff]  ;;  %v1641_v50 = vld [vmem:[#allocation3 + $0x41] sm:$0xff] }
 0x1c6   :  { %1476 = vst.msk [vmem:[#allocation5 + $0x18] sm:$0xff] %vm1384_vm13, %v3685_v49  ;;  %v1876_v51 = vld [vmem:[#allocation3 + $0x42] sm:$0xff]  ;;  %v3695_v13 = vld [vmem:[#allocation3 + $0x31] sm:$0xff] }
 0x1c7   :  { %v3701_v53 = vld [vmem:[#allocation3 + $0x32] sm:$0xff] }
 0x1c9   :  { %1746 = vrot.lane.b32.xlu0 %v1641_v50, %s2776_s22  ;;  %1811 = vrot.lane.b32.xlu1 %v1641_v50, %s2779_s18 }
 0x1cd   :  { %1681 = vrot.lane.b32.xlu0 %v1641_v50, %s2774_s17  ;;  %2046 = vrot.lane.b32.xlu1 %v1876_v51, %s2780_s2 }
 0x1d1   :  { %1981 = vrot.lane.b32.xlu0 %v1876_v51, %s2781_s11  ;;  %1916 = vrot.lane.b32.xlu1 %v1876_v51, %s2772_s10 }
 0x1d5   :  { %1679 = vrot.lane.b32.xlu1 %v3695_v13, %s2774_s17  ;;  %1509 = vrot.lane.b32.xlu0 %v3685_v49, %s2769_s14 }
 0x1d8   :  { %v2621_v52 = vpop.f32.mrb[4].mxu0 }
 0x1d9   :  { %v1315_v55 = vadd.f32 %v2621_v52, %v3651_v61  ;;  %1914 = vrot.lane.b32.xlu1 %v3701_v53, %s2772_s10  ;;  %1744 = vrot.lane.b32.xlu0 %v3695_v13, %s2776_s22  ;;  %v1309_v57 = vpop.f32.mrb[5].mxu0 }
 0x1da   :  { %v1310_v59 = vadd.f32 %v3651_v61, %v1309_v57 }
 0x1db   :  { %v1373_v60 = vmax.f32 %v1315_v55, 0.0 }
 0x1dc   :  { %v1372_v62 = vmax.f32 %v1310_v59, 0.0 }
 0x1dd   :  { %1442 = vst.msk [vmem:[#allocation3 + $0x61] sm:$0xff] %vm1384_vm13, %v1373_v60  ;;  %1979 = vrot.lane.b32.xlu0 %v3701_v53, %s2781_s11 }
 0x1de   :  { %1441 = vst.msk [vmem:[#allocation3 + $0x51] sm:$0xff] %vm1384_vm13, %v1372_v62 }
 0x1e4   :  { %v1459_v5 = vld [vmem:[#allocation3 + $0x60] sm:$0xff] }
 0x1e5   :  { %1580 = vrot.lane.b32.xlu1 %v1459_v5, %s2778_s15  ;;  %1515 = vrot.lane.b32.xlu0 %v1459_v5, %s2769_s14  ;;  %1479 = vst.msk [vmem:[#allocation5 + $0x30] sm:$0xff] %vm1384_vm13, %v1459_v5  ;;  %v1458_v6 = vld [vmem:[#allocation3 + $0x50] sm:$0xff]  ;;  %v1643_v7 = vld [vmem:[#allocation3 + $0x61] sm:$0xff] }
 0x1e6   :  { %1478 = vst.msk [vmem:[#allocation5 + $0x28] sm:$0xff] %vm1384_vm13, %v1458_v6  ;;  %v1878_v63 = vld [vmem:[#allocation3 + $0x62] sm:$0xff]  ;;  %v1642_v32 = vld [vmem:[#allocation3 + $0x51] sm:$0xff] }
 0x1e7   :  { %v1877_v27 = vld [vmem:[#allocation3 + $0x52] sm:$0xff] }
 0x1e9   :  { %1750 = vrot.lane.b32.xlu1 %v1643_v7, %s2776_s22  ;;  %1815 = vrot.lane.b32.xlu0 %v1643_v7, %s2779_s18 }
 0x1ed   :  { %2050 = vrot.lane.b32.xlu1 %v1878_v63, %s2780_s2  ;;  %1685 = vrot.lane.b32.xlu0 %v1643_v7, %s2774_s17 }
 0x1f1   :  { %1920 = vrot.lane.b32.xlu1 %v1878_v63, %s2772_s10  ;;  %1985 = vrot.lane.b32.xlu0 %v1878_v63, %s2781_s11 }
 0x1f5   :  { %1513 = vrot.lane.b32.xlu1 %v1458_v6, %s2769_s14  ;;  %1578 = vrot.lane.b32.xlu0 %v1458_v6, %s2778_s15 }
 0x1f8   :  { %v2624_v23 = vpop.f32.mrb[6].mxu0 }
 0x1f9   :  { %v1325_v24 = vadd.f32 %v2624_v23, %v3651_v61  ;;  %1748 = vrot.lane.b32.xlu1 %v1642_v32, %s2776_s22  ;;  %1813 = vrot.lane.b32.xlu0 %v1642_v32, %s2779_s18  ;;  %v1319_v26 = vpop.f32.mrb[7].mxu0 }
 0x1fa   :  { %v1320_v21 = vadd.f32 %v3651_v61, %v1319_v26 }
 0x1fb   :  { %v1375_v9 = vmax.f32 %v1325_v24, 0.0 }
 0x1fc   :  { %v1374_v28 = vmax.f32 %v1320_v21, 0.0 }
 0x1fd   :  { %1444 = vst.msk [vmem:[#allocation3 + $0x81] sm:$0xff] %vm1384_vm13, %v1375_v9  ;;  %2048 = vrot.lane.b32.xlu1 %v1877_v27, %s2780_s2  ;;  %1683 = vrot.lane.b32.xlu0 %v1642_v32, %s2774_s17 }
 0x1fe   :  { %1443 = vst.msk [vmem:[#allocation3 + $0x71] sm:$0xff] %vm1384_vm13, %v1374_v28 }
 0x201   :  { %1918 = vrot.lane.b32.xlu1 %v1877_v27, %s2772_s10  ;;  %1983 = vrot.lane.b32.xlu0 %v1877_v27, %s2781_s11 }
 0x204   :  { %v1461_v37 = vld [vmem:[#allocation3 + $0x80] sm:$0xff] }
 0x205   :  { %1584 = vrot.lane.b32.xlu1 %v1461_v37, %s2778_s15  ;;  %1519 = vrot.lane.b32.xlu0 %v1461_v37, %s2769_s14  ;;  %v1460_v42 = vld [vmem:[#allocation3 + $0x70] sm:$0xff]  ;;  %v1645_v58 = vld [vmem:[#allocation3 + $0x81] sm:$0xff] }
 0x206   :  { %1480 = vst.msk [vmem:[#allocation5 + $0x38] sm:$0xff] %vm1384_vm13, %v1460_v42  ;;  %v1880_v18 = vld [vmem:[#allocation3 + $0x82] sm:$0xff]  ;;  %v1644_v29 = vld [vmem:[#allocation3 + $0x71] sm:$0xff] }
 0x207   :  { %v1879_v2 = vld [vmem:[#allocation3 + $0x72] sm:$0xff] }
 0x209   :  { %1754 = vrot.lane.b32.xlu1 %v1645_v58, %s2776_s22  ;;  %1819 = vrot.lane.b32.xlu0 %v1645_v58, %s2779_s18 }
 0x20d   :  { %2054 = vrot.lane.b32.xlu1 %v1880_v18, %s2780_s2  ;;  %1989 = vrot.lane.b32.xlu0 %v1880_v18, %s2781_s11 }
 0x211   :  { %1582 = vrot.lane.b32.xlu1 %v1460_v42, %s2778_s15  ;;  %1517 = vrot.lane.b32.xlu0 %v1460_v42, %s2769_s14 }
 0x215   :  { %1752 = vrot.lane.b32.xlu1 %v1644_v29, %s2776_s22  ;;  %1817 = vrot.lane.b32.xlu0 %v1644_v29, %s2779_s18 }
 0x217   :  { %v1678_v46 = vpop.permute.xlu1 %1677 }
 0x218   :  { %v2627_v30 = vpop.f32.mrb[8].mxu0 }
 0x219   :  { %v1335_v31 = vadd.f32 %v2627_v30, %v3651_v61  ;;  %2052 = vrot.lane.b32.xlu1 %v1879_v2, %s2780_s2  ;;  %1687 = vrot.lane.b32.xlu0 %v1644_v29, %s2774_s17  ;;  %v1329_v56 = vpop.f32.mrb[9].mxu0 }
 0x21a   :  { %v1330_v34 = vadd.f32 %v3651_v61, %v1329_v56 }
 0x21b   :  { %v1377_v35 = vmax.f32 %v1335_v31, 0.0  ;;  %v1913_v47 = vpop.permute.xlu1 %1912 }
 0x21c   :  { %v1376_v41 = vmax.f32 %v1330_v34, 0.0 }
 0x21d   :  { %1446 = vst.msk [vmem:[#allocation3 + $0xc1] sm:$0xff] %vm1384_vm13, %v1377_v35  ;;  %1922 = vrot.lane.b32.xlu1 %v1879_v2, %s2772_s10  ;;  %1987 = vrot.lane.b32.xlu0 %v1879_v2, %s2781_s11 }
 0x21e   :  { %1445 = vst.msk [vmem:[#allocation3 + $0xb1] sm:$0xff] %vm1384_vm13, %v1376_v41 }
 0x224   :  { %v1465_v43 = vld [vmem:[#allocation3 + $0xc0] sm:$0xff] }
 0x225   :  { %1588 = vrot.lane.b32.xlu1 %v1465_v43, %s2778_s15  ;;  %1523 = vrot.lane.b32.xlu0 %v1465_v43, %s2769_s14  ;;  %v1464_v44 = vld [vmem:[#allocation3 + $0xb0] sm:$0xff]  ;;  %1483 = vst.msk [vmem:[#allocation5 + $0x50] sm:$0xff] %vm1384_vm13, %v1465_v43  ;;  %v3789_v8 = vld [vmem:[#allocation3 + $0xc1] sm:$0xff] }
 0x226   :  { %1482 = vst.msk [vmem:[#allocation5 + $0x48] sm:$0xff] %vm1384_vm13, %v1464_v44  ;;  %v1648_v45 = vld [vmem:[#allocation3 + $0xb1] sm:$0xff]  ;;  %v3857_v2 = vld [vmem:[#allocation3 + $0xc2] sm:$0xff] }
 0x227   :  { %v1883_v42 = vld [vmem:[#allocation3 + $0xb2] sm:$0xff] }
 0x229   :  { %1758 = vrot.lane.b32.xlu1 %v3789_v8, %s2776_s22  ;;  %1521 = vrot.lane.b32.xlu0 %v1464_v44, %s2769_s14 }
 0x22d   :  { %1756 = vrot.lane.b32.xlu1 %v1648_v45, %s2776_s22  ;;  %1691 = vrot.lane.b32.xlu0 %v1648_v45, %s2774_s17 }
 0x237   :  { %v1577_v50 = vpop.permute.xlu0 %1576  ;;  %v1512_v51 = vpop.permute.xlu1 %1511 }
 0x238   :  { %1557 = vst.msk [vmem:[#allocation5 + $0x18] sm:$0xff] %vm1553_vm3, %v1512_v51  ;;  %v2630_v52 = vpop.f32.mrb[10].mxu0 }
 0x239   :  { %v1345_v55 = vadd.f32 %v2630_v52, %v3651_v61  ;;  %v1339_v57 = vpop.f32.mrb[11].mxu0 }
 0x23a   :  { %v1340_v59 = vadd.f32 %v3651_v61, %v1339_v57 }
 0x23b   :  { %v1379_v60 = vmax.f32 %v1345_v55, 0.0  ;;  %v3802_v62 = vpop.permute.xlu0 %1746  ;;  %v1812_v1 = vpop.permute.xlu1 %1811 }
 0x23c   :  { %v1378_v3 = vmax.f32 %v1340_v59, 0.0 }
 0x23d   :  { %1448 = vst.msk [vmem:[#allocation3 + $0xe1] sm:$0xff] %vm1384_vm13, %v1379_v60 }
 0x23e   :  { %1447 = vst.msk [vmem:[#allocation3 + $0xd1] sm:$0xff] %vm1384_vm13, %v1378_v3  ;;  %v2740_v3 = vld [vmem:[#allocation2 + $0x19] ss:$2 sm:$0xff] }
 0x23f   :  { %v3806_v4 = vpop.permute.xlu0 %1681  ;;  %v2047_v5 = vpop.permute.xlu1 %2046 }
 0x243   :  { %v3808_v6 = vpop.permute.xlu0 %1981  ;;  %v3813_v10 = vpop.permute.xlu1 %1916 }
 0x244   :  { %v3823_v33 = vld [vmem:[#allocation3 + $0xe0] sm:$0xff] }
 0x245   :  { %v1466_v7 = vld [vmem:[#allocation3 + $0xd0] sm:$0xff] }
 0x246   :  { %1590 = vrot.lane.b32.xlu1 %v1466_v7, %s2778_s15  ;;  %1484 = vst.msk [vmem:[#allocation5 + $0x58] sm:$0xff] %vm1384_vm13, %v1466_v7  ;;  %1525 = vrot.lane.b32.xlu0 %v1466_v7, %s2769_s14  ;;  %v3832_v17 = vld [vmem:[#allocation3 + $0xd1] sm:$0xff] }
 0x247   :  { %v1510_v11 = vpop.permute.xlu0 %1509  ;;  %v1680_v14 = vpop.permute.xlu1 %1679 }
 0x248   :  { %1556 = vst.msk [vmem:[#allocation5 + $0x10] sm:$0xff] %vm1553_vm3, %v1510_v11 }
 0x249   :  { %1623 = vst.msk [vmem:[#allocation5 + $0x10] sm:$0xff] %vm1620_vm4, %v1577_v50 }
 0x24a   :  { %2056 = vrot.lane.b32.xlu1 %v1881_v12, %s2780_s2  ;;  %1823 = vrot.lane.b32.xlu0 %v3789_v8, %s2779_s18  ;;  %1724 = vst.msk [vmem:[#allocation5 + $0x10] sm:$0xff] %vm1721_vm5, %v1678_v46 }
 0x24b   :  { %v1745_v63 = vpop.permute.xlu0 %1744  ;;  %v1915_v19 = vpop.permute.xlu1 %1914 }
 0x24c   :  { %1791 = vst.msk [vmem:[#allocation5 + $0x10] sm:$0xff] %vm1788_vm6, %v1745_v63 }
 0x24d   :  { %1858 = vst.msk [vmem:[#allocation5 + $0x10] sm:$0xff] %vm1855_vm7, %v1812_v1 }
 0x24e   :  { %1592 = vrot.lane.b32.xlu1 %v3823_v33, %s2778_s15  ;;  %1527 = vrot.lane.b32.xlu0 %v3823_v33, %s2769_s14  ;;  %1959 = vst.msk [vmem:[#allocation5 + $0x10] sm:$0xff] %vm1956_vm8, %v1913_v47  ;;  %v2739_v47 = vld [vmem:[#allocation2 + $0x2b9] ss:$2 sm:$0xff] }
 0x24f   :  { %v1980_v15 = vpop.permute.xlu0 %1979 }
 0x250   :  { %2026 = vst.msk [vmem:[#allocation5 + $0x10] sm:$0xff] %vm2023_vm9, %v1980_v15 }
 0x251   :  { %2093 = vst.msk [vmem:[#allocation5 + $0x10] sm:$0xff] %vm2090_vm10, %v2047_v5 }
 0x252   :  { %1825 = vrot.lane.b32.xlu0 %v3832_v17, %s2779_s18  ;;  %1924 = vrot.lane.b32.xlu1 %v1882_v16, %s2772_s10 }
 0x256   :  { %737 = vrot.lane.b32.xlu0 %v2738_v20, %s2777_s0 }
 0x257   :  { %v1581_v0 = vpop.permute.xlu1 %1580  ;;  %v1516_v22 = vpop.permute.xlu0 %1515 }
 0x258   :  { %1559 = vst.msk [vmem:[#allocation5 + $0x28] sm:$0xff] %vm1553_vm3, %v1516_v22  ;;  %v2109_v23 = vld [vmem:[#allocation5 + $0x10] sm:$0xff] }
 0x259   :  { %2660 = vmatprep.mubr.msk.f32.mxu1 %vm2140_vm11, %v2109_v23 }
 0x25a   :  { %v2633_v32 = vpop.f32.mrb[12].mxu0  ;;  %1693 = vrot.lane.b32.xlu0 %v3789_v8, %s2774_s17 }
 0x25b   :  { %v1355_v24 = vadd.f32 %v2633_v32, %v3651_v61  ;;  %v1349_v26 = vpop.f32.mrb[13].mxu0  ;;  %v3844_v9 = vpop.permute.xlu1 %1750  ;;  %v3958_v32 = vld [vmem:[#allocation3 + $0x10] sm:$0xff] }
 0x25c   :  { %v1350_v21 = vadd.f32 %v3651_v61, %v1349_v26  ;;  %v1816_v27 = vpop.permute.xlu0 %1815  ;;  %v2743_v26 = vld [vmem:[#allocation2 + $0x319] ss:$2 sm:$0xff] }
 0x25d   :  { %v1381_v28 = vmax.f32 %v1355_v24, 0.0 }
 0x25e   :  { %v1380_v37 = vmax.f32 %v1350_v21, 0.0  ;;  %1991 = vrot.lane.b32.xlu0 %v1883_v42, %s2781_s11 }
 0x25f   :  { %1450 = vst.msk [vmem:[#allocation3 + $0x101] sm:$0xff] %vm1384_vm13, %v1381_v28  ;;  %v2051_v58 = vpop.permute.xlu1 %2050 }
 0x260   :  { %1449 = vst.msk [vmem:[#allocation3 + $0xf1] sm:$0xff] %vm1384_vm13, %v1380_v37  ;;  %v3849_v18 = vpop.permute.xlu0 %1685 }
 0x262   :  { %1695 = vrot.lane.b32.xlu0 %v3832_v17, %s2774_s17 }
 0x263   :  { %v3853_v29 = vpop.permute.xlu1 %1920 }
 0x264   :  { %v3855_v30 = vpop.permute.xlu0 %1985 }
 0x266   :  { %1993 = vrot.lane.b32.xlu0 %v3857_v2, %s2781_s11  ;;  %v3894_v52 = vld [vmem:[#allocation3 + $0x100] sm:$0xff] }
 0x267   :  { %v3859_v31 = vld [vmem:[#allocation3 + $0xf0] sm:$0xff]  ;;  %v2636_v56 = vpop.f32.mrb[14].mxu0  ;;  %v1514_v34 = vpop.permute.xlu1 %1513  ;;  %v1653_v24 = vld [vmem:[#allocation3 + $0x101] sm:$0xff] }
 0x268   :  { %1594 = vrot.lane.b32.xlu1 %v3859_v31, %s2778_s15  ;;  %v1579_v35 = vpop.permute.xlu0 %1578  ;;  %v1365_v36 = vadd.f32 %v2636_v56, %v3651_v61  ;;  %1558 = vst.msk [vmem:[#allocation5 + $0x20] sm:$0xff] %vm1553_vm3, %v1514_v34  ;;  %v1359_v41 = vpop.f32.mrb[15].mxu0  ;;  %v3902_v59 = vld [vmem:[#allocation3 + $0xf1] sm:$0xff]  ;;  %v1637_v34 = vld [vmem:[#allocation3 + $0x1] sm:$0xff] }
 0x269   :  { %1624 = vst.msk [vmem:[#allocation5 + $0x18] sm:$0xff] %vm1620_vm4, %v1579_v35  ;;  %1625 = vst.msk [vmem:[#allocation5 + $0x20] sm:$0xff] %vm1620_vm4, %v1581_v0  ;;  %v1360_v44 = vadd.f32 %v3651_v61, %v1359_v41  ;;  %v3883_v61 = vld [vmem:[#allocation3 + $0xe1] sm:$0xff]  ;;  %v1887_v28 = vld [vmem:[#allocation3 + $0xf2] sm:$0xff] }
 0x26a   :  { %1725 = vst.msk [vmem:[#allocation5 + $0x18] sm:$0xff] %vm1721_vm5, %v1680_v14  ;;  %v1383_v43 = vmax.f32 %v1365_v36, 0.0  ;;  %1726 = vst.msk [vmem:[#allocation5 + $0x20] sm:$0xff] %vm1721_vm5, %v3806_v4  ;;  %1529 = vrot.lane.b32.xlu0 %v3859_v31, %s2769_s14  ;;  %v2741_v14 = vld [vmem:[#allocation2 + $0x49] ss:$2 sm:$0xff] }
 0x26b   :  { %1792 = vst.msk [vmem:[#allocation5 + $0x18] sm:$0xff] %vm1788_vm6, %v3802_v62  ;;  %v1749_v8 = vpop.permute.xlu1 %1748  ;;  %v1382_v46 = vmax.f32 %v1360_v44, 0.0  ;;  %v1886_v0 = vld [vmem:[#allocation3 + $0xe2] sm:$0xff]  ;;  %v1638_v44 = vld [vmem:[#allocation3 + $0x11] sm:$0xff] }
 0x26c   :  { %1926 = vrot.lane.b32.xlu1 %v1883_v42, %s2772_s10  ;;  %v1814_v45 = vpop.permute.xlu0 %1813  ;;  %1452 = vst.msk [vmem:[#allocation3 + $0x121] sm:$0xff] %vm1384_vm13, %v1383_v43 }
 0x26d   :  { %1793 = vst.msk [vmem:[#allocation5 + $0x20] sm:$0xff] %vm1788_vm6, %v1749_v8 }
 0x26e   :  { %1859 = vst.msk [vmem:[#allocation5 + $0x18] sm:$0xff] %vm1855_vm7, %v1814_v45  ;;  %1860 = vst.msk [vmem:[#allocation5 + $0x20] sm:$0xff] %vm1855_vm7, %v1816_v27  ;;  %1827 = vrot.lane.b32.xlu0 %v3883_v61, %s2779_s18 }
 0x26f   :  { %1960 = vst.msk [vmem:[#allocation5 + $0x18] sm:$0xff] %vm1956_vm8, %v1915_v19  ;;  %1961 = vst.msk [vmem:[#allocation5 + $0x20] sm:$0xff] %vm1956_vm8, %v3813_v10  ;;  %v2049_v50 = vpop.permute.xlu1 %2048  ;;  %v1885_v10 = vld [vmem:[#allocation3 + $0xd2] sm:$0xff] }
 0x270   :  { %1451 = vst.msk [vmem:[#allocation3 + $0x111] sm:$0xff] %vm1384_vm13, %v1382_v46  ;;  %739 = vrot.lane.b32.xlu1 %v2739_v47, %s2777_s0  ;;  %v1684_v51 = vpop.permute.xlu0 %1683  ;;  %v1872_v47 = vld [vmem:[#allocation3 + $0x2] sm:$0xff] }
 0x271   :  { %2027 = vst.msk [vmem:[#allocation5 + $0x18] sm:$0xff] %vm2023_vm9, %v3808_v6 }
 0x272   :  { %2094 = vst.msk [vmem:[#allocation5 + $0x18] sm:$0xff] %vm2090_vm10, %v2049_v50  ;;  %1531 = vrot.lane.b32.xlu0 %v3894_v52, %s2769_s14 }
 0x273   :  { %v1919_v55 = vpop.permute.xlu1 %1918  ;;  %v1655_v43 = vld [vmem:[#allocation3 + $0x121] sm:$0xff] }
 0x274   :  { %1760 = vrot.lane.b32.xlu1 %v3832_v17, %s2776_s22  ;;  %v1984_v57 = vpop.permute.xlu0 %1983  ;;  %v2742_v17 = vld [vmem:[#allocation2 + $0x2e9] ss:$2 sm:$0xff] }
 0x275   :  { %2028 = vst.msk [vmem:[#allocation5 + $0x20] sm:$0xff] %vm2023_vm9, %v1984_v57 }
 0x276   :  { %2095 = vst.msk [vmem:[#allocation5 + $0x20] sm:$0xff] %vm2090_vm10, %v2051_v58  ;;  %1829 = vrot.lane.b32.xlu0 %v3902_v59, %s2779_s18  ;;  %v1471_v58 = vld [vmem:[#allocation3 + $0x120] sm:$0xff] }
 0x277   :  { %v1585_v60 = vpop.permute.xlu1 %1584  ;;  %v3915_v6 = vld [vmem:[#allocation3 + $0x110] sm:$0xff] }
 0x278   :  { %2058 = vrot.lane.b32.xlu1 %v3857_v2, %s2780_s2  ;;  %v1520_v62 = vpop.permute.xlu0 %1519 }
 0x279   :  { %v2110_v1 = vld [vmem:[#allocation5 + $0x18] sm:$0xff]  ;;  %1561 = vst.msk [vmem:[#allocation5 + $0x38] sm:$0xff] %vm1553_vm3, %v1520_v62 }
 0x27a   :  { %2661 = vmatmul.mubr.msk.f32.vlgmr.msra.gmra.mrb[0].mxu1 %vm2140_vm11, %v2110_v1  ;;  %1628 = vst.msk [vmem:[#allocation5 + $0x38] sm:$0xff] %vm1620_vm4, %v3654_v25  ;;  %713 = vrot.lane.b32.xlu0 %v2740_v3, %s2777_s0 }
 0x27b   :  { %v1755_v4 = vpop.permute.xlu1 %1754 }
 0x27c   :  { %1762 = vrot.lane.b32.xlu1 %v3883_v61, %s2776_s22  ;;  %v1820_v5 = vpop.permute.xlu0 %1819 }
 0x27d   :  { %v2111_v7 = vld [vmem:[#allocation5 + $0x20] sm:$0xff] }
 0x27e   :  { %2663 = vmatprep.mubr.msk.f32.mxu1 %vm2140_vm11, %v2111_v7  ;;  %1598 = vrot.lane.b32.xlu0 %v3915_v6, %s2778_s15 }
 0x27f   :  { %v2055_v25 = vpop.permute.xlu1 %2054 }
 0x280   :  { %2060 = vrot.lane.b32.xlu1 %v1885_v10, %s2780_s2  ;;  %v1990_v11 = vpop.permute.xlu0 %1989 }
 0x282   :  { %1930 = vrot.lane.b32.xlu0 %v1885_v10, %s2772_s10 }
 0x283   :  { %v1583_v12 = vpop.permute.xlu1 %1582 }
 0x284   :  { %1596 = vrot.lane.b32.xlu1 %v3894_v52, %s2778_s15  ;;  %v1518_v63 = vpop.permute.xlu0 %1517  ;;  %1626 = vst.msk [vmem:[#allocation5 + $0x28] sm:$0xff] %vm1620_vm4, %v1583_v12  ;;  %v1891_v12 = vld [vmem:[#allocation3 + $0x132] sm:$0xff] }
 0x285   :  { %1560 = vst.msk [vmem:[#allocation5 + $0x30] sm:$0xff] %vm1553_vm3, %v1518_v63 }
 0x286   :  { %1727 = vst.msk [vmem:[#allocation5 + $0x28] sm:$0xff] %vm1721_vm5, %v1684_v51  ;;  %715 = vrot.lane.b32.xlu0 %v2741_v14, %s2777_s0 }
 0x287   :  { %1627 = vst.msk [vmem:[#allocation5 + $0x30] sm:$0xff] %vm1620_vm4, %v1585_v60  ;;  %v1753_v15 = vpop.permute.xlu1 %1752 }
 0x288   :  { %1794 = vst.msk [vmem:[#allocation5 + $0x28] sm:$0xff] %vm1788_vm6, %v3844_v9  ;;  %1928 = vrot.lane.b32.xlu1 %v3857_v2, %s2772_s10  ;;  %v1818_v16 = vpop.permute.xlu0 %1817 }
 0x289   :  { %1728 = vst.msk [vmem:[#allocation5 + $0x30] sm:$0xff] %vm1721_vm5, %v3849_v18 }
 0x28a   :  { %1795 = vst.msk [vmem:[#allocation5 + $0x30] sm:$0xff] %vm1788_vm6, %v1753_v15  ;;  %1699 = vrot.lane.b32.xlu0 %v3902_v59, %s2774_s17 }
 0x28b   :  { %1861 = vst.msk [vmem:[#allocation5 + $0x28] sm:$0xff] %vm1855_vm7, %v1818_v16  ;;  %1862 = vst.msk [vmem:[#allocation5 + $0x30] sm:$0xff] %vm1855_vm7, %v1820_v5  ;;  %v2053_v19 = vpop.permute.xlu1 %2052 }
 0x28c   :  { %1962 = vst.msk [vmem:[#allocation5 + $0x28] sm:$0xff] %vm1956_vm8, %v1919_v55  ;;  %1963 = vst.msk [vmem:[#allocation5 + $0x30] sm:$0xff] %vm1956_vm8, %v3853_v29  ;;  %741 = vrot.lane.b32.xlu1 %v2742_v17, %s2777_s0  ;;  %v1688_v20 = vpop.permute.xlu0 %1687  ;;  %v1472_v29 = vld [vmem:[#allocation3 + $0x130] sm:$0xff] }
 0x28d   :  { %2029 = vst.msk [vmem:[#allocation5 + $0x28] sm:$0xff] %vm2023_vm9, %v3855_v30  ;;  %v1873_v55 = vld [vmem:[#allocation3 + $0x12] sm:$0xff] }
 0x28e   :  { %2096 = vst.msk [vmem:[#allocation5 + $0x28] sm:$0xff] %vm2090_vm10, %v2053_v19  ;;  %1997 = vrot.lane.b32.xlu0 %v1886_v0, %s2781_s11 }
 0x28f   :  { %1729 = vst.msk [vmem:[#allocation5 + $0x38] sm:$0xff] %vm1721_vm5, %v1688_v20  ;;  %v1923_v22 = vpop.permute.xlu1 %1922 }
 0x290   :  { %1796 = vst.msk [vmem:[#allocation5 + $0x38] sm:$0xff] %vm1788_vm6, %v1755_v4  ;;  %1697 = vrot.lane.b32.xlu1 %v3883_v61, %s2774_s17  ;;  %v1988_v23 = vpop.permute.xlu0 %1987 }
 0x291   :  { %1863 = vst.msk [vmem:[#allocation5 + $0x38] sm:$0xff] %vm1855_vm7, %v3669_v40 }
 0x292   :  { %1964 = vst.msk [vmem:[#allocation5 + $0x38] sm:$0xff] %vm1956_vm8, %v1923_v22  ;;  %1505 = vrot.lane.b32.xlu0 %v3958_v32, %s2769_s14 }
 0x293   :  { %2030 = vst.msk [vmem:[#allocation5 + $0x30] sm:$0xff] %vm2023_vm9, %v1988_v23  ;;  %2031 = vst.msk [vmem:[#allocation5 + $0x38] sm:$0xff] %vm2023_vm9, %v1990_v11 }
 0x294   :  { %2097 = vst.msk [vmem:[#allocation5 + $0x30] sm:$0xff] %vm2090_vm10, %v2055_v25  ;;  %1995 = vrot.lane.b32.xlu1 %v1885_v10, %s2781_s11 }
 0x295   :  { %v2112_v40 = vld [vmem:[#allocation5 + $0x28] sm:$0xff] }
 0x296   :  { %2664 = vmatmul.mubr.msk.f32.gmra.mrb[2].mxu1 %vm2140_vm11, %v2112_v40  ;;  %1766 = vrot.lane.b32.xlu0 %v1653_v24, %s2776_s22 }
 0x297   :  { %v1589_v21 = vpop.permute.xlu1 %1588  ;;  %v1524_v9 = vpop.permute.xlu0 %1523 }
 0x298   :  { %743 = vrot.lane.b32.xlu1 %v2743_v26, %s2777_s0  ;;  %1563 = vst.msk [vmem:[#allocation5 + $0x48] sm:$0xff] %vm1553_vm3, %v1524_v9 }
 0x29a   :  { %2064 = vrot.lane.b32.xlu0 %v1887_v28, %s2780_s2 }
 0x29b   :  { %v2113_v27 = vld [vmem:[#allocation5 + $0x30] sm:$0xff]  ;;  %v1759_v37 = vpop.permute.xlu1 %1758  ;;  %v1522_v42 = vpop.permute.xlu0 %1521 }
 0x29c   :  { %2666 = vmatprep.mubr.msk.f32.mxu1 %vm2140_vm11, %v2113_v27  ;;  %1764 = vrot.lane.b32.xlu1 %v3902_v59, %s2776_s22  ;;  %1562 = vst.msk [vmem:[#allocation5 + $0x40] sm:$0xff] %vm1553_vm3, %v1522_v42  ;;  %v1656_v59 = vld [vmem:[#allocation3 + $0x131] sm:$0xff] }
 0x29d   :  { %1629 = vst.msk [vmem:[#allocation5 + $0x40] sm:$0xff] %vm1620_vm4, %v1589_v21 }
 0x29e   :  { %1730 = vst.msk [vmem:[#allocation5 + $0x40] sm:$0xff] %vm1721_vm5, %v3797_v54  ;;  %1535 = vrot.lane.b32.xlu0 %v1471_v58, %s2769_s14  ;;  %v1654_v54 = vld [vmem:[#allocation3 + $0x111] sm:$0xff] }
 0x29f   :  { %v1757_v18 = vpop.permute.xlu1 %1756  ;;  %v1692_v30 = vpop.permute.xlu0 %1691 }
 0x2a0   :  { %2062 = vrot.lane.b32.xlu1 %v1886_v0, %s2780_s2  ;;  %1797 = vst.msk [vmem:[#allocation5 + $0x40] sm:$0xff] %vm1788_vm6, %v1757_v18 }
 0x2a2   :  { %1600 = vrot.lane.b32.xlu0 %v1471_v58, %s2778_s15 }
 0x2a4   :  { %1533 = vrot.lane.b32.xlu1 %v3915_v6, %s2769_s14 }
 0x2a6   :  { %1932 = vrot.lane.b32.xlu0 %v1886_v0, %s2772_s10 }
 0x2a8   :  { %1831 = vrot.lane.b32.xlu1 %v1653_v24, %s2779_s18 }
 0x2aa   :  { %1602 = vrot.lane.b32.xlu0 %v1472_v29, %s2778_s15 }
 0x2ac   :  { %1507 = vrot.lane.b32.xlu1 %v3665_v39, %s2769_s14 }
 0x2ae   :  { %1701 = vrot.lane.b32.xlu0 %v1653_v24, %s2774_s17 }
 0x2b0   :  { %1572 = vrot.lane.b32.xlu1 %v3665_v39, %s2778_s15 }
 0x2b2   :  { %1999 = vrot.lane.b32.xlu0 %v1887_v28, %s2781_s11 }
 0x2b4   :  { %1833 = vrot.lane.b32.xlu1 %v1654_v54, %s2779_s18 }
 0x2b6   :  { %1703 = vrot.lane.b32.xlu0 %v1654_v54, %s2774_s17 }
 0x2b8   :  { %1574 = vrot.lane.b32.xlu1 %v3685_v49, %s2778_s15  ;;  %v1591_v2 = vpop.permute.xlu1 %1590  ;;  %v1526_v56 = vpop.permute.xlu0 %1525  ;;  %v1888_v49 = vld [vmem:[#allocation3 + $0x102] sm:$0xff] }
 0x2b9   :  { %1630 = vst.msk [vmem:[#allocation5 + $0x48] sm:$0xff] %vm1620_vm4, %v1591_v2 }
 0x2ba   :  { %1564 = vst.msk [vmem:[#allocation5 + $0x50] sm:$0xff] %vm1553_vm3, %v1526_v56  ;;  %1768 = vrot.lane.b32.xlu0 %v1654_v54, %s2776_s22 }
 0x2bb   :  { %1731 = vst.msk [vmem:[#allocation5 + $0x48] sm:$0xff] %vm1721_vm5, %v1692_v30 }
 0x2bc   :  { %1798 = vst.msk [vmem:[#allocation5 + $0x48] sm:$0xff] %vm1788_vm6, %v1759_v37  ;;  %1673 = vrot.lane.b32.xlu1 %v1637_v34, %s2774_s17  ;;  %v2057_v39 = vpop.permute.xlu1 %2056  ;;  %v1824_v35 = vpop.permute.xlu0 %1823 }
 0x2bd   :  { %2098 = vst.msk [vmem:[#allocation5 + $0x38] sm:$0xff] %vm2090_vm10, %v2057_v39 }
 0x2be   :  { %1864 = vst.msk [vmem:[#allocation5 + $0x40] sm:$0xff] %vm1855_vm7, %v1824_v35  ;;  %2066 = vrot.lane.b32.xlu0 %v1888_v49, %s2780_s2 }
 0x2c0   :  { %1934 = vrot.lane.b32.xlu1 %v1887_v28, %s2772_s10  ;;  %v1593_v36 = vpop.permute.xlu1 %1592  ;;  %v1528_v41 = vpop.permute.xlu0 %1527 }
 0x2c1   :  { %1631 = vst.msk [vmem:[#allocation5 + $0x50] sm:$0xff] %vm1620_vm4, %v1593_v36 }
 0x2c2   :  { %1565 = vst.msk [vmem:[#allocation5 + $0x58] sm:$0xff] %vm1553_vm3, %v1528_v41  ;;  %1770 = vrot.lane.b32.xlu0 %v1655_v43, %s2776_s22 }
 0x2c4   :  { %1675 = vrot.lane.b32.xlu1 %v1638_v44, %s2774_s17  ;;  %v1826_v8 = vpop.permute.xlu0 %1825  ;;  %v2114_v45 = vld [vmem:[#allocation5 + $0x38] sm:$0xff]  ;;  %v1925_v46 = vpop.permute.xlu1 %1924 }
 0x2c5   :  { %1865 = vst.msk [vmem:[#allocation5 + $0x48] sm:$0xff] %vm1855_vm7, %v1826_v8  ;;  %2667 = vmatmul.mubr.msk.f32.gmra.mrb[4].mxu1 %vm2140_vm11, %v2114_v45 }
 0x2c6   :  { %1965 = vst.msk [vmem:[#allocation5 + $0x40] sm:$0xff] %vm1956_vm8, %v1925_v46  ;;  %1835 = vrot.lane.b32.xlu0 %v1655_v43, %s2779_s18 }
 0x2c8   :  { %1740 = vrot.lane.b32.xlu1 %v1638_v44, %s2776_s22  ;;  %v738_v61 = vpop.permute.xlu0 %737 }
 0x2c9   :  { %774 = vst.msk [vmem:[#allocation5 + $0x60] sm:$0xff] %vm761_vm0, %v738_v61 }
 0x2ca   :  { %1485 = vst.msk [vmem:[#allocation5 + $0x60] sm:$0xff] %vm1384_vm13, %v3823_v33  ;;  %1809 = vrot.lane.b32.xlu0 %v3695_v13, %s2779_s18  ;;  %v1889_v33 = vld [vmem:[#allocation3 + $0x112] sm:$0xff] }
 0x2cc   :  { %2001 = vrot.lane.b32.xlu1 %v1888_v49, %s2781_s11  ;;  %v1694_v50 = vpop.permute.xlu0 %1693 }
 0x2cd   :  { %1732 = vst.msk [vmem:[#allocation5 + $0x50] sm:$0xff] %vm1721_vm5, %v1694_v50 }
 0x2ce   :  { %1908 = vrot.lane.b32.xlu0 %v1872_v47, %s2772_s10 }
 0x2d0   :  { %1742 = vrot.lane.b32.xlu1 %v3663_v38, %s2776_s22  ;;  %v1992_v51 = vpop.permute.xlu0 %1991 }
 0x2d1   :  { %2032 = vst.msk [vmem:[#allocation5 + $0x40] sm:$0xff] %vm2023_vm9, %v1992_v51 }
 0x2d2   :  { %1910 = vrot.lane.b32.xlu0 %v1873_v55, %s2772_s10 }
 0x2d4   :  { %1807 = vrot.lane.b32.xlu1 %v3663_v38, %s2779_s18  ;;  %v1696_v13 = vpop.permute.xlu0 %1695 }
 0x2d6   :  { %1975 = vrot.lane.b32.xlu0 %v1873_v55, %s2781_s11 }
 0x2d8   :  { %2068 = vrot.lane.b32.xlu1 %v1889_v33, %s2780_s2  ;;  %v1994_v57 = vpop.permute.xlu0 %1993 }
 0x2da   :  { %v1595_v60 = vpop.permute.xlu1 %1594  ;;  %1977 = vrot.lane.b32.xlu0 %v3673_v48, %s2781_s11 }
 0x2db   :  { %1632 = vst.msk [vmem:[#allocation5 + $0x58] sm:$0xff] %vm1620_vm4, %v1595_v60 }
 0x2dc   :  { %1733 = vst.msk [vmem:[#allocation5 + $0x58] sm:$0xff] %vm1721_vm5, %v1696_v13  ;;  %1837 = vrot.lane.b32.xlu1 %v1656_v59, %s2779_s18  ;;  %v1530_v62 = vpop.permute.xlu0 %1529 }
 0x2dd   :  { %1566 = vst.msk [vmem:[#allocation5 + $0x60] sm:$0xff] %vm1553_vm3, %v1530_v62  ;;  %v4117_v62 = vld [vmem:[%s4214_s4] ss:$0 sm:$0xff]  ;;  %s2783_s4 = smov [#allocation7]  }
 0x2de   :  { %v1927_v38 = vpop.permute.xlu1 %1926  ;;  %2042 = vrot.lane.b32.xlu0 %v3673_v48, %s2780_s2 }
 0x2df   :  { %1966 = vst.msk [vmem:[#allocation5 + $0x48] sm:$0xff] %vm1956_vm8, %v1927_v38 }
 0x2e0   :  { %2033 = vst.msk [vmem:[#allocation5 + $0x48] sm:$0xff] %vm2023_vm9, %v1994_v57  ;;  %1936 = vrot.lane.b32.xlu1 %v1888_v49, %s2772_s10  ;;  %v1828_v1 = vpop.permute.xlu0 %1827 }
 0x2e2   :  { %v740_v3 = vpop.permute.xlu1 %739  ;;  %2044 = vrot.lane.b32.xlu0 %v3701_v53, %s2780_s2  ;;  %v1890_v53 = vld [vmem:[#allocation3 + $0x122] sm:$0xff] }
 0x2e3   :  { %775 = vst.msk [vmem:[#allocation5 + $0x68] sm:$0xff] %vm761_vm0, %v740_v3 }
 0x2e4   :  { %1486 = vst.msk [vmem:[#allocation5 + $0x68] sm:$0xff] %vm1384_vm13, %v3859_v31  ;;  %1938 = vrot.lane.b32.xlu1 %v1889_v33, %s2772_s10  ;;  %v1532_v4 = vpop.permute.xlu0 %1531  ;;  %v1453_v31 = vld [vmem:[#allocation3] sm:$0xff] }
 0x2e5   :  { %1567 = vst.msk [vmem:[#allocation5 + $0x68] sm:$0xff] %vm1553_vm3, %v1532_v4 }
 0x2e6   :  { %v1761_v5 = vpop.permute.xlu1 %1760 }
 0x2e7   :  { %1799 = vst.msk [vmem:[#allocation5 + $0x50] sm:$0xff] %vm1788_vm6, %v1761_v5 }
 0x2e8   :  { %1866 = vst.msk [vmem:[#allocation5 + $0x50] sm:$0xff] %vm1855_vm7, %v1828_v1  ;;  %2003 = vrot.lane.b32.xlu1 %v1889_v33, %s2781_s11  ;;  %v1830_v48 = vpop.permute.xlu0 %1829 }
 0x2ea   :  { %v2059_v7 = vpop.permute.xlu1 %2058 }
 0x2eb   :  { %2099 = vst.msk [vmem:[#allocation5 + $0x40] sm:$0xff] %vm2090_vm10, %v2059_v7 }
 0x2ec   :  { %2005 = vrot.lane.b32.xlu1 %v1890_v53, %s2781_s11  ;;  %v714_v10 = vpop.permute.xlu0 %713 }
 0x2ed   :  { %762 = vst.msk [vmem:[#allocation5] sm:$0xff] %vm761_vm0, %v714_v10 }
 0x2ee   :  { %v1763_v25 = vpop.permute.xlu1 %1762  ;;  %1473 = vst.msk [vmem:[#allocation5] sm:$0xff] %vm1384_vm13, %v1453_v31 }
 0x2ef   :  { %1800 = vst.msk [vmem:[#allocation5 + $0x58] sm:$0xff] %vm1788_vm6, %v1763_v25 }
 0x2f0   :  { %1867 = vst.msk [vmem:[#allocation5 + $0x58] sm:$0xff] %vm1855_vm7, %v1830_v48  ;;  %2070 = vrot.lane.b32.xlu1 %v1890_v53, %s2780_s2  ;;  %v1599_v11 = vpop.permute.xlu0 %1598 }
 0x2f1   :  { %1634 = vst.msk [vmem:[#allocation5 + $0x68] sm:$0xff] %vm1620_vm4, %v1599_v11 }
 0x2f2   :  { %v2061_v63 = vpop.permute.xlu1 %2060  ;;  %v2115_v14 = vld [vmem:[#allocation5 + $0x40] sm:$0xff] }
 0x2f3   :  { %2100 = vst.msk [vmem:[#allocation5 + $0x48] sm:$0xff] %vm2090_vm10, %v2061_v63  ;;  %2669 = vmatprep.mubr.msk.f32.mxu1 %vm2140_vm11, %v2115_v14 }
 0x2f4   :  { %2072 = vrot.lane.b32.xlu1 %v1891_v12, %s2780_s2  ;;  %v1931_v15 = vpop.permute.xlu0 %1930 }
 0x2f5   :  { %1968 = vst.msk [vmem:[#allocation5 + $0x58] sm:$0xff] %vm1956_vm8, %v1931_v15 }
 0x2f6   :  { %v1597_v16 = vpop.permute.xlu1 %1596 }
 0x2f7   :  { %1633 = vst.msk [vmem:[#allocation5 + $0x60] sm:$0xff] %vm1620_vm4, %v1597_v16 }
 0x2f8   :  { %v716_v17 = vpop.permute.xlu0 %715 }
 0x2f9   :  { %763 = vst.msk [vmem:[#allocation5 + $0x8] sm:$0xff] %vm761_vm0, %v716_v17 }
 0x2fa   :  { %v1929_v19 = vpop.permute.xlu1 %1928  ;;  %v2116_v20 = vld [vmem:[#allocation5 + $0x48] sm:$0xff]  ;;  %1474 = vst.msk [vmem:[#allocation5 + $0x8] sm:$0xff] %vm1384_vm13, %v3958_v32 }
 0x2fb   :  { %1967 = vst.msk [vmem:[#allocation5 + $0x50] sm:$0xff] %vm1956_vm8, %v1929_v19  ;;  %2670 = vmatmul.mubr.msk.f32.gmra.mrb[6].mxu1 %vm2140_vm11, %v2116_v20 }
 0x2fc   :  { %v1700_v0 = vpop.permute.xlu0 %1699 }
 0x2fd   :  { %1735 = vst.msk [vmem:[#allocation5 + $0x68] sm:$0xff] %vm1721_vm5, %v1700_v0 }
 0x2fe   :  { %v742_v22 = vpop.permute.xlu1 %741 }
 0x2ff   :  { %776 = vst.msk [vmem:[#allocation5 + $0x70] sm:$0xff] %vm761_vm0, %v742_v22 }
 0x300   :  { %1487 = vst.msk [vmem:[#allocation5 + $0x70] sm:$0xff] %vm1384_vm13, %v3894_v52  ;;  %v1998_v23 = vpop.permute.xlu0 %1997 }
 0x301   :  { %2035 = vst.msk [vmem:[#allocation5 + $0x58] sm:$0xff] %vm2023_vm9, %v1998_v23 }
 0x302   :  { %v1698_v40 = vpop.permute.xlu1 %1697 }
 0x303   :  { %1734 = vst.msk [vmem:[#allocation5 + $0x60] sm:$0xff] %vm1721_vm5, %v1698_v40 }
 0x304   :  { %v1506_v24 = vpop.permute.xlu0 %1505 }
 0x305   :  { %1554 = vst.msk [vmem:[#allocation5] sm:$0xff] %vm1553_vm3, %v1506_v24 }
 0x306   :  { %v1996_v26 = vpop.permute.xlu1 %1995 }
 0x307   :  { %2034 = vst.msk [vmem:[#allocation5 + $0x50] sm:$0xff] %vm2023_vm9, %v1996_v26 }
 0x308   :  { %v1767_v32 = vpop.permute.xlu0 %1766 }
 0x309   :  { %1802 = vst.msk [vmem:[#allocation5 + $0x68] sm:$0xff] %vm1788_vm6, %v1767_v32 }
 0x30a   :  { %v744_v21 = vpop.permute.xlu1 %743 }
 0x30b   :  { %777 = vst.msk [vmem:[#allocation5 + $0x78] sm:$0xff] %vm761_vm0, %v744_v21 }
 0x30c   :  { %1488 = vst.msk [vmem:[#allocation5 + $0x78] sm:$0xff] %vm1384_vm13, %v3915_v6  ;;  %v2065_v52 = vpop.permute.xlu0 %2064 }
 0x30d   :  { %2102 = vst.msk [vmem:[#allocation5 + $0x58] sm:$0xff] %vm2090_vm10, %v2065_v52 }
 0x30e   :  { %v1765_v9 = vpop.permute.xlu1 %1764 }
 0x30f   :  { %1801 = vst.msk [vmem:[#allocation5 + $0x60] sm:$0xff] %vm1788_vm6, %v1765_v9 }
 0x310   :  { %v1536_v27 = vpop.permute.xlu0 %1535 }
 0x311   :  { %1569 = vst.msk [vmem:[#allocation5 + $0x78] sm:$0xff] %vm1553_vm3, %v1536_v27 }
 0x312   :  { %v2063_v28 = vpop.permute.xlu1 %2062 }
 0x313   :  { %2101 = vst.msk [vmem:[#allocation5 + $0x50] sm:$0xff] %vm2090_vm10, %v2063_v28 }
 0x314   :  { %v1601_v37 = vpop.permute.xlu0 %1600  ;;  %v2118_v29 = vld [vmem:[#allocation5 + $0x58] sm:$0xff] }
 0x316   :  { %v1534_v42 = vpop.permute.xlu1 %1533 }
 0x317   :  { %1568 = vst.msk [vmem:[#allocation5 + $0x70] sm:$0xff] %vm1553_vm3, %v1534_v42 }
 0x318   :  { %1635 = vst.msk [vmem:[#allocation5 + $0x70] sm:$0xff] %vm1620_vm4, %v1601_v37  ;;  %v1933_v58 = vpop.permute.xlu0 %1932 }
 0x31a   :  { %v1832_v6 = vpop.permute.xlu1 %1831  ;;  %v2117_v18 = vld [vmem:[#allocation5 + $0x50] sm:$0xff] }
 0x31b   :  { %1868 = vst.msk [vmem:[#allocation5 + $0x60] sm:$0xff] %vm1855_vm7, %v1832_v6  ;;  %2672 = vmatprep.mubr.msk.f32.mxu1 %vm2140_vm11, %v2117_v18 }
 0x31c   :  { %1969 = vst.msk [vmem:[#allocation5 + $0x60] sm:$0xff] %vm1956_vm8, %v1933_v58  ;;  %2673 = vmatmul.mubr.msk.f32.gmra.mrb[8].mxu1 %vm2140_vm11, %v2118_v29  ;;  %v1603_v54 = vpop.permute.xlu0 %1602 }
 0x31d   :  { %1636 = vst.msk [vmem:[#allocation5 + $0x78] sm:$0xff] %vm1620_vm4, %v1603_v54 }
 0x31e   :  { %v1508_v30 = vpop.permute.xlu1 %1507 }
 0x31f   :  { %1555 = vst.msk [vmem:[#allocation5 + $0x8] sm:$0xff] %vm1553_vm3, %v1508_v30 }
 0x320   :  { %v1702_v2 = vpop.permute.xlu0 %1701 }
 0x321   :  { %1736 = vst.msk [vmem:[#allocation5 + $0x70] sm:$0xff] %vm1721_vm5, %v1702_v2 }
 0x322   :  { %v1573_v56 = vpop.permute.xlu1 %1572 }
 0x323   :  { %1621 = vst.msk [vmem:[#allocation5] sm:$0xff] %vm1620_vm4, %v1573_v56 }
 0x324   :  { %v2000_v34 = vpop.permute.xlu0 %1999 }
 0x325   :  { %2036 = vst.msk [vmem:[#allocation5 + $0x60] sm:$0xff] %vm2023_vm9, %v2000_v34 }
 0x326   :  { %v1834_v39 = vpop.permute.xlu1 %1833 }
 0x327   :  { %1869 = vst.msk [vmem:[#allocation5 + $0x68] sm:$0xff] %vm1855_vm7, %v1834_v39 }
 0x328   :  { %v1704_v35 = vpop.permute.xlu0 %1703 }
 0x329   :  { %1737 = vst.msk [vmem:[#allocation5 + $0x78] sm:$0xff] %vm1721_vm5, %v1704_v35 }
 0x32a   :  { %v1575_v49 = vpop.permute.xlu1 %1574 }
 0x32b   :  { %1622 = vst.msk [vmem:[#allocation5 + $0x8] sm:$0xff] %vm1620_vm4, %v1575_v49 }
 0x32c   :  { %v1769_v36 = vpop.permute.xlu0 %1768 }
 0x32d   :  { %1803 = vst.msk [vmem:[#allocation5 + $0x70] sm:$0xff] %vm1788_vm6, %v1769_v36 }
 0x32e   :  { %v1674_v41 = vpop.permute.xlu1 %1673 }
 0x32f   :  { %1722 = vst.msk [vmem:[#allocation5] sm:$0xff] %vm1721_vm5, %v1674_v41 }
 0x330   :  { %v2067_v43 = vpop.permute.xlu0 %2066 }
 0x331   :  { %2103 = vst.msk [vmem:[#allocation5 + $0x60] sm:$0xff] %vm2090_vm10, %v2067_v43 }
 0x332   :  { %v1935_v44 = vpop.permute.xlu1 %1934 }
 0x333   :  { %1970 = vst.msk [vmem:[#allocation5 + $0x68] sm:$0xff] %vm1956_vm8, %v1935_v44 }
 0x334   :  { %v1771_v8 = vpop.permute.xlu0 %1770 }
 0x335   :  { %1804 = vst.msk [vmem:[#allocation5 + $0x78] sm:$0xff] %vm1788_vm6, %v1771_v8 }
 0x336   :  { %v1676_v45 = vpop.permute.xlu1 %1675 }
 0x337   :  { %1723 = vst.msk [vmem:[#allocation5 + $0x8] sm:$0xff] %vm1721_vm5, %v1676_v45 }
 0x338   :  { %v1836_v46 = vpop.permute.xlu0 %1835  ;;  %v2119_v61 = vld [vmem:[#allocation5 + $0x60] sm:$0xff] }
 0x339   :  { %1870 = vst.msk [vmem:[#allocation5 + $0x70] sm:$0xff] %vm1855_vm7, %v1836_v46  ;;  %2675 = vmatprep.mubr.msk.f32.mxu1 %vm2140_vm11, %v2119_v61 }
 0x33a   :  { %v1741_v47 = vpop.permute.xlu1 %1740 }
 0x33b   :  { %1789 = vst.msk [vmem:[#allocation5] sm:$0xff] %vm1788_vm6, %v1741_v47 }
 0x33c   :  { %v1810_v50 = vpop.permute.xlu0 %1809 }
 0x33e   :  { %v2002_v51 = vpop.permute.xlu1 %2001 }
 0x33f   :  { %2037 = vst.msk [vmem:[#allocation5 + $0x68] sm:$0xff] %vm2023_vm9, %v2002_v51 }
 0x340   :  { %v1909_v55 = vpop.permute.xlu0 %1908 }
 0x342   :  { %v1743_v13 = vpop.permute.xlu1 %1742 }
 0x343   :  { %1790 = vst.msk [vmem:[#allocation5 + $0x8] sm:$0xff] %vm1788_vm6, %v1743_v13 }
 0x344   :  { %1857 = vst.msk [vmem:[#allocation5 + $0x8] sm:$0xff] %vm1855_vm7, %v1810_v50  ;;  %v1911_v33 = vpop.permute.xlu0 %1910 }
 0x345   :  { %1958 = vst.msk [vmem:[#allocation5 + $0x8] sm:$0xff] %vm1956_vm8, %v1911_v33 }
 0x346   :  { %v1808_v57 = vpop.permute.xlu1 %1807 }
 0x347   :  { %1856 = vst.msk [vmem:[#allocation5] sm:$0xff] %vm1855_vm7, %v1808_v57 }
 0x348   :  { %1957 = vst.msk [vmem:[#allocation5] sm:$0xff] %vm1956_vm8, %v1909_v55  ;;  %v1976_v59 = vpop.permute.xlu0 %1975 }
 0x349   :  { %2024 = vst.msk [vmem:[#allocation5] sm:$0xff] %vm2023_vm9, %v1976_v59 }
 0x34a   :  { %v2069_v60 = vpop.permute.xlu1 %2068 }
 0x34b   :  { %2104 = vst.msk [vmem:[#allocation5 + $0x68] sm:$0xff] %vm2090_vm10, %v2069_v60 }
 0x34c   :  { %v1978_v4 = vpop.permute.xlu0 %1977 }
 0x34d   :  { %v2662_v38 = vpop.f32.mrb[0].mxu1  ;;  %2025 = vst.msk [vmem:[#allocation5 + $0x8] sm:$0xff] %vm2023_vm9, %v1978_v4 }
 0x34e   :  { %v2274_v1 = vadd.f32 %v2662_v38, %v4117_v62  ;;  %v2268_v3 = vpop.f32.mrb[1].mxu1  ;;  %v1838_v48 = vpop.permute.xlu1 %1837 }
 0x34f   :  { %v2269_v5 = vadd.f32 %v4117_v62, %v2268_v3  ;;  %1871 = vst.msk [vmem:[#allocation5 + $0x78] sm:$0xff] %vm1855_vm7, %v1838_v48 }
 0x350   :  { %v2340_v7 = vmax.f32 %v2274_v1, 0.0  ;;  %v2043_v31 = vpop.permute.xlu0 %2042 }
 0x351   :  { %v2339_v53 = vmax.f32 %v2269_v5, 0.0  ;;  %2091 = vst.msk [vmem:[#allocation5] sm:$0xff] %vm2090_vm10, %v2043_v31 }
 0x352   :  { %2356 = vst.msk [vmem:[#allocation6 + $0x18] sm:$0xff] %vm1384_vm13, %v2340_v7  ;;  %v1937_v10 = vpop.permute.xlu1 %1936  ;;  %v2120_v25 = vld [vmem:[#allocation5 + $0x68] sm:$0xff] }
 0x353   :  { %2355 = vst.msk [vmem:[#allocation6 + $0x10] sm:$0xff] %vm1384_vm13, %v2339_v53  ;;  %2676 = vmatmul.mubr.msk.f32.gmra.mrb[10].mxu1 %vm2140_vm11, %v2120_v25 }
 0x354   :  { %1971 = vst.msk [vmem:[#allocation5 + $0x70] sm:$0xff] %vm1956_vm8, %v1937_v10  ;;  %v2045_v11 = vpop.permute.xlu0 %2044 }
 0x355   :  { %2092 = vst.msk [vmem:[#allocation5 + $0x8] sm:$0xff] %vm2090_vm10, %v2045_v11 }
 0x356   :  { %v1939_v12 = vpop.permute.xlu1 %1938 }
 0x357   :  { %1972 = vst.msk [vmem:[#allocation5 + $0x78] sm:$0xff] %vm1956_vm8, %v1939_v12 }
 0x358   :  { %v2107_v63 = vld [vmem:[#allocation5] sm:$0xff] }
 0x359   :  { %2657 = vmatprep.mubr.msk.f32.mxu0 %vm2140_vm11, %v2107_v63 }
 0x35a   :  { %v2004_v14 = vpop.permute.xlu1 %2003 }
 0x35b   :  { %2038 = vst.msk [vmem:[#allocation5 + $0x70] sm:$0xff] %vm2023_vm9, %v2004_v14 }
 0x35c   :  { %v2108_v15 = vld [vmem:[#allocation5 + $0x8] sm:$0xff] }
 0x35d   :  { %2658 = vmatmul.mubr.msk.f32.vlgmr.msra.gmra.mrb[16].mxu0 %vm2140_vm11, %v2108_v15 }
 0x35e   :  { %v2006_v16 = vpop.permute.xlu1 %2005 }
 0x35f   :  { %2039 = vst.msk [vmem:[#allocation5 + $0x78] sm:$0xff] %vm2023_vm9, %v2006_v16 }
 0x362   :  { %v2071_v17 = vpop.permute.xlu1 %2070 }
 0x363   :  { %2105 = vst.msk [vmem:[#allocation5 + $0x70] sm:$0xff] %vm2090_vm10, %v2071_v17 }
 0x366   :  { %v2073_v19 = vpop.permute.xlu1 %2072 }
 0x367   :  { %2106 = vst.msk [vmem:[#allocation5 + $0x78] sm:$0xff] %vm2090_vm10, %v2073_v19 }
 0x369   :  { %v2665_v20 = vpop.f32.mrb[2].mxu1 }
 0x36a   :  { %v2284_v0 = vadd.f32 %v2665_v20, %v4117_v62  ;;  %v2278_v22 = vpop.f32.mrb[3].mxu1  ;;  %v2121_v40 = vld [vmem:[#allocation5 + $0x70] sm:$0xff] }
 0x36b   :  { %v2279_v23 = vadd.f32 %v4117_v62, %v2278_v22  ;;  %2678 = vmatprep.mubr.msk.f32.mxu1 %vm2140_vm11, %v2121_v40 }
 0x36c   :  { %v2342_v24 = vmax.f32 %v2284_v0, 0.0 }
 0x36d   :  { %v2341_v26 = vmax.f32 %v2279_v23, 0.0 }
 0x36e   :  { %2358 = vst.msk [vmem:[#allocation6 + $0x28] sm:$0xff] %vm1384_vm13, %v2342_v24  ;;  %v2122_v32 = vld [vmem:[#allocation5 + $0x78] sm:$0xff] }
 0x36f   :  { %2357 = vst.msk [vmem:[#allocation6 + $0x20] sm:$0xff] %vm1384_vm13, %v2341_v26  ;;  %2679 = vmatmul.mubr.msk.f32.gmra.mrb[12].mxu1 %vm2140_vm11, %v2122_v32 }
 0x398   :  { %v2668_v21 = vpop.f32.mrb[4].mxu1 }
 0x399   :  { %v2294_v52 = vadd.f32 %v2668_v21, %v4117_v62  ;;  %v2288_v9 = vpop.f32.mrb[5].mxu1 }
 0x39a   :  { %v2289_v27 = vadd.f32 %v4117_v62, %v2288_v9 }
 0x39b   :  { %v2344_v28 = vmax.f32 %v2294_v52, 0.0 }
 0x39c   :  { %v2343_v37 = vmax.f32 %v2289_v27, 0.0 }
 0x39d   :  { %2360 = vst.msk [vmem:[#allocation6 + $0x38] sm:$0xff] %vm1384_vm13, %v2344_v28 }
 0x39e   :  { %2359 = vst.msk [vmem:[#allocation6 + $0x30] sm:$0xff] %vm1384_vm13, %v2343_v37 }
 0x3a5   :  { %v2380_v13 = vld [vmem:[#allocation6 + $0x1] ss:$8 sm:$0xf0]  ;;  %v2370_v59 = vld [vmem:[#allocation6] ss:$8 sm:$0xf0] }
 0x3a6   :  { %v2398_v1 = vld [vmem:[#allocation6 + $0x2] ss:$8 sm:$0xf0]  ;;  %v2416_v25 = vld [vmem:[#allocation6 + $0x3] ss:$8 sm:$0xf0] }
 0x3a7   :  { %v2434_v63 = vld [vmem:[#allocation6 + $0x4] ss:$8 sm:$0xf0]  ;;  %v2470_v23 = vld [vmem:[#allocation6 + $0x6] ss:$8 sm:$0xf0] }
 0x3a8   :  { %v2488_v28 = vld [vmem:[#allocation6 + $0x7] ss:$8 sm:$0xf0] }
 0x3ce   :  { %v2671_v42 = vpop.f32.mrb[6].mxu1 }
 0x3cf   :  { %v2304_v58 = vadd.f32 %v2671_v42, %v4117_v62  ;;  %v2298_v6 = vpop.f32.mrb[7].mxu1 }
 0x3d0   :  { %v2299_v18 = vadd.f32 %v4117_v62, %v2298_v6 }
 0x3d1   :  { %v2346_v29 = vmax.f32 %v2304_v58, 0.0 }
 0x3d2   :  { %v2345_v54 = vmax.f32 %v2299_v18, 0.0 }
 0x3d3   :  { %2362 = vst.msk [vmem:[#allocation6 + $0x48] sm:$0xff] %vm1384_vm13, %v2346_v29 }
 0x3d4   :  { %2361 = vst.msk [vmem:[#allocation6 + $0x40] sm:$0xff] %vm1384_vm13, %v2345_v54 }
 0x3ef   :  { %v2674_v30 = vpop.f32.mrb[8].mxu1 }
 0x3f0   :  { %v2314_v2 = vadd.f32 %v2674_v30, %v4117_v62  ;;  %v2308_v56 = vpop.f32.mrb[9].mxu1 }
 0x3f1   :  { %v2309_v34 = vadd.f32 %v4117_v62, %v2308_v56 }
 0x3f2   :  { %v2348_v39 = vmax.f32 %v2314_v2, 0.0 }
 0x3f3   :  { %v2347_v35 = vmax.f32 %v2309_v34, 0.0 }
 0x3f4   :  { %2364 = vst.msk [vmem:[#allocation6 + $0x58] sm:$0xff] %vm1384_vm13, %v2348_v39 }
 0x3f5   :  { %2363 = vst.msk [vmem:[#allocation6 + $0x50] sm:$0xff] %vm1384_vm13, %v2347_v35 }
 0x3fc   :  { %v2383_v16 = vld [vmem:[#allocation6 + $0x41] ss:$8 sm:$0xf]  ;;  %v2373_v40 = vld [vmem:[#allocation6 + $0x40] ss:$8 sm:$0xf] }
 0x3fd   :  { %v2401_v26 = vld [vmem:[#allocation6 + $0x42] ss:$8 sm:$0xf]  ;;  %v2419_v37 = vld [vmem:[#allocation6 + $0x43] ss:$8 sm:$0xf] }
 0x3fe   :  { %v2437_v18 = vld [vmem:[#allocation6 + $0x44] ss:$8 sm:$0xf]  ;;  %v2455_v30 = vld [vmem:[#allocation6 + $0x45] ss:$8 sm:$0xf] }
 0x3ff   :  { %v2473_v34 = vld [vmem:[#allocation6 + $0x46] ss:$8 sm:$0xf] }
 0x426   :  { %v2677_v49 = vpop.f32.mrb[10].mxu1 }
 0x427   :  { %v2324_v36 = vadd.f32 %v2677_v49, %v4117_v62  ;;  %v2318_v41 = vpop.f32.mrb[11].mxu1  ;;  %v2491_v49 = vld [vmem:[#allocation6 + $0x47] ss:$8 sm:$0xf] }
 0x428   :  { %v2319_v43 = vadd.f32 %v4117_v62, %v2318_v41 }
 0x429   :  { %v2350_v44 = vmax.f32 %v2324_v36, 0.0 }
 0x42a   :  { %v2349_v8 = vmax.f32 %v2319_v43, 0.0 }
 0x42b   :  { %2366 = vst.msk [vmem:[#allocation6 + $0x68] sm:$0xff] %vm1384_vm13, %v2350_v44 }
 0x42c   :  { %2365 = vst.msk [vmem:[#allocation6 + $0x60] sm:$0xff] %vm1384_vm13, %v2349_v8 }
 0x430   :  { %v2659_v45 = vpop.f32.mrb[16].mxu0 }
 0x431   :  { %v2264_v46 = vadd.f32 %v2659_v45, %v4117_v62  ;;  %v2258_v61 = vpop.f32.mrb[17].mxu0 }
 0x432   :  { %v2259_v47 = vadd.f32 %v4117_v62, %v2258_v61 }
 0x433   :  { %v2338_v50 = vmax.f32 %v2264_v46, 0.0 }
 0x434   :  { %v2337_v51 = vmax.f32 %v2259_v47, 0.0 }
 0x435   :  { %2354 = vst.msk [vmem:[#allocation6 + $0x8] sm:$0xff] %vm1384_vm13, %v2338_v50 }
 0x436   :  { %2353 = vst.msk [vmem:[#allocation6] sm:$0xff] %vm1384_vm13, %v2337_v51 }
 0x43d   :  { %v2379_v55 = vld [vmem:[#allocation6 + $0x1] ss:$8 sm:$0xf]  ;;  %v2397_v57 = vld [vmem:[#allocation6 + $0x2] ss:$8 sm:$0xf] }
 0x43e   :  { %v2381_v33 = vor.u32 %v2380_v13, %v2379_v55  ;;  %v2369_v60 = vld [vmem:[#allocation6] ss:$8 sm:$0xf]  ;;  %v2399_v48 = vor.u32 %v2398_v1, %v2397_v57  ;;  %v2415_v53 = vld [vmem:[#allocation6 + $0x3] ss:$8 sm:$0xf] }
 0x43f   :  { %v2371_v3 = vor.u32 %v2370_v59, %v2369_v60  ;;  %v2417_v11 = vor.u32 %v2416_v25, %v2415_v53  ;;  %v2433_v12 = vld [vmem:[#allocation6 + $0x4] ss:$8 sm:$0xf]  ;;  %v2451_v15 = vld [vmem:[#allocation6 + $0x5] ss:$8 sm:$0xf] }
 0x440   :  { %2388 = vrot.lane.b32.xlu0 %v2381_v33, %s2774_s17  ;;  %v2435_v14 = vor.u32 %v2434_v63, %v2433_v12  ;;  %v2469_v0 = vld [vmem:[#allocation6 + $0x6] ss:$8 sm:$0xf]  ;;  %v2487_v9 = vld [vmem:[#allocation6 + $0x7] ss:$8 sm:$0xf] }
 0x441   :  { %2376 = vst.msk [vmem:[#allocation7] sm:$0xff] %vm1384_vm13, %v2371_v3  ;;  %v2471_v32 = vor.u32 %v2470_v23, %v2469_v0  ;;  %v2489_v42 = vor.u32 %v2488_v28, %v2487_v9 }
 0x442   :  { %v2680_v38 = vpop.f32.mrb[12].mxu1 }
 0x443   :  { %v2334_v4 = vadd.f32 %v2680_v38, %v4117_v62  ;;  %v2328_v5 = vpop.f32.mrb[13].mxu1 }
 0x444   :  { %v2329_v7 = vadd.f32 %v4117_v62, %v2328_v5  ;;  %2406 = vrot.lane.b32.xlu0 %v2399_v48, %s2772_s10  ;;  %v2452_v62 = vld [vmem:[#allocation6 + $0x5] ss:$8 sm:$0xf0] }
 0x445   :  { %v2352_v31 = vmax.f32 %v2334_v4, 0.0  ;;  %v2453_v19 = vor.u32 %v2452_v62, %v2451_v15 }
 0x446   :  { %v2351_v10 = vmax.f32 %v2329_v7, 0.0 }
 0x447   :  { %2368 = vst.msk [vmem:[#allocation6 + $0x78] sm:$0xff] %vm1384_vm13, %v2352_v31 }
 0x448   :  { %2367 = vst.msk [vmem:[#allocation6 + $0x70] sm:$0xff] %vm1384_vm13, %v2351_v10  ;;  %2424 = vrot.lane.b32.xlu0 %v2417_v11, %s2769_s14 }
 0x44c   :  { %2442 = vrot.lane.b32.xlu0 %v2435_v14, %s2776_s22 }
 0x44f   :  { %v2384_v17 = vld [vmem:[#allocation6 + $0x41] ss:$8 sm:$0xf0]  ;;  %v2402_v22 = vld [vmem:[#allocation6 + $0x42] ss:$8 sm:$0xf0] }
 0x450   :  { %v2385_v20 = vor.u32 %v2384_v17, %v2383_v16  ;;  %2460 = vrot.lane.b32.xlu0 %v2453_v19, %s2781_s11  ;;  %v2374_v24 = vld [vmem:[#allocation6 + $0x40] ss:$8 sm:$0xf0]  ;;  %v2403_v52 = vor.u32 %v2402_v22, %v2401_v26  ;;  %v2420_v27 = vld [vmem:[#allocation6 + $0x43] ss:$8 sm:$0xf0] }
 0x451   :  { %v2375_v21 = vor.u32 %v2374_v24, %v2373_v40  ;;  %v2421_v58 = vor.u32 %v2420_v27, %v2419_v37  ;;  %v2438_v6 = vld [vmem:[#allocation6 + $0x44] ss:$8 sm:$0xf0]  ;;  %v2456_v54 = vld [vmem:[#allocation6 + $0x45] ss:$8 sm:$0xf0] }
 0x452   :  { %2390 = vrot.lane.b32.xlu1 %v2385_v20, %s2774_s17  ;;  %v2439_v29 = vor.u32 %v2438_v6, %v2437_v18  ;;  %v2457_v2 = vor.u32 %v2456_v54, %v2455_v30  ;;  %v2474_v56 = vld [vmem:[#allocation6 + $0x46] ss:$8 sm:$0xf0]  ;;  %v2492_v35 = vld [vmem:[#allocation6 + $0x47] ss:$8 sm:$0xf0] }
 0x453   :  { %2377 = vst.msk [vmem:[#allocation7 + $0x8] sm:$0xff] %vm1384_vm13, %v2375_v21  ;;  %v2475_v39 = vor.u32 %v2474_v56, %v2473_v34  ;;  %v2493_v36 = vor.u32 %v2492_v35, %v2491_v49 }
 0x454   :  { %2478 = vrot.lane.b32.xlu0 %v2471_v32, %s2778_s15 }
 0x456   :  { %2408 = vrot.lane.b32.xlu1 %v2403_v52, %s2772_s10 }
 0x458   :  { %2496 = vrot.lane.b32.xlu0 %v2489_v42, %s2779_s18 }
 0x45a   :  { %2426 = vrot.lane.b32.xlu1 %v2421_v58, %s2769_s14  ;;  %s2509_s14 = sshll.u32 %s2783_s4, 4  ;;  %s2510_s14 = int_to_ptr.vmem [resolvable:$true] %s2509_s14 }
 0x45b   :  { %s2744_s10 = scalar_lea.vmem %s2510_s14, 256  ;;  %p2749_p1 = scmp.lt.s32.totalorder %s2510_s14, %s2510_s14 }
 0x45c   :  { %p2745_p0 = scmp.ne.s32.totalorder %s2510_s14, %s2744_s10  ;;  %p2750_p2 = scmp.lt.s32.totalorder %s2744_s10, %s2744_s10 }
 0x45e   :  { %2444 = vrot.lane.b32.xlu1 %v2439_v29, %s2776_s22  ;;  %p2751_p3 = por %p2750_p2, %p2749_p1 }
 0x460   :  { %p2752_p4 = pnand %p2751_p3, %p2745_p0 }
 0x462   :  { %2462 = vrot.lane.b32.xlu1 %v2457_v2, %s2781_s11 }
 0x466   :  { %2480 = vrot.lane.b32.xlu1 %v2475_v39, %s2778_s15 }
 0x46a   :  { %2498 = vrot.lane.b32.xlu1 %v2493_v36, %s2779_s18 }
 0x4b2   :  { %v2389_v41 = vpop.permute.xlu0 %2388 }
 0x4b3   :  { %2394 = vst.msk [vmem:[#allocation7] sm:$0xff] %vm1721_vm5, %v2389_v41 }
 0x4b6   :  { %v2407_v43 = vpop.permute.xlu0 %2406 }
 0x4b7   :  { %2412 = vst.msk [vmem:[#allocation7] sm:$0xff] %vm1956_vm8, %v2407_v43 }
 0x4ba   :  { %v2425_v44 = vpop.permute.xlu0 %2424 }
 0x4bb   :  { %2430 = vst.msk [vmem:[#allocation7] sm:$0xff] %vm1553_vm3, %v2425_v44 }
 0x4be   :  { %v2443_v8 = vpop.permute.xlu0 %2442 }
 0x4bf   :  { %2448 = vst.msk [vmem:[#allocation7] sm:$0xff] %vm1788_vm6, %v2443_v8 }
 0x4c2   :  { %v2461_v45 = vpop.permute.xlu0 %2460 }
 0x4c3   :  { %2466 = vst.msk [vmem:[#allocation7] sm:$0xff] %vm2023_vm9, %v2461_v45 }
 0x4c4   :  { %v2391_v46 = vpop.permute.xlu1 %2390 }
 0x4c5   :  { %2395 = vst.msk [vmem:[#allocation7 + $0x8] sm:$0xff] %vm1721_vm5, %v2391_v46 }
 0x4c6   :  { %v2479_v61 = vpop.permute.xlu0 %2478 }
 0x4c7   :  { %2484 = vst.msk [vmem:[#allocation7] sm:$0xff] %vm1620_vm4, %v2479_v61 }
 0x4c8   :  { %v2409_v47 = vpop.permute.xlu1 %2408 }
 0x4c9   :  { %2413 = vst.msk [vmem:[#allocation7 + $0x8] sm:$0xff] %vm1956_vm8, %v2409_v47 }
 0x4ca   :  { %v2497_v50 = vpop.permute.xlu0 %2496 }
 0x4cb   :  { %2502 = vst.msk [vmem:[#allocation7] sm:$0xff] %vm1855_vm7, %v2497_v50 }
 0x4cc   :  { %v2427_v51 = vpop.permute.xlu1 %2426 }
 0x4cd   :  { %2431 = vst.msk [vmem:[#allocation7 + $0x8] sm:$0xff] %vm1553_vm3, %v2427_v51 }
 0x4d0   :  { %v2445_v55 = vpop.permute.xlu1 %2444 }
 0x4d1   :  { %2449 = vst.msk [vmem:[#allocation7 + $0x8] sm:$0xff] %vm1788_vm6, %v2445_v55 }
 0x4d4   :  { %v2463_v13 = vpop.permute.xlu1 %2462 }
 0x4d5   :  { %2467 = vst.msk [vmem:[#allocation7 + $0x8] sm:$0xff] %vm2023_vm9, %v2463_v13 }
 0x4d8   :  { %v2481_v33 = vpop.permute.xlu1 %2480 }
 0x4d9   :  { %2485 = vst.msk [vmem:[#allocation7 + $0x8] sm:$0xff] %vm1620_vm4, %v2481_v33 }
 0x4dc   :  { %v2499_v57 = vpop.permute.xlu1 %2498 }
 0x4dd   :  { %2503 = vst.msk [vmem:[#allocation7 + $0x8] sm:$0xff] %vm1855_vm7, %v2499_v57 }
 0x4de   :  { %2755 = shalt.err (!%p2752_p4)
}
 0x4df   :  { %s2756_s18 = scalar_lea.hbm %s4215_s5, 256 }
 0x4e0   :  { %p2757_p5 = scmp.ne.s32.totalorder %s4215_s5, %s2756_s18  ;;  %p2760_p6 = scmp.lt.u32.totalorder %s2756_s18, %s4215_s5 }
 0x4e2   :  { %p2762_p7 = pnand %p2760_p6, %p2757_p5 }
 0x4e4   :  { %2765 = shalt.err (!%p2762_p7)
}
 0x4e5   :  { %s2784_s19 = smov 128  }
 0x4e6   :  { %2515 = dma.vmem_to_hbm [thread:$0]  %s2510_s14, 256, %s4215_s5, [#allocation8], %s2784_s19, %s2784_s19, %s2774_s17  }
 0x4e7   :  { %2766 = dma.done.wait [#allocation8], 256  }
 0x4e8   :  { %2767 = vsyncadd [#allocation8], 4294967040 }
 0x4e9   :  { %2519 = vsyncpa [#allocation8], 1 }

</bundles_post_ra>
